<compile_context>
chip_gen: v7x
topology: tpu7x:2x2x1
jax: 0.10.0
libtpu: 0.0.40
codegen_flags: <defaults>
</compile_context>

<pallas_src>
import functools

import numpy as np
import jax
import jax.numpy as jnp
from jax.experimental import pallas as pl
from jax.experimental.pallas import tpu as pltpu


# ----------------------------------------------------------------------------------
# Deterministic parameter construction (mirrors STFT.__init__ / MelSpectrogram.__init__)
# ----------------------------------------------------------------------------------

def _hann_periodic(n: int) -> np.ndarray:
    # scipy.signal.get_window('hann', n, fftbins=True)
    k = np.arange(n)
    return 0.5 - 0.5 * np.cos(2.0 * np.pi * k / n)


def _hz_to_mel(f):
    # librosa Slaney mel scale (htk=False)
    f = np.asarray(f, dtype=np.float64)
    f_sp = 200.0 / 3
    mels = f / f_sp
    min_log_hz = 1000.0
    min_log_mel = min_log_hz / f_sp
    logstep = np.log(6.4) / 27.0
    return np.where(f >= min_log_hz,
                    min_log_mel + np.log(np.maximum(f, 1e-10) / min_log_hz) / logstep,
                    mels)


def _mel_to_hz(m):
    m = np.asarray(m, dtype=np.float64)
    f_sp = 200.0 / 3
    freqs = f_sp * m
    min_log_hz = 1000.0
    min_log_mel = min_log_hz / f_sp
    logstep = np.log(6.4) / 27.0
    return np.where(m >= min_log_mel,
                    min_log_hz * np.exp(logstep * (m - min_log_mel)),
                    freqs)


def _mel_filterbank(sr, n_fft, n_mels, fmin, fmax):
    # librosa.filters.mel with defaults (htk=False, norm='slaney')
    if fmax is None:
        fmax = sr / 2.0
    n_freqs = 1 + n_fft // 2
    fftfreqs = np.linspace(0.0, sr / 2.0, n_freqs)
    mel_f = _mel_to_hz(np.linspace(_hz_to_mel(fmin), _hz_to_mel(fmax), n_mels + 2))
    fdiff = np.diff(mel_f)
    ramps = mel_f[:, None] - fftfreqs[None, :]
    weights = np.zeros((n_mels, n_freqs), dtype=np.float64)
    for i in range(n_mels):
        lower = -ramps[i] / fdiff[i]
        upper = ramps[i + 2] / fdiff[i + 1]
        weights[i] = np.maximum(0.0, np.minimum(lower, upper))
    enorm = 2.0 / (mel_f[2:n_mels + 2] - mel_f[:n_mels])
    weights *= enorm[:, None]
    return weights.astype(np.float32)


def make_mel_params(filter_length, hop_length, n_mels, sampling_rate, mel_fmin, mel_fmax):
    cutoff = filter_length // 2 + 1
    fourier = np.fft.fft(np.eye(filter_length))
    real_b = np.real(fourier[:cutoff, :])
    imag_b = np.imag(fourier[:cutoff, :])
    # win_length == filter_length here, so pad_center is a no-op.
    win = _hann_periodic(filter_length)
    real_b = (real_b * win[None, :]).astype(np.float32)   # [cutoff, filter_length]
    imag_b = (imag_b * win[None, :]).astype(np.float32)   # [cutoff, filter_length]
    mel_basis = _mel_filterbank(sampling_rate, filter_length, n_mels, mel_fmin, mel_fmax)
    return real_b, imag_b, mel_basis                       # mel_basis: [n_mels, cutoff]


def _round_up(x, m):
    return ((x + m - 1) // m) * m


# ----------------------------------------------------------------------------------
# Pallas kernel: fused framing + STFT-magnitude + mel projection + log, tiled over
# (batch, time).  One grid step produces a lane-dense [n_mels, TQ] output block.
# ----------------------------------------------------------------------------------

def _mel_kernel(cur_ref, look_ref, basis_ref, mel_ref, out_ref, *,
                tq, r, hop, c_pad, n_mels):
    # cur_ref  : [1, TQ,   hop] f32  — hop-sized audio chunks for frames [t0, t0 + TQ)
    # look_ref : [1, LOOK, hop] f32  — next LOOK chunks (only rows 0..r-2 are used)
    # basis_ref: [F, 2*c_pad]   f32  — [windowed real | windowed imag] DFT basis, pruned cols
    # mel_ref  : [c_pad, m_pad] f32  — transposed, pruned + zero-padded mel filterbank
    # out_ref  : [1, n_mels, TQ] f32
    cur = cur_ref[0]                                          # [TQ,   hop]
    look = look_ref[0]                                        # [LOOK, hop]

    # K-split STFT projection: frame_t = concat_k chunk[t + k].  Instead of materializing
    # the [TQ, F] frame tile, accumulate r small matmuls against hop-row basis slices.
    y = jnp.dot(cur, basis_ref[0:hop, :], preferred_element_type=jnp.float32)
    for k in range(1, r):
        part = jnp.concatenate([cur[k:, :], look[:k, :]], axis=0)        # [TQ, hop]
        y = y + jnp.dot(part, basis_ref[k * hop:(k + 1) * hop, :],
                        preferred_element_type=jnp.float32)              # [TQ, 2*c_pad]

    real = y[:, :c_pad]
    imag = y[:, c_pad:]
    mag = jnp.sqrt(real * real + imag * imag)                            # [TQ, c_pad] f32

    mel = jnp.dot(mag, mel_ref[...], preferred_element_type=jnp.float32)  # [TQ, m_pad]
    mel_t = mel.T[:n_mels, :]                                 # [n_mels, TQ] (XLU transpose)
    out_ref[0] = jnp.log(1.0 + 10000.0 * mel_t)


def make_mel_spectrogram_fn(filter_length=1024, hop_length=256, n_mels=80,
                            sampling_rate=22050, mel_fmin=0.0, mel_fmax=None,
                            frames_per_tile=512):
    """Builds the (pruned, padded) bases ONCE and returns mel(audio) -> [B, n_mels, T]."""
    F = int(filter_length)
    hop = int(hop_length)
    if F % hop != 0:
        # TODO(synk): filter_length not a multiple of hop_length needs a per-frame gather
        # path; not implemented (the 1024/256 defaults and the demo satisfy it).
        raise NotImplementedError("filter_length must be a multiple of hop_length")
    r = F // hop
    cutoff = F // 2 + 1

    real_b, imag_b, mel_basis = make_mel_params(
        F, hop, n_mels, sampling_rate, mel_fmin, mel_fmax)

    # --- prune frequency bins with all-zero mel weight (DC/Nyquist by default): exact ---
    mel_np = np.asarray(mel_basis)
    keep = np.where(np.any(mel_np != 0.0, axis=0))[0]
    if keep.size == 0:
        keep = np.arange(cutoff)
    dropped = np.setdiff1d(np.arange(cutoff), keep)
    assert np.all(mel_np[:, dropped] == 0.0), "pruned bins must have zero mel weight"
    c_used = int(keep.size)
    c_pad = _round_up(c_used, 128)
    m_pad = _round_up(n_mels, 128)

    # --- pack constant bases: fused [F, 2*c_pad] DFT projection + [c_pad, m_pad] mel ---
    basis_np = np.zeros((F, 2 * c_pad), np.float32)
    basis_np[:, :c_used] = np.asarray(real_b)[keep, :].T
    basis_np[:, c_pad:c_pad + c_used] = np.asarray(imag_b)[keep, :].T
    melT_np = np.zeros((c_pad, m_pad), np.float32)
    melT_np[:c_used, :n_mels] = mel_np[:, keep].T
    basis_c = jnp.asarray(basis_np)     # f32 operands everywhere (see header)
    mel_t = jnp.asarray(melT_np)

    look = max(8, _round_up(r, 8))      # lookahead chunks per tile (>= r-1, multiple of 8)
    tq_unit = int(np.lcm(look, 128))    # keep output blocks lane-dense (TQ % 128 == 0)

    def mel_spectrogram(audio):
        if audio.ndim == 1:
            audio = audio[None, :]
        B = audio.shape[0]

        # reflect pad + chunk the audio into hop-sized rows (no frame materialization)
        pad = (F - hop) // 2
        padded = jnp.pad(audio.astype(jnp.float32), ((0, 0), (pad, pad)), mode="reflect")
        L = padded.shape[-1]
        T = (L - F) // hop + 1

        tq = min(int(frames_per_tile), _round_up(T, tq_unit))
        tq = max(tq_unit, (tq // tq_unit) * tq_unit)
        # v7x has 2 TensorCores sharded over the "parallel" grid axes: prefer >= 4 grid
        # points on short clips instead of collapsing into one huge time tile.
        while tq > tq_unit and B * pl.cdiv(T, tq) < 4:
            tq = max(tq_unit, ((tq // 2) // tq_unit) * tq_unit)
        assert tq % look == 0 and tq % 128 == 0

        t_tiles = int(pl.cdiv(T, tq))
        t_pad = t_tiles * tq
        n_ch = t_pad + look                      # chunk rows incl. lookahead slack
        pad_right = n_ch * hop - L
        assert pad_right >= 0
        padded = jnp.pad(padded, ((0, 0), (0, pad_right)))
        chunks = padded.reshape(B, n_ch, hop)

        kernel = functools.partial(_mel_kernel, tq=tq, r=r, hop=hop,
                                   c_pad=c_pad, n_mels=n_mels)

        cost = pl.CostEstimate(
            flops=int(2 * B * t_pad * (F * 2 * c_pad + c_pad * m_pad)),
            transcendentals=int(B * t_pad * (c_pad + n_mels)),   # sqrt + log
            bytes_accessed=int(chunks.size * 4 + basis_c.size * 4 + mel_t.size * 4
                               + B * n_mels * t_pad * 4),
        )

        out = pl.pallas_call(
            kernel,
            out_shape=jax.ShapeDtypeStruct((B, n_mels, t_pad), jnp.float32),
            grid=(B, t_tiles),
            in_specs=[
                # main chunk block for this time tile
                pl.BlockSpec((1, tq, hop), lambda b, i: (b, i, 0)),
                # small lookahead block of the same chunks array (next r-1 chunks)
                pl.BlockSpec((1, look, hop), lambda b, i: (b, (i + 1) * (tq // look), 0)),
                # grid-invariant bases (fetched once, revisited)
                pl.BlockSpec((F, 2 * c_pad), lambda b, i: (0, 0)),
                pl.BlockSpec((c_pad, m_pad), lambda b, i: (0, 0)),
            ],
            out_specs=pl.BlockSpec((1, n_mels, tq), lambda b, i: (b, 0, i)),
            compiler_params=pltpu.CompilerParams(
                dimension_semantics=("parallel", "parallel"),
                vmem_limit_bytes=32 * 1024 * 1024,
            ),
            cost_estimate=cost,
        )(chunks, chunks, basis_c, mel_t)

        # avoid the extra HBM crop pass when T already tiles evenly (the common case)
        if t_pad != T:
            out = out[:, :, :T]
        return out

    return mel_spectrogram


# ----------------------------------------------------------------------------------
# Pure-JAX f32 reference (matches the PyTorch module's math).
# ----------------------------------------------------------------------------------

def _reference(audio, real_b, imag_b, mel_basis, filter_length, hop_length):
    pad = (filter_length - hop_length) // 2
    padded = jnp.pad(audio, ((0, 0), (pad, pad)), mode="reflect")
    T = (padded.shape[-1] - filter_length) // hop_length + 1
    idx = jnp.arange(T)[:, None] * hop_length + jnp.arange(filter_length)[None, :]
    frames = padded[:, idx].astype(jnp.float32)                  # [B, T, F]
    hp = jax.lax.Precision.HIGHEST
    real = jnp.einsum("btf,cf->bct", frames, jnp.asarray(real_b), precision=hp)
    imag = jnp.einsum("btf,cf->bct", frames, jnp.asarray(imag_b), precision=hp)
    mag = jnp.sqrt(real * real + imag * imag)                    # [B, cutoff, T]
    mel = jnp.einsum("mc,bct->bmt", jnp.asarray(mel_basis), mag, precision=hp)
    return jnp.log(1.0 + 10000.0 * mel)


if __name__ == "__main__":
    # Small configuration consistent with the module (filter/hop ratio 4 like 1024/256),
    # with a lane-dense hop (128) per the perf review.
    filter_length = 512
    hop_length = 128
    n_mels = 80
    sampling_rate = 22050
    mel_fmin, mel_fmax = 0.0, None

    mel_fn = make_mel_spectrogram_fn(filter_length, hop_length, n_mels, sampling_rate,
                                     mel_fmin, mel_fmax, frames_per_tile=512)

    key = jax.random.PRNGKey(0)
    B, num_samples = 2, 65536                 # ~3 s of audio; T = 512 frames, grid (2, 2)
    audio = jax.random.uniform(key, (B, num_samples), dtype=jnp.float32,
                               minval=-0.99, maxval=0.99)
    assert float(audio.min()) >= -1.0 and float(audio.max()) <= 1.0

    mel = jax.block_until_ready(mel_fn(audio))

    real_b, imag_b, mel_basis = make_mel_params(
        filter_length, hop_length, n_mels, sampling_rate, mel_fmin, mel_fmax)
    ref = jax.block_until_ready(
        _reference(audio, real_b, imag_b, mel_basis, filter_length, hop_length))

    T_expected = num_samples // hop_length
    assert mel.shape == (B, n_mels, T_expected), mel.shape
    assert ref.shape == mel.shape
    np.testing.assert_allclose(np.asarray(mel), np.asarray(ref), rtol=1e-2, atol=1e-2)

    print("KERNEL_OK")
</pallas_src>

<mosaic_0001>
module attributes {stable_mosaic.version = 11 : i64} {
  func.func @_mel_kernel(%arg0: i32, %arg1: i32, %arg2: memref<1x256x128xf32, #tpu.memory_space<vmem>>, %arg3: memref<1x8x128xf32, #tpu.memory_space<vmem>>, %arg4: memref<512x512xf32, #tpu.memory_space<vmem>>, %arg5: memref<256x128xf32, #tpu.memory_space<vmem>>, %arg6: memref<1x80x256xf32, #tpu.memory_space<vmem>>) attributes {dimension_semantics = [#tpu.dimension_semantics<parallel>, #tpu.dimension_semantics<parallel>], iteration_bounds = array<i64: 2, 2>, scalar_prefetch = 0 : i64, scratch_operands = 0 : i64, tpu.core_type = #tpu.core_type<tc>, window_params = [{transform_indices = @transform_0, window_bounds = array<i64: 1, 256, 128>}, {transform_indices = @transform_1, window_bounds = array<i64: 1, 8, 128>}, {pipeline_mode = #tpu.pipeline_mode<synchronous>, transform_indices = @transform_2, window_bounds = array<i64: 512, 512>}, {pipeline_mode = #tpu.pipeline_mode<synchronous>, transform_indices = @transform_3, window_bounds = array<i64: 256, 128>}, {transform_indices = @transform_4, window_bounds = array<i64: 1, 80, 256>}]} {
    %c0 = arith.constant 0 : index
    %c0_0 = arith.constant 0 : index
    %c0_1 = arith.constant 0 : index
    %0 = vector.load %arg2[%c0, %c0_0, %c0_1] : memref<1x256x128xf32, #tpu.memory_space<vmem>>, vector<1x256x128xf32>
    %1 = vector.shape_cast %0 : vector<1x256x128xf32> to vector<256x128xf32>
    %c0_2 = arith.constant 0 : index
    %c0_3 = arith.constant 0 : index
    %c0_4 = arith.constant 0 : index
    %2 = vector.load %arg3[%c0_2, %c0_3, %c0_4] : memref<1x8x128xf32, #tpu.memory_space<vmem>>, vector<1x8x128xf32>
    %3 = vector.shape_cast %2 : vector<1x8x128xf32> to vector<8x128xf32>
    %c0_5 = arith.constant 0 : index
    %c0_6 = arith.constant 0 : index
    %4 = vector.load %arg4[%c0_5, %c0_6] : memref<512x512xf32, #tpu.memory_space<vmem>>, vector<128x512xf32>
    %cst = arith.constant dense<0.000000e+00> : vector<256x512xf32>
    %5 = tpu.matmul %1, %4, %cst {dimension_numbers = #tpu.dot_dimension_numbers<[1], [0], [0], [1], [0, 0, 1, 1], [], []>} : vector<256x128xf32>, vector<128x512xf32>, vector<256x512xf32> -> vector<256x512xf32>
    %6 = vector.extract_strided_slice %1 {offsets = [1, 0], sizes = [255, 128], strides = [1, 1]} : vector<256x128xf32> to vector<255x128xf32>
    %7 = vector.extract_strided_slice %3 {offsets = [0, 0], sizes = [1, 128], strides = [1, 1]} : vector<8x128xf32> to vector<1x128xf32>
    %8 = tpu.concatenate %6, %7 in 0 : vector<255x128xf32>, vector<1x128xf32> -> vector<256x128xf32>
    %c128 = arith.constant 128 : index
    %c0_7 = arith.constant 0 : index
    %9 = vector.load %arg4[%c128, %c0_7] : memref<512x512xf32, #tpu.memory_space<vmem>>, vector<128x512xf32>
    %cst_8 = arith.constant dense<0.000000e+00> : vector<256x512xf32>
    %10 = tpu.matmul %8, %9, %cst_8 {dimension_numbers = #tpu.dot_dimension_numbers<[1], [0], [0], [1], [0, 0, 1, 1], [], []>} : vector<256x128xf32>, vector<128x512xf32>, vector<256x512xf32> -> vector<256x512xf32>
    %11 = arith.addf %5, %10 : vector<256x512xf32>
    %12 = vector.extract_strided_slice %1 {offsets = [2, 0], sizes = [254, 128], strides = [1, 1]} : vector<256x128xf32> to vector<254x128xf32>
    %13 = vector.extract_strided_slice %3 {offsets = [0, 0], sizes = [2, 128], strides = [1, 1]} : vector<8x128xf32> to vector<2x128xf32>
    %14 = tpu.concatenate %12, %13 in 0 : vector<254x128xf32>, vector<2x128xf32> -> vector<256x128xf32>
    %c256 = arith.constant 256 : index
    %c0_9 = arith.constant 0 : index
    %15 = vector.load %arg4[%c256, %c0_9] : memref<512x512xf32, #tpu.memory_space<vmem>>, vector<128x512xf32>
    %cst_10 = arith.constant dense<0.000000e+00> : vector<256x512xf32>
    %16 = tpu.matmul %14, %15, %cst_10 {dimension_numbers = #tpu.dot_dimension_numbers<[1], [0], [0], [1], [0, 0, 1, 1], [], []>} : vector<256x128xf32>, vector<128x512xf32>, vector<256x512xf32> -> vector<256x512xf32>
    %17 = arith.addf %11, %16 : vector<256x512xf32>
    %18 = vector.extract_strided_slice %1 {offsets = [3, 0], sizes = [253, 128], strides = [1, 1]} : vector<256x128xf32> to vector<253x128xf32>
    %19 = vector.extract_strided_slice %3 {offsets = [0, 0], sizes = [3, 128], strides = [1, 1]} : vector<8x128xf32> to vector<3x128xf32>
    %20 = tpu.concatenate %18, %19 in 0 : vector<253x128xf32>, vector<3x128xf32> -> vector<256x128xf32>
    %c384 = arith.constant 384 : index
    %c0_11 = arith.constant 0 : index
    %21 = vector.load %arg4[%c384, %c0_11] : memref<512x512xf32, #tpu.memory_space<vmem>>, vector<128x512xf32>
    %cst_12 = arith.constant dense<0.000000e+00> : vector<256x512xf32>
    %22 = tpu.matmul %20, %21, %cst_12 {dimension_numbers = #tpu.dot_dimension_numbers<[1], [0], [0], [1], [0, 0, 1, 1], [], []>} : vector<256x128xf32>, vector<128x512xf32>, vector<256x512xf32> -> vector<256x512xf32>
    %23 = arith.addf %17, %22 : vector<256x512xf32>
    %24 = vector.extract_strided_slice %23 {offsets = [0, 0], sizes = [256, 256], strides = [1, 1]} : vector<256x512xf32> to vector<256x256xf32>
    %25 = vector.extract_strided_slice %23 {offsets = [0, 256], sizes = [256, 256], strides = [1, 1]} : vector<256x512xf32> to vector<256x256xf32>
    %26 = arith.mulf %24, %24 : vector<256x256xf32>
    %27 = arith.mulf %25, %25 : vector<256x256xf32>
    %28 = arith.addf %26, %27 : vector<256x256xf32>
    %29 = math.sqrt %28 : vector<256x256xf32>
    %c0_13 = arith.constant 0 : index
    %c0_14 = arith.constant 0 : index
    %30 = vector.load %arg5[%c0_13, %c0_14] : memref<256x128xf32, #tpu.memory_space<vmem>>, vector<256x128xf32>
    %cst_15 = arith.constant dense<0.000000e+00> : vector<256x128xf32>
    %31 = tpu.matmul %29, %30, %cst_15 {dimension_numbers = #tpu.dot_dimension_numbers<[1], [0], [0], [1], [0, 0, 1, 1], [], []>} : vector<256x256xf32>, vector<256x128xf32>, vector<256x128xf32> -> vector<256x128xf32>
    %32 = tpu.transpose %31, [1, 0] : vector<256x128xf32> -> vector<128x256xf32>
    %33 = vector.extract_strided_slice %32 {offsets = [0, 0], sizes = [80, 256], strides = [1, 1]} : vector<128x256xf32> to vector<80x256xf32>
    %cst_16 = arith.constant 1.000000e+04 : f32
    %34 = vector.broadcast %cst_16 : f32 to vector<80x256xf32>
    %35 = arith.mulf %34, %33 : vector<80x256xf32>
    %cst_17 = arith.constant 1.000000e+00 : f32
    %36 = vector.broadcast %cst_17 : f32 to vector<80x256xf32>
    %37 = arith.addf %36, %35 : vector<80x256xf32>
    %38 = math.log %37 : vector<80x256xf32>
    %c0_18 = arith.constant 0 : index
    %c0_19 = arith.constant 0 : index
    %c0_20 = arith.constant 0 : index
    %39 = vector.load %arg6[%c0_18, %c0_19, %c0_20] : memref<1x80x256xf32, #tpu.memory_space<vmem>>, vector<1x80x256xf32>
    %40 = vector.shape_cast %39 : vector<1x80x256xf32> to vector<80x256xf32>
    %41 = vector.shape_cast %38 : vector<80x256xf32> to vector<1x80x256xf32>
    tpu.vector_store %arg6[%c0_18, %c0_19, %c0_20], %41 {strides = array<i32>} : memref<1x80x256xf32, #tpu.memory_space<vmem>>, vector<1x80x256xf32>,
    return
  }
  func.func @transform_0(%arg0: i32, %arg1: i32) -> (i32, i32, i32) {
    %c0_i32 = arith.constant 0 : i32
    %c0_i32_0 = arith.constant 0 : i32
    return %arg0, %arg1, %c0_i32 : i32, i32, i32
  }
  func.func @transform_1(%arg0: i32, %arg1: i32) -> (i32, i32, i32) {
    %c1_i32 = arith.constant 1 : i32
    %0 = arith.addi %arg1, %c1_i32 : i32
    %c32_i32 = arith.constant 32 : i32
    %1 = arith.muli %0, %c32_i32 : i32
    %c0_i32 = arith.constant 0 : i32
    %c0_i32_0 = arith.constant 0 : i32
    return %arg0, %1, %c0_i32 : i32, i32, i32
  }
  func.func @transform_2(%arg0: i32, %arg1: i32) -> (i32, i32) {
    %c0_i32 = arith.constant 0 : i32
    %c0_i32_0 = arith.constant 0 : i32
    %c0_i32_1 = arith.constant 0 : i32
    return %c0_i32, %c0_i32_0 : i32, i32
  }
  func.func @transform_3(%arg0: i32, %arg1: i32) -> (i32, i32) {
    %c0_i32 = arith.constant 0 : i32
    %c0_i32_0 = arith.constant 0 : i32
    %c0_i32_1 = arith.constant 0 : i32
    return %c0_i32, %c0_i32_0 : i32, i32
  }
  func.func @transform_4(%arg0: i32, %arg1: i32) -> (i32, i32, i32) {
    %c0_i32 = arith.constant 0 : i32
    %c0_i32_0 = arith.constant 0 : i32
    return %arg0, %c0_i32, %arg1 : i32, i32, i32
  }
}

</mosaic_0001>

<bundles_post_ra>
// kernel: tpu_custom_call.1
= control target key start
LH: loop header
LB: loop body
LE: loop exit
PB: predicated region body
PF: predicated region fallthrough
CT: control target
= control target key end

     0   :  { %s8429_s0 = inlined_call_operand.hbm [shape: f32[2,520,128], index: 0, kind: input, shape index: {}]   ;;  %s8430_s1 = inlined_call_operand.hbm [shape: f32[2,520,128], index: 1, kind: input, shape index: {}]   ;;  %s8431_s2 = inlined_call_operand.hbm [shape: f32[512,512], index: 2, kind: input, shape index: {}]   ;;  %s8432_s3 = inlined_call_operand.hbm [shape: f32[256,128], index: 3, kind: input, shape index: {}]   ;;  %s8433_s4 = inlined_call_operand.hbm [shape: f32[2,80,512], index: 4, kind: output, shape index: {}]  }
   0x1   :  { %8486 = sst [smem:[#allocation73_spill]] %s8431_s2 }
   0x2   :  { %8487 = sst [smem:[#allocation74_spill]] %s8433_s4 }
   0x3   :  { %9 = vsyncpa [#allocation3], 0 }
   0x4   :  { %11 = vsyncpa [#allocation3 + $0x1], 0 }
   0x5   :  { %12 = vsyncpa [#allocation6], 0 }
   0x6   :  { %14 = vsyncpa [#allocation6 + $0x1], 0 }
   0x7   :  { %15 = vsyncpa [#allocation9], 0 }
   0x8   :  { %16 = vsyncpa [#allocation4], 0 }
   0x9   :  { %18 = vsyncpa [#allocation4 + $0x1], 0  ;;  %s5829_s15 = smov 0   ;;  %s5831_s16 = smov 0  }
   0xa   :  { %s5833_s17 = smov 0   ;;  %s5835_s18 = smov 0  }
   0xb   :  { %s5837_s19 = smov 0   ;;  %s5839_s20 = smov 0  }
   0xc   :  { %s5841_s21 = smov 0   ;;  %s5843_s22 = smov 0  }
   0xd   :  { %s5845_s23 = smov 0   ;;  %s5847_s24 = smov 0  }
   0xe   :  { %s5849_s25 = smov 0  }
   0xf LB: > { %8488 = sst [smem:[#allocation16_spill]] %s5758_s18  ;;  %s5885_s26 = sadd.s32 4294967295, %s5786_s25   ;;  %s5786_s25 = sphi %s5849_s25, %s24_s25   ;;  %s5782_s24 = sphi %s5847_s24, %s8725_s24   ;;  %s5778_s23 = sphi %s5845_s23, %s8716_s23   ;;  %s5774_s22 = sphi %s5843_s22, %s8724_s22   ;;  %s5770_s21 = sphi %s5841_s21, %s8715_s21   ;;  %s5766_s20 = sphi %s5839_s20, %s8723_s20   ;;  %s5762_s19 = sphi %s5837_s19, %s8722_s19   ;;  %s5758_s18 = sphi %s5835_s18, %s8721_s18   ;;  %s5754_s17 = sphi %s5833_s17, %s8720_s17   ;;  %s5750_s16 = sphi %s5831_s16, %s8719_s16   ;;  %s5746_s15 = sphi %s5829_s15, %s8718_s15  }
  0x10   : > { %8489 = sst [smem:[#allocation17_spill]] %s5770_s21  ;;  %s33_s28 = sadd.s32 1, %s5778_s23 }
  0x11   : > { %8490 = sst [smem:[#allocation18_spill]] %s5774_s22  ;;  %s36_s29 = sadd.s32 1, %s5782_s24 }
  0x12   : > { %8491 = sst [smem:[#allocation19_spill]] %s5778_s23  ;;  %p34_p0 = scmp.ge.s32.totalorder %s33_s28, 2 }
  0x13   : > { %s45_s30 = sadd.s32 1, %s5766_s20  ;;  %p52_p1 = scmp.ne.s32.totalorder %s5766_s20, %s5762_s19 }
  0x14   : > { %p53_p2 = scmp.eq.s32.totalorder %s5786_s25, 0  ;;  %s8727_s28 = smov (%p34_p0, %s33_s28), 0 }
  0x15   : > { %8492 = sst [smem:[#allocation20_spill]] %s8727_s28  ;;  %s8729_s29 = smov (!%p34_p0, %s36_s29), %s5782_s24 }
  0x16   : > { %s41_s5 = ssub.s32 %s5778_s23, %s8727_s28  ;;  %p5904_p3 = por %p53_p2, %p52_p1 }
  0x17   : > { %p38_p4 = scmp.ge.s32.totalorder %s8729_s29, 2  ;;  %p8437_p5 = scmp.ne.s32.totalorder %s5762_s19, %s5758_s18 }
  0x18   : > { %s8493_s6 = scalar_select %p5904_p3, 1, 0 }
  0x19   : > { %p8442_p6 = scmp.eq.s32.totalorder %s5885_s26, 0  ;;  %s5912_s7 = sshll.u32 %s5778_s23, 5 }
  0x1a   : > { %s8731_s29 = smov (%p38_p4, %s8729_s29), 0  ;;  %s4496_s9 = sadd.s32 32, %s5912_s7 }
  0x1b   : > { %8494 = sst [smem:[#allocation21_spill]] %s8731_s29  ;;  %p5921_p7 = por %p8442_p6, %p8437_p5 }
  0x1c   : > { %s40_s10 = ssub.s32 %s5782_s24, %s8731_s29  ;;  %s4497_s11 = sshll.u32 %s8727_s28, 5 }
  0x1d   : > { %s8495_s8 = scalar_select %p5921_p7, 1, 0 }
  0x1e   : > { %s42_s12 = sor.u32 %s41_s5, %s40_s10  ;;  %s4498_s13 = sadd.s32 32, %s4497_s11 }
  0x1f   : > { %p43_p8 = scmp.eq.s32.totalorder %s42_s12, 0  ;;  %s73_s14 = ssub.s32 %s4496_s9, %s4498_s13 }
  0x20   : > { %s74_s27 = sor.u32 %s73_s14, %s40_s10  ;;  %s77_s23 = sadd.s32 1, %s5754_s17 }
  0x21   : > { %s5931_s4 = scalar_select %p43_p8, %s5766_s20, %s45_s30  }
  0x22   : > { %p75_p9 = scmp.eq.s32.totalorder %s74_s27, 0  ;;  %p84_p10 = scmp.ne.s32.totalorder %s5754_s17, %s5750_s16 }
  0x23   : > { %8496 = sst [smem:[#allocation22_spill]] %s5931_s4  ;;  %p90_p11 = scmp.ne.s32.totalorder %s5750_s16, %s5746_s15 }
  0x24   : > { %p158_p12 = scmp.eq.s32.totalorder %s5885_s26, 3  ;;  %p5943_p13 = por %p84_p10, %p53_p2 }
  0x25   : > { %s5939_s29 = scalar_select %p75_p9, %s5754_s17, %s77_s23  }
  0x26   : > { %s8498_s5 = scalar_select %p5943_p13, 1, 0 }
  0x27   : > { %8497 = sst [smem:[#allocation23_spill]] %s5939_s29  ;;  %p5949_p0 = por %p90_p11, %p8442_p6 }
  0x28   : > { %p5956_p4 = por %p158_p12, %p52_p1  ;;  %s8502_s27 = sadd.s32 4294967294, %s5786_s25  }
  0x29   : > { %s8499_s11 = scalar_select %p5949_p0, 1, 0 }
  0x2a   : > { %s8500_s30 = scalar_select %p5956_p4, 1, 0 }
  0x2b   : > { %p164_p8 = scmp.eq.s32.totalorder %s8502_s27, 3  ;;  %p4472_p5 = scmp.ge.s32.totalorder %s5786_s25, 1 }
  0x2c   : > { %8501 = sst [smem:[#allocation24_spill]] %s8500_s30  ;;  %p171_p9 = scmp.lt.s32.totalorder %s5786_s25, 5 }
  0x2d   : > { %p8503_p7 = scmp.ne.s32.totalorder %s5762_s19, %s5758_s18  ;;  %s5788_s9 = smov [#allocation7]  }
  0x2e   : > { %p5971_p2 = pnand %p4472_p5, %p171_p9  ;;  %s183_s10 = sshll.u32 %s5788_s9, 4  ;;  %s184_s10 = int_to_ptr.vmem [resolvable:$true] %s183_s10 }
  0x2f   : > { %p5967_p3 = por %p164_p8, %p8503_p7  ;;  %s5789_s13 = smov [#allocation8]  }
  0x30   : > { %s8506_s23 = scalar_select %p5971_p2, 1, 0 }
  0x31   : > { %s8504_s15 = scalar_select %p5967_p3, 1, 0 }
  0x32   : > { %p5219_p1 = pneg %p5971_p2  ;;  %s196_s14 = sshll.u32 %s5789_s13, 4  ;;  %s5983_s14 = int_to_ptr.vmem [resolvable:$true] %s196_s14 }
  0x33   : > { %8505 = sst [smem:[#allocation25_spill]] %s8504_s15  ;;  %s8508_s2 = sld [smem:[#allocation73_spill]] }
  0x34   : > { %p5979_p10 = pnand %p5219_p1, %p8442_p6 }
  0x36   : > { %p5539_p7 = pneg %p5979_p10 }
  0x39   : > { %s5537_s4 = scalar_lea.hbm %s8508_s2, 32768 }
  0x3a   : > { %p5538_p5 = scmp.ne.s32.totalorder %s8508_s2, %s5537_s4  ;;  %p5544_p8 = scmp.lt.u32.totalorder %s5537_s4, %s8508_s2 }
  0x3c   : > { %p5540_p11 = pnand %p5539_p7, %p5538_p5 }
  0x3e   : > { %p5541_p12 = pneg %p5540_p11 }
  0x40   : > { %p5546_p9 = pnand %p5544_p8, %p5541_p12 }
  0x42   : > { %5549 = shalt.err (!%p5546_p9)
}
  0x43   : > { %s5550_s13 = scalar_lea.vmem %s184_s10, 32768  ;;  %p5558_p4 = scmp.lt.s32.totalorder %s184_s10, %s184_s10 }
  0x44   : > { %p5551_p1 = scmp.ne.s32.totalorder %s184_s10, %s5550_s13  ;;  %p5559_p0 = scmp.lt.s32.totalorder %s5550_s13, %s5550_s13 }
  0x46   : > { %p5553_p6 = pnand %p5551_p1, %p5539_p7  ;;  %p5560_p2 = por %p5559_p0, %p5558_p4 }
  0x48   : > { %p5554_p3 = pneg %p5553_p6 }
  0x4a   : > { %p5561_p13 = pnand %p5560_p2, %p5554_p3 }
  0x4c   : > { %5564 = shalt.err (!%p5561_p13)
}
  0x4d   : > { %s5790_s28 = smov 512   ;;  %s5791_s29 = smov 32  }
  0x4e   : > { %5222 = dma.hbm_to_vmem [thread:$0]  (!%p5979_p10), %s8508_s2, 32768, %s184_s10, [#allocation6], %s5790_s28, %s5790_s28, %s5791_s29  }
  0x4f   : > { %s5565_s9 = scalar_lea.hbm %s8432_s3, 4096 }
  0x50   : > { %p5566_p6 = scmp.ne.s32.totalorder %s8432_s3, %s5565_s9  ;;  %p5572_p0 = scmp.lt.u32.totalorder %s5565_s9, %s8432_s3 }
  0x52   : > { %p5568_p3 = pnand %p5566_p6, %p5539_p7 }
  0x54   : > { %p5569_p13 = pneg %p5568_p3 }
  0x56   : > { %p5574_p4 = pnand %p5572_p0, %p5569_p13 }
  0x58   : > { %5577 = shalt.err (!%p5574_p4)
}
  0x59   : > { %s5578_s10 = scalar_lea.vmem %s5983_s14, 4096  ;;  %p5586_p12 = scmp.lt.s32.totalorder %s5983_s14, %s5983_s14 }
  0x5a   : > { %p5579_p2 = scmp.ne.s32.totalorder %s5983_s14, %s5578_s10  ;;  %p5587_p8 = scmp.lt.s32.totalorder %s5578_s10, %s5578_s10 }
  0x5c   : > { %p5581_p5 = pnand %p5579_p2, %p5539_p7  ;;  %p5588_p9 = por %p5587_p8, %p5586_p12 }
  0x5e   : > { %p5582_p11 = pneg %p5581_p5 }
  0x60   : > { %p5589_p1 = pnand %p5588_p9, %p5582_p11 }
  0x62   : > { %5592 = shalt.err (!%p5589_p1)
}
  0x63   : > { %s5792_s21 = smov 128   ;;  %s5793_s22 = smov 8  }
  0x64   : > { %5225 = dma.hbm_to_vmem [thread:$0]  (!%p5979_p10), %s8432_s3, 4096, %s5983_s14, [#allocation9], %s5792_s21, %s5792_s21, %s5793_s22  }
  0x65   : > { %p4475_p6 = scmp.ge.s32.totalorder %s5786_s25, 4 }
  0x66   : > { %p8509_p7 = scmp.ne.s32.totalorder (!%p4475_p6), %s8493_s6, 0 }
  0x67   : > { %206 = sbr.rel (%p4475_p6) target bundleno = 167 (0xa7), region = 24 }
  0x6e   : > { %209 = sbr.rel (!%p8509_p7) target bundleno = 139 (0x8b), region = 28  ;;  %s210_s29 = sand.u32 (%p8509_p7), 1, %s5766_s20  }
  0x6f   : > { %s4476_s4 = sshll.u32 (%p8509_p7), %s210_s29, 8  ;;  %s6036_s18 = scalar_lea.sflag (%p8509_p7), [#allocation3], %s210_s29 }
  0x70   : > { %s214_s15 = scalar_lea.vmem (%p8509_p7), [#allocation2], %s4476_s4  ;;  %s5203_s27 = smul.u32 (%p8509_p7), 65, %s5782_s24 }
  0x71   : > { %s229_s12 = sshll.u32 (%p8509_p7), %s214_s15, 4  ;;  %s5597_s28 = scalar_lea.hbm (%p8509_p7), %s8429_s0, 16640  ;;  %s6040_s12 = int_to_ptr.vmem [resolvable:$true] %s229_s12 }
  0x72   : > { %s225_s9 = sadd.s32 (%p8509_p7), %s5203_s27, %s5912_s7 }
  0x73   : > { %s4480_s14 = sshll.u32 (%p8509_p7), %s225_s9, 7 }
  0x74   : > { %s227_s21 = scalar_lea.hbm (%p8509_p7), %s8429_s0, %s4480_s14 }
  0x75   : > { %s5593_s6 = scalar_lea.hbm %s227_s21, 4096  ;;  %p5598_p3 = scmp.lt.u32.totalorder %s227_s21, %s8429_s0 }
  0x76   : > { %p5594_p10 = scmp.ne.s32.totalorder %s227_s21, %s5593_s6  ;;  %p5599_p13 = scmp.lt.u32.totalorder %s5597_s28, %s5593_s6 }
  0x77   : > { %p5601_p4 = scmp.lt.u32.totalorder %s5593_s6, %s227_s21 }
  0x78   : > { %p5600_p0 = por %p5599_p13, %p5598_p3 }
  0x7a   : > { %p5602_p2 = por %p5601_p4, %p5600_p0 }
  0x7c   : > { %p5603_p5 = pnand %p5602_p2, %p5594_p10 }
  0x7e   : > { %5606 = shalt.err (!%p5603_p5)
}
  0x7f   : > { %s5607_s4 = scalar_lea.vmem %s6040_s12, 4096  ;;  %s5794_s15 = smov [#allocation2]  }
  0x80   : > { %p5608_p11 = scmp.ne.s32.totalorder %s6040_s12, %s5607_s4  ;;  %s5611_s27 = sshll.u32 %s5794_s15, 4  ;;  %s5612_s27 = int_to_ptr.vmem [resolvable:$false] %s5611_s27 }
  0x81   : > { %s5613_s9 = scalar_lea.vmem %s5612_s27, 8192  ;;  %p5614_p12 = scmp.lt.s32.totalorder %s6040_s12, %s5612_s27 }
  0x82   : > { %p5615_p8 = scmp.lt.s32.totalorder %s5613_s9, %s5607_s4 }
  0x84   : > { %p5616_p9 = por %p5615_p8, %p5614_p12 }
  0x86   : > { %p5617_p1 = pnand %p5616_p9, %p5608_p11 }
  0x88   : > { %5620 = shalt.err (!%p5617_p1)
}
  0x89   : > { %s5795_s2 = smov 128   ;;  %s5796_s14 = smov 8  }
  0x8a   : > { %235 = dma.hbm_to_vmem [thread:$0]  %s227_s21, 4096, %s6040_s12, %s6036_s18, %s5795_s2, %s5795_s2, %s5796_s14  }
  0x8b PF: > { %s241_s13 = sand.u32 1, %s5754_s17   ;;  %s239_s10 = sand.u32 1, %s5786_s25  }
  0x8c   : > { %s4483_s6 = sshll.u32 %s241_s13, 3  ;;  %s4375_s22 = smul.u32 65, %s5782_s24 }
  0x8d   : > { %s243_s30 = scalar_lea.vmem [#allocation5], %s4483_s6  ;;  %s240_s21 = scalar_lea.sflag [#allocation6], %s239_s10 }
  0x8e   : > { %s254_s28 = sshll.u32 %s243_s30, 4  ;;  %s4376_s29 = sadd.s32 %s5912_s7, %s4375_s22  ;;  %s6060_s28 = int_to_ptr.vmem [resolvable:$true] %s254_s28 }
  0x8f   : > { %s4485_s4 = sshll.u32 %s4376_s29, 7  ;;  %p8510_p7 = scmp.ne.s32.totalorder %s8498_s5, 0 }
  0x90   : > { %s4378_s18 = scalar_lea.hbm %s8430_s1, %s4485_s4  ;;  %s5625_s13 = scalar_lea.hbm %s8430_s1, 16640 }
  0x91   : > { %s4379_s12 = scalar_lea.hbm %s4378_s18, 4096  ;;  %s5649_s9 = scalar_lea.hbm %s4378_s18, 4224 }
  0x92   : > { %p5622_p6 = scmp.ne.s32.totalorder %s4379_s12, %s5649_s9  ;;  %p5626_p13 = scmp.lt.u32.totalorder %s4379_s12, %s8430_s1 }
  0x93   : > { %p5627_p0 = scmp.lt.u32.totalorder %s5625_s13, %s5649_s9  ;;  %p5629_p2 = scmp.lt.u32.totalorder %s5649_s9, %s4379_s12 }
  0x94   : > { %p5623_p10 = pnand %p5622_p6, %p8510_p7 }
  0x95   : > { %p5628_p4 = por %p5627_p0, %p5626_p13 }
  0x96   : > { %p5624_p3 = pneg %p5623_p10 }
  0x97   : > { %p5630_p5 = por %p5629_p2, %p5628_p4 }
  0x99   : > { %p5631_p11 = pnand %p5630_p5, %p5624_p3 }
  0x9b   : > { %5634 = shalt.err (!%p5631_p11)
}
  0x9c   : > { %s5635_s10 = scalar_lea.vmem %s6060_s28, 128  ;;  %s5797_s22 = smov [#allocation5]  }
  0x9d   : > { %p5636_p12 = scmp.ne.s32.totalorder %s6060_s28, %s5635_s10  ;;  %s5639_s30 = sshll.u32 %s5797_s22, 4  ;;  %s5640_s30 = int_to_ptr.vmem [resolvable:$false] %s5639_s30 }
  0x9e   : > { %s5641_s29 = scalar_lea.vmem %s5640_s30, 256  ;;  %p5642_p1 = scmp.lt.s32.totalorder %s6060_s28, %s5640_s30 }
  0x9f   : > { %p5637_p8 = pnand %p5636_p12, %p8510_p7  ;;  %p5643_p6 = scmp.lt.s32.totalorder %s5641_s29, %s5635_s10 }
  0xa1   : > { %p5638_p9 = pneg %p5637_p8  ;;  %p5644_p10 = por %p5643_p6, %p5642_p1 }
  0xa3   : > { %p5645_p13 = pnand %p5644_p10, %p5638_p9 }
  0xa5   : > { %5648 = shalt.err (!%p5645_p13)
}
  0xa6   : > { %5210 = dma.hbm_to_vmem [thread:$0]  (%p8510_p7), %s4379_s12, 128, %s6060_s28, %s240_s21  }
  0xa7 PF: > { %p8511_p3 = scmp.ne.s32.totalorder %s8506_s23, 0 }
  0xa9   : > { %263 = sbr.rel (%p8511_p3) target bundleno = 1396 (0x574), region = 36 }
  0xb0   : > { %s6084_s4 = sand.u32 1, %s5762_s19   ;;  %p8512_p0 = scmp.ne.s32.totalorder %s8495_s8, 0 }
  0xb1   : > { %s4487_s15 = sshll.u32 %s6084_s4, 8  ;;  %s266_s27 = scalar_lea.sflag [#allocation3], %s6084_s4 }
  0xb2   : > { %s6088_s18 = scalar_lea.vmem [#allocation2], %s4487_s15 }
  0xb3   : > { %5723 = dma.done.wait (%p8512_p0), %s266_s27, 4096  }
  0xb4   : > { %5725 = vsyncadd (%p8512_p0), %s266_s27, 4294963200  ;;  %s274_s5 = sand.u32 1, %s5885_s26   ;;  %s276_s23 = sand.u32 1, %s5750_s16  }
  0xb5   : > { %s6096_s28 = sshll.u32 %s276_s23, 3  ;;  %s275_s12 = scalar_lea.sflag [#allocation6], %s274_s5 }
  0xb6   : > { %s278_s21 = scalar_lea.vmem [#allocation5], %s6096_s28  ;;  %p8513_p7 = scmp.ne.s32.totalorder %s8499_s11, 0 }
  0xb8   : > { %5727 = dma.done.wait (%p8513_p7), %s275_s12, 128  }
  0xb9   : > { %5729 = vsyncadd (%p8513_p7), %s275_s12, 4294967168  ;;  %p8514_p4 = scmp.eq.s32.totalorder %s5885_s26, 0 }
  0xbb   : > { %5731 = dma.done.wait (%p8514_p4), [#allocation6], 32768   ;;  %p8515_p2 = pmov %p8514_p4 }
  0xbd   : > { %5733 = vsyncadd (%p8515_p2), [#allocation6], 4294934528  ;;  %p8516_p5 = pmov %p8515_p2 }
  0xbe   : > { %p8517_p11 = pmov %p8515_p2 }
  0xbf   : > { %5735 = dma.done.wait (%p8516_p5), [#allocation9], 4096  }
  0xc0   : > { %5737 = vsyncadd (%p8517_p11), [#allocation9], 4294963200  ;;  %v5798_v0 = vmov 0.0   ;;  %v554_v1 = vld [vmem:[#allocation7 + $0x208] sm:$0xff]  ;;  %v553_v3 = vld [vmem:[#allocation7 + $0x200] sm:$0xff]  ;;  %vm453_vm0 = vcmask 1046528  }
  0xc1   : > { %681 = vmatprep.mubr.f32.mxu0 %v5798_v0  ;;  %777 = vmatprep.mubr.f32.mxu1 %v5798_v0  ;;  %v558_v2 = vld [vmem:[#allocation7 + $0x228] sm:$0xff]  ;;  %v557_v5 = vld [vmem:[#allocation7 + $0x220] sm:$0xff]  ;;  %v6114_v47 = vld [vmem:[%s6088_s18] sm:$0xff]  ;;  %vm1645_vm1 = vcmask 1045504   ;;  %vm2450_vm2 = vcmask 1044480   ;;  %s5204_s26 = smul.u32 160, %s6084_s4 }
  0xc2   : > { %v4499_v4 = vpack.c.bf16 %v558_v2, %v554_v1  ;;  %v562_v6 = vld [vmem:[#allocation7 + $0x248] sm:$0xff]  ;;  %v4501_v8 = vpack.c.bf16 %v557_v5, %v553_v3  ;;  %v561_v10 = vld [vmem:[#allocation7 + $0x240] sm:$0xff]  ;;  %v6117_v48 = vld [vmem:[%s6088_s18 + $0x8] sm:$0xff]  ;;  %v454_v56 = vrot.slane %v6114_v47, 1  ;;  %s8705_s11 = sld [smem:[#allocation18_spill]]  ;;  %s8706_s9 = sld [smem:[#allocation17_spill]] }
  0xc3   : > { %v566_v7 = vld [vmem:[#allocation7 + $0x268] sm:$0xff]  ;;  %v565_v11 = vld [vmem:[#allocation7 + $0x260] sm:$0xff]  ;;  %v6120_v50 = vld [vmem:[%s6088_s18 + $0x80] sm:$0xff]  ;;  %v455_v57 = vrot.slane %v6117_v48, 1  ;;  %s8336_s8 = scalar_lea.vmem [#allocation10], %s5204_s26  ;;  %s8707_s13 = sld [smem:[#allocation24_spill]] }
  0xc4   : > { %v4503_v9 = vpack.c.bf16 %v566_v7, %v562_v6  ;;  %v570_v12 = vld [vmem:[#allocation7 + $0x288] sm:$0xff]  ;;  %4500 = vmatprep.subr.bf16.mxu0 %v4499_v4  ;;  %4803 = vmatprep.subr.bf16.mxu1 %v4499_v4  ;;  %v4505_v14 = vpack.c.bf16 %v565_v11, %v561_v10  ;;  %v569_v16 = vld [vmem:[#allocation7 + $0x280] sm:$0xff]  ;;  %v6123_v51 = vld [vmem:[%s6088_s18 + $0x88] sm:$0xff]  ;;  %v8449_v59 = vrot.slane %v6120_v50, 1  ;;  %s4332_s7 = sshll.u32 %s8336_s8, 4  ;;  %s8708_s29 = sld [smem:[#allocation74_spill]]  ;;  %s8360_s7 = int_to_ptr.vmem [resolvable:$true] %s4332_s7 }
  0xc5   : > { %v574_v13 = vld [vmem:[#allocation7 + $0x2a8] sm:$0xff]  ;;  %4502 = vmatpush1.bf16.msra.mxu0 %v4501_v8  ;;  %4811 = vmatpush1.bf16.msra.mxu1 %v4501_v8  ;;  %v573_v17 = vld [vmem:[#allocation7 + $0x2a0] sm:$0xff]  ;;  %v556_v52 = vld [vmem:[#allocation7 + $0x218] sm:$0xff]  ;;  %v487_v60 = vrot.slane %v6123_v51, 1  ;;  %v6136_v6 = vsel %vm453_vm0, %v454_v56, %v455_v57  ;;  %s4317_s27 = scalar_lea.sflag [#allocation4], %s6084_s4  ;;  %s5800_s5 = smov [#allocation10]  }
  0xc6   : > { %4504 = vmatprep.subr.bf16.mxu0 %v4503_v9  ;;  %4804 = vmatprep.subr.bf16.mxu1 %v4503_v9  ;;  %v4507_v15 = vpack.c.bf16 %v574_v13, %v570_v12  ;;  %v578_v18 = vld [vmem:[#allocation7 + $0x2c8] sm:$0xff]  ;;  %v4509_v20 = vpack.c.bf16 %v573_v17, %v569_v16  ;;  %v577_v22 = vld [vmem:[#allocation7 + $0x2c0] sm:$0xff]  ;;  %v560_v53 = vld [vmem:[#allocation7 + $0x238] sm:$0xff]  ;;  %s5654_s23 = sshll.u32 %s5800_s5, 4  ;;  %s5655_s23 = int_to_ptr.vmem [resolvable:$false] %s5654_s23 }
  0xc7   : > { %v582_v19 = vld [vmem:[#allocation7 + $0x2e8] sm:$0xff]  ;;  %v581_v23 = vld [vmem:[#allocation7 + $0x2e0] sm:$0xff]  ;;  %v555_v61 = vld [vmem:[#allocation7 + $0x210] sm:$0xff]  ;;  %v4531_v62 = vpack.c.bf16 %v560_v53, %v556_v52  ;;  %v6141_v9 = vsel %vm453_vm0, %v8449_v59, %v487_v60  ;;  %s5656_s28 = scalar_lea.vmem %s5655_s23, 5120  ;;  %p5657_p6 = scmp.lt.s32.totalorder %s8360_s7, %s5655_s23 }
  0xc8   : > { %v4511_v21 = vpack.c.bf16 %v582_v19, %v578_v18  ;;  %v586_v24 = vld [vmem:[#allocation7 + $0x308] sm:$0xff]  ;;  %v4513_v26 = vpack.c.bf16 %v581_v23, %v577_v22  ;;  %v585_v28 = vld [vmem:[#allocation7 + $0x300] sm:$0xff]  ;;  %v559_v63 = vld [vmem:[#allocation7 + $0x230] sm:$0xff]  ;;  %s5205_s2 = smul.u32 40, %s8705_s11  ;;  %s4491_s14 = sshll.u32 %s8706_s9, 1 }
  0xc9   : > { %4506 = vmatpush1.bf16.msra.mxu0 %v4505_v14  ;;  %4812 = vmatpush1.bf16.msra.mxu1 %v4505_v14  ;;  %v590_v25 = vld [vmem:[#allocation7 + $0x328] sm:$0xff]  ;;  %v589_v29 = vld [vmem:[#allocation7 + $0x320] sm:$0xff]  ;;  %v564_v4 = vld [vmem:[#allocation7 + $0x258] sm:$0xff]  ;;  %v4533_v10 = vpack.c.bf16 %v559_v63, %v555_v61  ;;  %p8709_p8 = scmp.ne.s32.totalorder %s8707_s13, 0 }
  0xca   : > { %4508 = vmatprep.subr.bf16.mxu0 %v4507_v15  ;;  %4805 = vmatprep.subr.bf16.mxu1 %v4507_v15  ;;  %v4515_v27 = vpack.c.bf16 %v590_v25, %v586_v24  ;;  %v594_v30 = vld [vmem:[#allocation7 + $0x348] sm:$0xff]  ;;  %v4517_v32 = vpack.c.bf16 %v589_v29, %v585_v28  ;;  %v593_v34 = vld [vmem:[#allocation7 + $0x340] sm:$0xff]  ;;  %v568_v5 = vld [vmem:[#allocation7 + $0x278] sm:$0xff]  ;;  %s4329_s6 = sadd.s32 %s5205_s2, %s4491_s14 }
  0xcb   : > { %v598_v31 = vld [vmem:[#allocation7 + $0x368] sm:$0xff]  ;;  %v597_v35 = vld [vmem:[#allocation7 + $0x360] sm:$0xff]  ;;  %v4535_v15 = vpack.c.bf16 %v568_v5, %v564_v4  ;;  %v563_v16 = vld [vmem:[#allocation7 + $0x250] sm:$0xff]  ;;  %s4492_s10 = sshll.u32 %s4329_s6, 7 }
  0xcc   : > { %v4519_v33 = vpack.c.bf16 %v598_v31, %v594_v30  ;;  %v602_v36 = vld [vmem:[#allocation7 + $0x388] sm:$0xff]  ;;  %v4521_v38 = vpack.c.bf16 %v597_v35, %v593_v34  ;;  %v601_v40 = vld [vmem:[#allocation7 + $0x380] sm:$0xff]  ;;  %v567_v17 = vld [vmem:[#allocation7 + $0x270] sm:$0xff]  ;;  %s8365_s15 = scalar_lea.hbm %s8708_s29, %s4492_s10 }
  0xcd   : > { %4510 = vmatpush1.bf16.msra.mxu0 %v4509_v20  ;;  %4813 = vmatpush1.bf16.msra.mxu1 %v4509_v20  ;;  %v606_v37 = vld [vmem:[#allocation7 + $0x3a8] sm:$0xff]  ;;  %v605_v41 = vld [vmem:[#allocation7 + $0x3a0] sm:$0xff]  ;;  %v572_v18 = vld [vmem:[#allocation7 + $0x298] sm:$0xff]  ;;  %v4537_v30 = vpack.c.bf16 %v567_v17, %v563_v16 }
  0xce   : > { %4512 = vmatprep.subr.bf16.mxu0 %v4511_v21  ;;  %4806 = vmatprep.subr.bf16.mxu1 %v4511_v21  ;;  %v4523_v39 = vpack.c.bf16 %v606_v37, %v602_v36  ;;  %v610_v42 = vld [vmem:[#allocation7 + $0x3c8] sm:$0xff]  ;;  %v609_v44 = vld [vmem:[#allocation7 + $0x3c0] sm:$0xff]  ;;  %v4525_v45 = vpack.c.bf16 %v605_v41, %v601_v40  ;;  %v576_v22 = vld [vmem:[#allocation7 + $0x2b8] sm:$0xff] }
  0xcf   : > { %v614_v43 = vld [vmem:[#allocation7 + $0x3e8] sm:$0xff]  ;;  %v613_v46 = vld [vmem:[#allocation7 + $0x3e0] sm:$0xff]  ;;  %v6163_v29 = vld [vmem:[%s6088_s18 + $0x20] sm:$0xff]  ;;  %v4539_v35 = vpack.c.bf16 %v576_v22, %v572_v18 }
  0xd0   : > { %v4527_v49 = vpack.c.bf16 %v614_v43, %v610_v42  ;;  %v358_v54 = vld [vmem:[#allocation7 + $0x8] sm:$0xff]  ;;  %v4529_v58 = vpack.c.bf16 %v613_v46, %v609_v44  ;;  %v6130_v1 = vld [vmem:[%s6088_s18 + $0x10] sm:$0xff]  ;;  %v6167_v31 = vld [vmem:[%s6088_s18 + $0xa0] sm:$0xff] }
  0xd1   : > { %4514 = vmatpush1.bf16.msra.mxu0 %v4513_v26  ;;  %4814 = vmatpush1.bf16.msra.mxu1 %v4513_v26  ;;  %v362_v55 = vld [vmem:[#allocation7 + $0x28] sm:$0xff]  ;;  %v6133_v2 = vld [vmem:[%s6088_s18 + $0x90] sm:$0xff]  ;;  %v457_v11 = vrot.slane %v6130_v1, 1  ;;  %v580_v36 = vld [vmem:[#allocation7 + $0x2d8] sm:$0xff]  ;;  %v493_v46 = vrot.slane %v6167_v31, 1 }
  0xd2   : > { %4516 = vmatprep.subr.bf16.mxu0 %v4515_v27  ;;  %4807 = vmatprep.subr.bf16.mxu1 %v4515_v27  ;;  %v4563_v3 = vpack.c.bf16 %v362_v55, %v358_v54  ;;  %v357_v7 = vld [vmem:[#allocation7] sm:$0xff]  ;;  %v489_v12 = vrot.slane %v6133_v2, 1  ;;  %v6146_v13 = vld [vmem:[%s6088_s18 + $0x18] sm:$0xff]  ;;  %v584_v40 = vld [vmem:[#allocation7 + $0x2f8] sm:$0xff] }
  0xd3   : > { %v361_v8 = vld [vmem:[#allocation7 + $0x20] sm:$0xff]  ;;  %v6149_v14 = vld [vmem:[%s6088_s18 + $0x98] sm:$0xff]  ;;  %v6155_v25 = vsel %vm453_vm0, %v455_v57, %v457_v11  ;;  %v459_v27 = vrot.slane %v6146_v13, 1  ;;  %v6185_v52 = vld [vmem:[%s6088_s18 + $0xa8] sm:$0xff]  ;;  %v4543_v57 = vpack.c.bf16 %v584_v40, %v580_v36 }
  0xd4   : > { %v4565_v19 = vpack.c.bf16 %v361_v8, %v357_v7  ;;  %v366_v20 = vld [vmem:[#allocation7 + $0x48] sm:$0xff]  ;;  %v365_v23 = vld [vmem:[#allocation7 + $0x40] sm:$0xff]  ;;  %v6158_v26 = vsel %vm453_vm0, %v487_v60, %v489_v12  ;;  %v491_v28 = vrot.slane %v6149_v14, 1  ;;  %8518 = vst [vmem:[#allocation26_spill] sm:$0xff] %v6185_v52  ;;  %v579_v54 = vld [vmem:[#allocation7 + $0x2d0] sm:$0xff] }
  0xd5   : > { %4518 = vmatpush1.bf16.msra.mxu0 %v4517_v32  ;;  %4815 = vmatpush1.bf16.msra.mxu1 %v4517_v32  ;;  %v370_v21 = vld [vmem:[#allocation7 + $0x68] sm:$0xff]  ;;  %v369_v24 = vld [vmem:[#allocation7 + $0x60] sm:$0xff]  ;;  %v571_v32 = vld [vmem:[#allocation7 + $0x290] sm:$0xff]  ;;  %v6174_v43 = vsel %vm453_vm0, %v457_v11, %v459_v27 }
  0xd6   : > { %4520 = vmatprep.subr.bf16.mxu0 %v4519_v33  ;;  %4808 = vmatprep.subr.bf16.mxu1 %v4519_v33  ;;  %v575_v33 = vld [vmem:[#allocation7 + $0x2b0] sm:$0xff]  ;;  %v4567_v34 = vpack.c.bf16 %v370_v21, %v366_v20  ;;  %v4569_v37 = vpack.c.bf16 %v369_v24, %v365_v23  ;;  %v373_v41 = vld [vmem:[#allocation7 + $0x80] sm:$0xff]  ;;  %v6177_v44 = vsel %vm453_vm0, %v489_v12, %v491_v28  ;;  %v382_v61 = vld [vmem:[#allocation7 + $0xc8] sm:$0xff] }
  0xd7   : > { %v377_v42 = vld [vmem:[#allocation7 + $0xa0] sm:$0xff]  ;;  %v4541_v53 = vpack.c.bf16 %v575_v33, %v571_v32  ;;  %v583_v55 = vld [vmem:[#allocation7 + $0x2f0] sm:$0xff]  ;;  %v592_v63 = vld [vmem:[#allocation7 + $0x338] sm:$0xff]  ;;  %v6195_v7 = vsel %vm453_vm0, %v491_v28, %v493_v46 }
  0xd8   : > { %v4573_v60 = vpack.c.bf16 %v377_v42, %v373_v41  ;;  %v385_v4 = vld [vmem:[#allocation7 + $0xe0] sm:$0xff]  ;;  %v587_v16 = vld [vmem:[#allocation7 + $0x310] sm:$0xff]  ;;  %v596_v20 = vld [vmem:[#allocation7 + $0x358] sm:$0xff] }
  0xd9   : > { %4522 = vmatpush1.bf16.msra.mxu0 %v4521_v38  ;;  %4816 = vmatpush1.bf16.msra.mxu1 %v4521_v38  ;;  %v374_v38 = vld [vmem:[#allocation7 + $0x88] sm:$0xff]  ;;  %v6200_v11 = vld [vmem:[%s6088_s18 + $0x30] sm:$0xff]  ;;  %v591_v17 = vld [vmem:[#allocation7 + $0x330] sm:$0xff] }
  0xda   : > { %4524 = vmatprep.subr.bf16.mxu0 %v4523_v39  ;;  %4809 = vmatprep.subr.bf16.mxu1 %v4523_v39  ;;  %v378_v39 = vld [vmem:[#allocation7 + $0xa8] sm:$0xff]  ;;  %v6203_v12 = vld [vmem:[%s6088_s18 + $0xb0] sm:$0xff]  ;;  %v600_v24 = vld [vmem:[#allocation7 + $0x378] sm:$0xff]  ;;  %v465_v33 = vrot.slane %v6200_v11, 1 }
  0xdb   : > { %v4571_v56 = vpack.c.bf16 %v378_v39, %v374_v38  ;;  %8519 = vst [vmem:[#allocation27_spill] sm:$0xff] %v6203_v12  ;;  %v390_v22 = vld [vmem:[#allocation7 + $0x108] sm:$0xff]  ;;  %v393_v28 = vld [vmem:[#allocation7 + $0x120] sm:$0xff]  ;;  %v595_v38 = vld [vmem:[#allocation7 + $0x350] sm:$0xff]  ;;  %v4551_v41 = vpack.c.bf16 %v600_v24, %v596_v20 }
  0xdc   : > { %v394_v23 = vld [vmem:[#allocation7 + $0x128] sm:$0xff]  ;;  %v599_v39 = vld [vmem:[#allocation7 + $0x370] sm:$0xff]  ;;  %v604_v42 = vld [vmem:[#allocation7 + $0x398] sm:$0xff] }
  0xdd   : > { %4526 = vmatpush1.bf16.msra.mxu0 %v4525_v45  ;;  %4817 = vmatpush1.bf16.msra.mxu1 %v4525_v45  ;;  %v461_v45 = vrot.slane %v6163_v29, 1  ;;  %v6221_v36 = vld [vmem:[%s6088_s18 + $0xb8] sm:$0xff]  ;;  %v4579_v40 = vpack.c.bf16 %v394_v23, %v390_v22  ;;  %v616_v20 = vld [vmem:[#allocation7 + $0x3f8] sm:$0xff]  ;;  %v409_v22 = vld [vmem:[#allocation7 + $0x1a0] sm:$0xff] }
  0xde   : > { %4528 = vmatprep.subr.bf16.mxu0 %v4527_v49  ;;  %4810 = vmatprep.subr.bf16.mxu1 %v4527_v49  ;;  %v6182_v49 = vld [vmem:[%s6088_s18 + $0x28] sm:$0xff]  ;;  %8520 = vst [vmem:[#allocation28_spill] sm:$0xff] %v6221_v36  ;;  %v6362_v59 = vld [vmem:[%s6088_s18 + $0x78] sm:$0xff] }
  0xdf   : > { %v6192_v5 = vsel %vm453_vm0, %v459_v27, %v461_v45  ;;  %v463_v8 = vrot.slane %v6182_v49, 1  ;;  %v389_v27 = vld [vmem:[#allocation7 + $0x100] sm:$0xff] }
  0xe1   : > { %4530 = vmatpush1.bf16.msra.mxu0 %v4529_v58  ;;  %4818 = vmatpush1.bf16.msra.mxu1 %v4529_v58  ;;  %v588_v58 = vld [vmem:[#allocation7 + $0x318] sm:$0xff] }
  0xe2   : > { %4532 = vmatprep.subr.bf16.mxu1 %v4531_v62  ;;  %4564 = vmatprep.subr.bf16.mxu0 %v4563_v3  ;;  %v386_v62 = vld [vmem:[#allocation7 + $0xe8] sm:$0xff]  ;;  %v381_v3 = vld [vmem:[#allocation7 + $0xc0] sm:$0xff] }
  0xe3   : > { %v4575_v18 = vpack.c.bf16 %v386_v62, %v382_v61  ;;  %v4577_v21 = vpack.c.bf16 %v385_v4, %v381_v3  ;;  %v499_v61 = vrot.slane %v6221_v36, 1  ;;  %v6236_v62 = vld [vmem:[%s6088_s18 + $0x40] sm:$0xff]  ;;  %v4553_v3 = vpack.c.bf16 %v599_v39, %v595_v38  ;;  %v6257_v38 = vld [vmem:[%s6088_s18 + $0xc8] sm:$0xff] }
  0xe4   : > { %682 = vmatmul.mubr.f32.vlgmr.msra.gmra.mrb[0].mxu0 %v6136_v6  ;;  %778 = vmatmul.mubr.f32.vlgmr.msra.gmra.mrb[0].mxu1 %v6141_v9  ;;  %v603_v4 = vld [vmem:[#allocation7 + $0x390] sm:$0xff]  ;;  %8523 = vst [vmem:[#allocation31_spill] sm:$0xff] %v6257_v38  ;;  %v380_v36 = vld [vmem:[#allocation7 + $0xb8] sm:$0xff] }
  0xe5   : > { %4534 = vmatpush1.bf16.msra.mxu1 %v4533_v10  ;;  %687 = vmatprep.mubr.f32.mxu0 %v5798_v0  ;;  %v495_v10 = vrot.slane %v6185_v52, 1  ;;  %v1764_v52 = vld [vmem:[#allocation7 + $0x4a0] sm:$0xff] }
  0xe6   : > { %783 = vmatprep.mubr.f32.mxu1 %v5798_v0  ;;  %4536 = vmatprep.subr.bf16.mxu1 %v4535_v15  ;;  %v4545_v15 = vpack.c.bf16 %v583_v55, %v579_v54  ;;  %v608_v54 = vld [vmem:[#allocation7 + $0x3b8] sm:$0xff]  ;;  %v397_v55 = vld [vmem:[#allocation7 + $0x140] sm:$0xff] }
  0xe7   : > { %4566 = vmatpush1.bf16.msra.mxu0 %v4565_v19  ;;  %v4547_v19 = vpack.c.bf16 %v592_v63, %v588_v58  ;;  %v6213_v32 = vsel %vm453_vm0, %v493_v46, %v495_v10  ;;  %v398_v46 = vld [vmem:[#allocation7 + $0x148] sm:$0xff]  ;;  %v6239_v63 = vld [vmem:[%s6088_s18 + $0xc0] sm:$0xff] }
  0xe8   : > { %688 = vmatmul.mubr.f32.gmra.mrb[2].mxu0 %v6155_v25  ;;  %784 = vmatmul.mubr.f32.gmra.mrb[2].mxu1 %v6158_v26  ;;  %8521 = vst [vmem:[#allocation29_spill] sm:$0xff] %v6239_v63 }
  0xe9   : > { %693 = vmatprep.mubr.f32.mxu0 %v5798_v0  ;;  %789 = vmatprep.mubr.f32.mxu1 %v5798_v0 }
  0xea   : > { %4538 = vmatpush1.bf16.msra.mxu1 %v4537_v30  ;;  %4568 = vmatprep.subr.bf16.mxu0 %v4567_v34  ;;  %v6210_v30 = vsel %vm453_vm0, %v461_v45, %v463_v8  ;;  %v497_v34 = vrot.slane %v6203_v12, 1  ;;  %v4581_v45 = vpack.c.bf16 %v393_v28, %v389_v27  ;;  %v469_v27 = vrot.slane %v6236_v62, 1 }
  0xeb   : > { %4540 = vmatprep.subr.bf16.mxu1 %v4539_v35  ;;  %4570 = vmatpush1.bf16.msra.mxu0 %v4569_v37  ;;  %v6218_v35 = vld [vmem:[%s6088_s18 + $0x38] sm:$0xff]  ;;  %v4549_v37 = vpack.c.bf16 %v591_v17, %v587_v16  ;;  %v612_v17 = vld [vmem:[#allocation7 + $0x3d8] sm:$0xff]  ;;  %v501_v28 = vrot.slane %v6239_v63, 1 }
  0xec   : > { %694 = vmatmul.mubr.f32.gmra.mrb[4].mxu0 %v6174_v43  ;;  %790 = vmatmul.mubr.f32.gmra.mrb[4].mxu1 %v6177_v44  ;;  %v6231_v58 = vsel %vm453_vm0, %v495_v10, %v497_v34  ;;  %v6249_v24 = vsel %vm453_vm0, %v497_v34, %v499_v61  ;;  %v1753_v63 = vld [vmem:[#allocation7 + $0x448] sm:$0xff] }
  0xed   : > { %699 = vmatprep.mubr.f32.mxu0 %v5798_v0  ;;  %795 = vmatprep.mubr.f32.mxu1 %v5798_v0  ;;  %8522 = vst [vmem:[#allocation30_spill] sm:$0xff] %v6249_v24 }
  0xee   : > { %4542 = vmatpush1.bf16.msra.mxu1 %v4541_v53  ;;  %4572 = vmatprep.subr.bf16.mxu0 %v4571_v56  ;;  %v402_v53 = vld [vmem:[#allocation7 + $0x168] sm:$0xff]  ;;  %v401_v56 = vld [vmem:[#allocation7 + $0x160] sm:$0xff] }
  0xef   : > { %4544 = vmatprep.subr.bf16.mxu1 %v4543_v57  ;;  %4574 = vmatpush1.bf16.msra.mxu0 %v4573_v60  ;;  %v6228_v57 = vsel %vm453_vm0, %v463_v8, %v465_v33  ;;  %v467_v60 = vrot.slane %v6218_v35, 1  ;;  %v4583_v16 = vpack.c.bf16 %v402_v53, %v398_v46  ;;  %v4555_v8 = vpack.c.bf16 %v608_v54, %v604_v42  ;;  %v615_v42 = vld [vmem:[#allocation7 + $0x3f0] sm:$0xff]  ;;  %v418_v46 = vld [vmem:[#allocation7 + $0x1e8] sm:$0xff]  ;;  %v413_v53 = vld [vmem:[#allocation7 + $0x1c0] sm:$0xff] }
  0xf0   : > { %700 = vmatmul.mubr.f32.gmra.mrb[6].mxu0 %v6192_v5  ;;  %796 = vmatmul.mubr.f32.gmra.mrb[6].mxu1 %v6195_v7  ;;  %v4585_v10 = vpack.c.bf16 %v401_v56, %v397_v55  ;;  %v417_v54 = vld [vmem:[#allocation7 + $0x1e0] sm:$0xff]  ;;  %v360_v55 = vld [vmem:[#allocation7 + $0x18] sm:$0xff] }
  0xf1   : > { %705 = vmatprep.mubr.f32.mxu0 %v5798_v0  ;;  %801 = vmatprep.mubr.f32.mxu1 %v5798_v0  ;;  %v6246_v23 = vsel %vm453_vm0, %v465_v33, %v467_v60  ;;  %v4559_v33 = vpack.c.bf16 %v616_v20, %v612_v17  ;;  %v364_v56 = vld [vmem:[#allocation7 + $0x38] sm:$0xff] }
  0xf2   : > { %4546 = vmatpush1.bf16.msra.mxu1 %v4545_v15  ;;  %4576 = vmatprep.subr.bf16.mxu0 %v4575_v18  ;;  %v607_v15 = vld [vmem:[#allocation7 + $0x3b0] sm:$0xff]  ;;  %v406_v18 = vld [vmem:[#allocation7 + $0x188] sm:$0xff] }
  0xf3   : > { %4548 = vmatprep.subr.bf16.mxu1 %v4547_v19  ;;  %4578 = vmatpush1.bf16.msra.mxu0 %v4577_v21  ;;  %v410_v19 = vld [vmem:[#allocation7 + $0x1a8] sm:$0xff]  ;;  %v405_v21 = vld [vmem:[#allocation7 + $0x180] sm:$0xff]  ;;  %v4557_v39 = vpack.c.bf16 %v607_v15, %v603_v4  ;;  %v6267_v4 = vsel %vm453_vm0, %v499_v61, %v501_v28 }
  0xf4   : > { %706 = vmatmul.mubr.f32.gmra.mrb[8].mxu0 %v6210_v30  ;;  %802 = vmatmul.mubr.f32.gmra.mrb[8].mxu1 %v6213_v32  ;;  %v4589_v34 = vpack.c.bf16 %v409_v22, %v405_v21  ;;  %8524 = vst [vmem:[#allocation32_spill] sm:$0xff] %v6267_v4 }
  0xf5   : > { %711 = vmatprep.mubr.f32.mxu0 %v5798_v0  ;;  %807 = vmatprep.mubr.f32.mxu1 %v5798_v0 }
  0xf6   : > { %4550 = vmatpush1.bf16.msra.mxu1 %v4549_v37  ;;  %4580 = vmatprep.subr.bf16.mxu0 %v4579_v40  ;;  %v6254_v37 = vld [vmem:[%s6088_s18 + $0x48] sm:$0xff]  ;;  %v4587_v40 = vpack.c.bf16 %v410_v19, %v406_v18  ;;  %v4595_v19 = vpack.c.bf16 %v364_v56, %v360_v55 }
  0xf7   : > { %4552 = vmatprep.subr.bf16.mxu1 %v4551_v41  ;;  %4582 = vmatpush1.bf16.msra.mxu0 %v4581_v45  ;;  %v611_v41 = vld [vmem:[#allocation7 + $0x3d0] sm:$0xff]  ;;  %v414_v45 = vld [vmem:[#allocation7 + $0x1c8] sm:$0xff]  ;;  %v471_v15 = vrot.slane %v6254_v37, 1 }
  0xf8   : > { %712 = vmatmul.mubr.f32.gmra.mrb[10].mxu0 %v6228_v57  ;;  %808 = vmatmul.mubr.f32.gmra.mrb[10].mxu1 %v6231_v58  ;;  %v4561_v17 = vpack.c.bf16 %v615_v42, %v611_v41  ;;  %v4591_v18 = vpack.c.bf16 %v418_v46, %v414_v45  ;;  %v6290_v41 = vld [vmem:[%s6088_s18 + $0x58] sm:$0xff]  ;;  %v6308_v46 = vld [vmem:[%s6088_s18 + $0x60] sm:$0xff] }
  0xf9   : > { %717 = vmatprep.mubr.f32.mxu0 %v5798_v0  ;;  %813 = vmatprep.mubr.f32.mxu1 %v5798_v0  ;;  %v6282_v61 = vsel %vm453_vm0, %v469_v27, %v471_v15  ;;  %v6293_v42 = vld [vmem:[%s6088_s18 + $0xd8] sm:$0xff]  ;;  %v477_v56 = vrot.slane %v6308_v46, 1 }
  0xfa   : > { %4554 = vmatpush1.bf16.msra.mxu1 %v4553_v3  ;;  %4584 = vmatprep.subr.bf16.mxu0 %v4583_v16  ;;  %v6264_v3 = vsel %vm453_vm0, %v467_v60, %v469_v27  ;;  %v503_v16 = vrot.slane %v6257_v38, 1  ;;  %v4593_v60 = vpack.c.bf16 %v417_v54, %v413_v53  ;;  %8527 = vst [vmem:[#allocation35_spill] sm:$0xff] %v6293_v42  ;;  %v507_v45 = vrot.slane %v6293_v42, 1  ;;  %v6311_v53 = vld [vmem:[%s6088_s18 + $0xe0] sm:$0xff] }
  0xfb   : > { %4556 = vmatprep.subr.bf16.mxu1 %v4555_v8  ;;  %4586 = vmatpush1.bf16.msra.mxu0 %v4585_v10  ;;  %v6272_v8 = vld [vmem:[%s6088_s18 + $0x50] sm:$0xff]  ;;  %8529 = vst [vmem:[#allocation37_spill] sm:$0xff] %v6311_v53  ;;  %v356_v42 = vld [vmem:[%s278_s21] sm:$0xff] }
  0xfc   : > { %718 = vmatmul.mubr.f32.gmra.mrb[12].mxu0 %v6246_v23  ;;  %814 = vmatmul.mubr.f32.gmra.mrb[12].mxu1 %v6249_v24  ;;  %v6275_v10 = vld [vmem:[%s6088_s18 + $0xd0] sm:$0xff]  ;;  %v6285_v20 = vsel %vm453_vm0, %v501_v28, %v503_v16  ;;  %v473_v21 = vrot.slane %v6272_v8, 1  ;;  %v1765_v24 = vld [vmem:[#allocation7 + $0x4a8] sm:$0xff] }
  0xfd   : > { %723 = vmatprep.mubr.f32.mxu0 %v5798_v0  ;;  %819 = vmatprep.mubr.f32.mxu1 %v5798_v0  ;;  %8525 = vst [vmem:[#allocation33_spill] sm:$0xff] %v6275_v10  ;;  %8526 = vst [vmem:[#allocation34_spill] sm:$0xff] %v6285_v20  ;;  %v505_v22 = vrot.slane %v6275_v10, 1  ;;  %v368_v10 = vld [vmem:[#allocation7 + $0x58] sm:$0xff] }
  0xfe   : > { %4558 = vmatpush1.bf16.msra.mxu1 %v4557_v39  ;;  %4588 = vmatprep.subr.bf16.mxu0 %v4587_v40  ;;  %v1745_v39 = vld [vmem:[#allocation7 + $0x408] sm:$0xff]  ;;  %v6300_v27 = vsel %vm453_vm0, %v471_v15, %v473_v21  ;;  %v509_v15 = vrot.slane %v6311_v53, 1 }
  0xff   : > { %4560 = vmatprep.subr.bf16.mxu1 %v4559_v33  ;;  %4590 = vmatpush1.bf16.msra.mxu0 %v4589_v34  ;;  %v1749_v40 = vld [vmem:[#allocation7 + $0x428] sm:$0xff]  ;;  %v6303_v28 = vsel %vm453_vm0, %v503_v16, %v505_v22  ;;  %v475_v34 = vrot.slane %v6290_v41, 1  ;;  %v6321_v55 = vsel %vm453_vm0, %v505_v22, %v507_v45  ;;  %v6326_v16 = vld [vmem:[%s6088_s18 + $0x68] sm:$0xff]  ;;  %v6344_v22 = vld [vmem:[%s6088_s18 + $0x70] sm:$0xff] }
 0x100   : > { %724 = vmatmul.mubr.f32.gmra.mrb[14].mxu0 %v6264_v3  ;;  %820 = vmatmul.mubr.f32.gmra.mrb[14].mxu1 %v6267_v4  ;;  %v4627_v33 = vpack.c.bf16 %v1749_v40, %v1745_v39  ;;  %8528 = vst [vmem:[#allocation36_spill] sm:$0xff] %v6303_v28  ;;  %8530 = vst [vmem:[#allocation38_spill] sm:$0xff] %v6321_v55  ;;  %v6347_v39 = vld [vmem:[%s6088_s18 + $0xf0] sm:$0xff] }
 0x101   : > { %729 = vmatprep.mubr.f32.mxu0 %v5798_v0  ;;  %825 = vmatprep.mubr.f32.mxu1 %v5798_v0  ;;  %v6318_v54 = vsel %vm453_vm0, %v473_v21, %v475_v34  ;;  %8533 = vst [vmem:[#allocation41_spill] sm:$0xff] %v6347_v39  ;;  %v1756_v4 = vld [vmem:[#allocation7 + $0x460] sm:$0xff] }
 0x102   : > { %4562 = vmatpush1.bf16.msra.mxu1 %v4561_v17  ;;  %4592 = vmatprep.subr.bf16.mxu0 %v4591_v18  ;;  %v6329_v17 = vld [vmem:[%s6088_s18 + $0xe8] sm:$0xff]  ;;  %v6336_v18 = vsel %vm453_vm0, %v475_v34, %v477_v56  ;;  %v481_v34 = vrot.slane %v6344_v22, 1 }
 0x103   : > { %4594 = vmatpush1.bf16.msra.mxu0 %v4593_v60  ;;  %4596 = vmatprep.subr.bf16.mxu1 %v4595_v19  ;;  %8531 = vst [vmem:[#allocation39_spill] sm:$0xff] %v6329_v17  ;;  %v6339_v60 = vsel %vm453_vm0, %v507_v45, %v509_v15  ;;  %v479_v19 = vrot.slane %v6326_v16, 1  ;;  %v511_v21 = vrot.slane %v6329_v17, 1  ;;  %v513_v45 = vrot.slane %v6347_v39, 1  ;;  %v6365_v17 = vld [vmem:[%s6088_s18 + $0xf8] sm:$0xff] }
 0x104   : > { %730 = vmatmul.mubr.f32.gmra.mrb[16].mxu0 %v6282_v61  ;;  %826 = vmatmul.mubr.f32.gmra.mrb[16].mxu1 %v6285_v20  ;;  %8532 = vst [vmem:[#allocation40_spill] sm:$0xff] %v6339_v60  ;;  %8535 = vst [vmem:[#allocation43_spill] sm:$0xff] %v6365_v17  ;;  %v483_v39 = vrot.slane %v6362_v59, 1  ;;  %v515_v53 = vrot.slane %v6365_v17, 1  ;;  %v8538_v17 = vrot.slane %v6120_v50, 1  ;;  %v1757_v20 = vld [vmem:[#allocation7 + $0x468] sm:$0xff] }
 0x105   : > { %735 = vmatprep.mubr.f32.mxu0 %v5798_v0  ;;  %831 = vmatprep.mubr.f32.mxu1 %v5798_v0  ;;  %v6354_v40 = vsel %vm453_vm0, %v477_v56, %v479_v19  ;;  %v6372_v56 = vsel %vm453_vm0, %v479_v19, %v481_v34 }
 0x106   : > { %4628 = vmatprep.subr.bf16.mxu0 %v4627_v33  ;;  %v6357_v33 = vsel %vm453_vm0, %v509_v15, %v511_v21  ;;  %v6375_v15 = vsel %vm453_vm0, %v511_v21, %v513_v45  ;;  %v6386_v19 = vsel %vm453_vm0, %v481_v34, %v483_v39  ;;  %v6389_v21 = vsel %vm453_vm0, %v513_v45, %v515_v53  ;;  %v363_v45 = vld [vmem:[#allocation7 + $0x30] sm:$0xff] }
 0x107   : > { %8534 = vst [vmem:[#allocation42_spill] sm:$0xff] %v6357_v33  ;;  %8536 = vst [vmem:[#allocation44_spill] sm:$0xff] %v6375_v15 }
 0x108   : > { %736 = vmatmul.mubr.f32.gmra.mrb[18].mxu0 %v6300_v27  ;;  %832 = vmatmul.mubr.f32.gmra.mrb[18].mxu1 %v6303_v28  ;;  %8537 = vst [vmem:[#allocation45_spill] sm:$0xff] %v6389_v21  ;;  %v371_v28 = vld [vmem:[#allocation7 + $0x70] sm:$0xff] }
 0x109   : > { %741 = vmatprep.mubr.f32.mxu0 %v5798_v0  ;;  %837 = vmatprep.mubr.f32.mxu1 %v5798_v0 }
 0x10c   : > { %742 = vmatmul.mubr.f32.gmra.mrb[20].mxu0 %v6318_v54  ;;  %838 = vmatmul.mubr.f32.gmra.mrb[20].mxu1 %v6321_v55  ;;  %v1748_v55 = vld [vmem:[#allocation7 + $0x420] sm:$0xff] }
 0x10d   : > { %747 = vmatprep.mubr.f32.mxu0 %v5798_v0  ;;  %843 = vmatprep.mubr.f32.mxu1 %v5798_v0 }
 0x110   : > { %748 = vmatmul.mubr.f32.gmra.mrb[22].mxu0 %v6336_v18  ;;  %844 = vmatmul.mubr.f32.gmra.mrb[22].mxu1 %v6339_v60  ;;  %v359_v60 = vld [vmem:[#allocation7 + $0x10] sm:$0xff] }
 0x111   : > { %753 = vmatprep.mubr.f32.mxu0 %v5798_v0  ;;  %849 = vmatprep.mubr.f32.mxu1 %v5798_v0  ;;  %v4597_v38 = vpack.c.bf16 %v363_v45, %v359_v60  ;;  %v375_v60 = vld [vmem:[#allocation7 + $0x90] sm:$0xff] }
 0x112   : > { %v379_v45 = vld [vmem:[#allocation7 + $0xb0] sm:$0xff] }
 0x114   : > { %754 = vmatmul.mubr.f32.gmra.mrb[24].mxu0 %v6354_v40  ;;  %850 = vmatmul.mubr.f32.gmra.mrb[24].mxu1 %v6357_v33  ;;  %v550_v33 = vrot.slane %v356_v42, 1  ;;  %v372_v42 = vld [vmem:[#allocation7 + $0x78] sm:$0xff] }
 0x115   : > { %759 = vmatprep.mubr.f32.mxu0 %v5798_v0  ;;  %855 = vmatprep.mubr.f32.mxu1 %v5798_v0 }
 0x116   : > { %v6401_v34 = vsel %vm453_vm0, %v515_v53, %v550_v33  ;;  %v376_v53 = vld [vmem:[#allocation7 + $0x98] sm:$0xff] }
 0x117   : > { %8539 = vst [vmem:[#allocation46_spill] sm:$0xff] %v6401_v34 }
 0x118   : > { %760 = vmatmul.mubr.f32.gmra.mrb[26].mxu0 %v6372_v56  ;;  %856 = vmatmul.mubr.f32.gmra.mrb[26].mxu1 %v6375_v15  ;;  %v6398_v15 = vsel %vm453_vm0, %v483_v39, %v8538_v17  ;;  %v4599_v17 = vpack.c.bf16 %v372_v42, %v368_v10  ;;  %v367_v39 = vld [vmem:[#allocation7 + $0x50] sm:$0xff]  ;;  %v4631_v42 = vpack.c.bf16 %v1757_v20, %v1753_v63 }
 0x119   : > { %765 = vmatprep.mubr.f32.mxu0 %v5798_v0  ;;  %861 = vmatprep.mubr.f32.mxu1 %v5798_v0  ;;  %v4601_v10 = vpack.c.bf16 %v371_v28, %v367_v39  ;;  %v4605_v28 = vpack.c.bf16 %v379_v45, %v375_v60  ;;  %v383_v63 = vld [vmem:[#allocation7 + $0xd0] sm:$0xff]  ;;  %v396_v39 = vld [vmem:[#allocation7 + $0x138] sm:$0xff] }
 0x11a   : > { %v395_v60 = vld [vmem:[#allocation7 + $0x130] sm:$0xff]  ;;  %v400_v45 = vld [vmem:[#allocation7 + $0x158] sm:$0xff] }
 0x11c   : > { %766 = vmatmul.mubr.f32.gmra.mrb[28].mxu0 %v6386_v19  ;;  %862 = vmatmul.mubr.f32.gmra.mrb[28].mxu1 %v6389_v21  ;;  %v1744_v21 = vld [vmem:[#allocation7 + $0x400] sm:$0xff] }
 0x11d   : > { %771 = vmatprep.mubr.f32.mxu0 %v5798_v0  ;;  %867 = vmatprep.mubr.f32.mxu1 %v5798_v0  ;;  %v4629_v33 = vpack.c.bf16 %v1748_v55, %v1744_v21  ;;  %v4603_v55 = vpack.c.bf16 %v380_v36, %v376_v53  ;;  %v384_v21 = vld [vmem:[#allocation7 + $0xd8] sm:$0xff]  ;;  %v387_v36 = vld [vmem:[#allocation7 + $0xf0] sm:$0xff]  ;;  %v1768_v53 = vld [vmem:[#allocation7 + $0x4c0] sm:$0xff] }
 0x120   : > { %772 = vmatmul.mubr.f32.gmra.mrb[30].mxu0 %v6398_v15  ;;  %868 = vmatmul.mubr.f32.gmra.mrb[30].mxu1 %v6401_v34  ;;  %v1752_v34 = vld [vmem:[#allocation7 + $0x440] sm:$0xff] }
 0x121   : > { %938 = vmatprep.mubr.f32.mxu1 %v5798_v0  ;;  %1195 = vmatprep.mubr.f32.mxu0 %v5798_v0  ;;  %v4633_v12 = vpack.c.bf16 %v1756_v4, %v1752_v34  ;;  %v392_v34 = vld [vmem:[#allocation7 + $0x118] sm:$0xff] }
 0x124   : > { %939 = vmatmul.mubr.f32.vlgmr.msra.gmra.mrb[32].mxu1 %v6136_v6  ;;  %1196 = vmatmul.mubr.f32.vlgmr.msra.gmra.mrb[0].mxu0 %v6114_v47  ;;  %v1761_v6 = vld [vmem:[#allocation7 + $0x488] sm:$0xff]  ;;  %v388_v47 = vld [vmem:[#allocation7 + $0xf8] sm:$0xff] }
 0x125   : > { %4598 = vmatpush1.bf16.msra.mxu1 %v4597_v38  ;;  %944 = vmatprep.mubr.f32.mxu1 %v5798_v0  ;;  %v1760_v38 = vld [vmem:[#allocation7 + $0x480] sm:$0xff]  ;;  %v4635_v20 = vpack.c.bf16 %v1765_v24, %v1761_v6  ;;  %v4607_v4 = vpack.c.bf16 %v388_v47, %v384_v21  ;;  %v4609_v24 = vpack.c.bf16 %v387_v36, %v383_v63 }
 0x126   : > { %1201 = vmatprep.mubr.f32.mxu0 %v5798_v0  ;;  %4600 = vmatprep.subr.bf16.mxu1 %v4599_v17  ;;  %v1769_v17 = vld [vmem:[#allocation7 + $0x4c8] sm:$0xff]  ;;  %v1776_v21 = vld [vmem:[#allocation7 + $0x500] sm:$0xff] }
 0x127   : > { %4630 = vmatpush1.bf16.msra.mxu0 %v4629_v33  ;;  %v1772_v33 = vld [vmem:[#allocation7 + $0x4e0] sm:$0xff] }
 0x128   : > { %945 = vmatmul.mubr.f32.gmra.mrb[34].mxu1 %v6155_v25  ;;  %1202 = vmatmul.mubr.f32.gmra.mrb[2].mxu0 %v6117_v48  ;;  %v4637_v25 = vpack.c.bf16 %v1764_v52, %v1760_v38  ;;  %v1773_v48 = vld [vmem:[#allocation7 + $0x4e8] sm:$0xff]  ;;  %v4611_v52 = vpack.c.bf16 %v396_v39, %v392_v34  ;;  %v1780_v6 = vld [vmem:[#allocation7 + $0x520] sm:$0xff]  ;;  %v399_v38 = vld [vmem:[#allocation7 + $0x150] sm:$0xff] }
 0x129   : > { %950 = vmatprep.mubr.f32.mxu1 %v5798_v0  ;;  %1207 = vmatprep.mubr.f32.mxu0 %v5798_v0  ;;  %v412_v34 = vld [vmem:[#allocation7 + $0x1b8] sm:$0xff]  ;;  %v407_v39 = vld [vmem:[#allocation7 + $0x190] sm:$0xff] }
 0x12a   : > { %4602 = vmatpush1.bf16.msra.mxu1 %v4601_v10  ;;  %4632 = vmatprep.subr.bf16.mxu0 %v4631_v42  ;;  %v391_v10 = vld [vmem:[#allocation7 + $0x110] sm:$0xff]  ;;  %v1777_v42 = vld [vmem:[#allocation7 + $0x508] sm:$0xff] }
 0x12b   : > { %4604 = vmatprep.subr.bf16.mxu1 %v4603_v55  ;;  %4634 = vmatpush1.bf16.msra.mxu0 %v4633_v12  ;;  %v4639_v12 = vpack.c.bf16 %v1773_v48, %v1769_v17  ;;  %v404_v55 = vld [vmem:[#allocation7 + $0x178] sm:$0xff]  ;;  %v4613_v47 = vpack.c.bf16 %v395_v60, %v391_v10  ;;  %v1788_v17 = vld [vmem:[#allocation7 + $0x560] sm:$0xff]  ;;  %v1793_v60 = vld [vmem:[#allocation7 + $0x588] sm:$0xff] }
 0x12c   : > { %951 = vmatmul.mubr.f32.gmra.mrb[36].mxu1 %v6174_v43  ;;  %1208 = vmatmul.mubr.f32.gmra.mrb[4].mxu0 %v6130_v1  ;;  %v4641_v43 = vpack.c.bf16 %v1772_v33, %v1768_v53  ;;  %v1781_v1 = vld [vmem:[#allocation7 + $0x528] sm:$0xff]  ;;  %v4615_v36 = vpack.c.bf16 %v404_v55, %v400_v45  ;;  %v411_v53 = vld [vmem:[#allocation7 + $0x1b0] sm:$0xff]  ;;  %v416_v10 = vld [vmem:[#allocation7 + $0x1d8] sm:$0xff] }
 0x12d   : > { %956 = vmatprep.mubr.f32.mxu1 %v5798_v0  ;;  %1213 = vmatprep.mubr.f32.mxu0 %v5798_v0  ;;  %v4643_v63 = vpack.c.bf16 %v1781_v1, %v1777_v42  ;;  %v1796_v45 = vld [vmem:[#allocation7 + $0x5a0] sm:$0xff]  ;;  %v415_v42 = vld [vmem:[#allocation7 + $0x1d0] sm:$0xff] }
 0x12e   : > { %4606 = vmatpush1.bf16.msra.mxu1 %v4605_v28  ;;  %4636 = vmatprep.subr.bf16.mxu0 %v4635_v20  ;;  %v403_v28 = vld [vmem:[#allocation7 + $0x170] sm:$0xff]  ;;  %v408_v20 = vld [vmem:[#allocation7 + $0x198] sm:$0xff] }
 0x12f   : > { %4608 = vmatprep.subr.bf16.mxu1 %v4607_v4  ;;  %4638 = vmatpush1.bf16.msra.mxu0 %v4637_v25  ;;  %v1785_v4 = vld [vmem:[#allocation7 + $0x548] sm:$0xff]  ;;  %v1784_v25 = vld [vmem:[#allocation7 + $0x540] sm:$0xff]  ;;  %v4617_v48 = vpack.c.bf16 %v403_v28, %v399_v38  ;;  %v419_v1 = vld [vmem:[#allocation7 + $0x1f0] sm:$0xff] }
 0x130   : > { %957 = vmatmul.mubr.f32.gmra.mrb[38].mxu1 %v6192_v5  ;;  %1214 = vmatmul.mubr.f32.gmra.mrb[6].mxu0 %v6146_v13  ;;  %v4645_v5 = vpack.c.bf16 %v1780_v6, %v1776_v21  ;;  %v1789_v13 = vld [vmem:[#allocation7 + $0x568] sm:$0xff]  ;;  %v1804_v38 = vld [vmem:[#allocation7 + $0x5e0] sm:$0xff]  ;;  %v1747_v28 = vld [vmem:[#allocation7 + $0x418] sm:$0xff] }
 0x131   : > { %962 = vmatprep.mubr.f32.mxu1 %v5798_v0  ;;  %1219 = vmatprep.mubr.f32.mxu0 %v5798_v0  ;;  %v4647_v33 = vpack.c.bf16 %v1789_v13, %v1785_v4  ;;  %v1755_v13 = vld [vmem:[#allocation7 + $0x458] sm:$0xff] }
 0x132   : > { %4610 = vmatpush1.bf16.msra.mxu1 %v4609_v24  ;;  %4640 = vmatprep.subr.bf16.mxu0 %v4639_v12  ;;  %v4619_v24 = vpack.c.bf16 %v412_v34, %v408_v20  ;;  %v420_v12 = vld [vmem:[#allocation7 + $0x1f8] sm:$0xff] }
 0x133   : > { %4612 = vmatprep.subr.bf16.mxu1 %v4611_v52  ;;  %4642 = vmatpush1.bf16.msra.mxu0 %v4641_v43  ;;  %v1792_v52 = vld [vmem:[#allocation7 + $0x580] sm:$0xff]  ;;  %v4621_v43 = vpack.c.bf16 %v411_v53, %v407_v39  ;;  %v4623_v21 = vpack.c.bf16 %v420_v12, %v416_v10  ;;  %v1759_v34 = vld [vmem:[#allocation7 + $0x478] sm:$0xff] }
 0x134   : > { %963 = vmatmul.mubr.f32.gmra.mrb[40].mxu1 %v6210_v30  ;;  %1220 = vmatmul.mubr.f32.gmra.mrb[8].mxu0 %v6163_v29  ;;  %v4649_v30 = vpack.c.bf16 %v1788_v17, %v1784_v25  ;;  %v1797_v29 = vld [vmem:[#allocation7 + $0x5a8] sm:$0xff]  ;;  %v4653_v6 = vpack.c.bf16 %v1796_v45, %v1792_v52  ;;  %v8559_v25 = vld [vmem:[#allocation46_spill] sm:$0xff]  ;;  %v1763_v12 = vld [vmem:[#allocation7 + $0x498] sm:$0xff] }
 0x135   : > { %968 = vmatprep.mubr.f32.mxu1 %v5798_v0  ;;  %1225 = vmatprep.mubr.f32.mxu0 %v5798_v0  ;;  %v4651_v55 = vpack.c.bf16 %v1797_v29, %v1793_v60  ;;  %v8560_v17 = vld [vmem:[#allocation43_spill] sm:$0xff]  ;;  %v2553_v39 = vld [vmem:[#allocation7 + $0x620] sm:$0xff]  ;;  %v1754_v60 = vld [vmem:[#allocation7 + $0x450] sm:$0xff] }
 0x136   : > { %4614 = vmatpush1.bf16.msra.mxu1 %v4613_v47  ;;  %4644 = vmatprep.subr.bf16.mxu0 %v4643_v63  ;;  %v1805_v47 = vld [vmem:[#allocation7 + $0x5e8] sm:$0xff]  ;;  %v1751_v63 = vld [vmem:[#allocation7 + $0x438] sm:$0xff]  ;;  %v1758_v29 = vld [vmem:[#allocation7 + $0x470] sm:$0xff] }
 0x137   : > { %4616 = vmatprep.subr.bf16.mxu1 %v4615_v36  ;;  %4646 = vmatpush1.bf16.msra.mxu0 %v4645_v5  ;;  %v4625_v36 = vpack.c.bf16 %v419_v1, %v415_v42  ;;  %v4659_v4 = vpack.c.bf16 %v1751_v63, %v1747_v28  ;;  %v2558_v45 = vld [vmem:[#allocation7 + $0x648] sm:$0xff]  ;;  %v1767_v42 = vld [vmem:[#allocation7 + $0x4b8] sm:$0xff]  ;;  %v2557_v1 = vld [vmem:[#allocation7 + $0x640] sm:$0xff] }
 0x138   : > { %969 = vmatmul.mubr.f32.gmra.mrb[42].mxu1 %v6228_v57  ;;  %1226 = vmatmul.mubr.f32.gmra.mrb[10].mxu0 %v6182_v49  ;;  %v1801_v57 = vld [vmem:[#allocation7 + $0x5c8] sm:$0xff]  ;;  %v1800_v49 = vld [vmem:[#allocation7 + $0x5c0] sm:$0xff]  ;;  %v4667_v63 = vpack.c.bf16 %v1767_v42, %v1763_v12  ;;  %v1786_v12 = vld [vmem:[#allocation7 + $0x550] sm:$0xff] }
 0x139   : > { %974 = vmatprep.mubr.f32.mxu1 %v5798_v0  ;;  %1231 = vmatprep.mubr.f32.mxu0 %v5798_v0  ;;  %v4655_v20 = vpack.c.bf16 %v1805_v47, %v1801_v57  ;;  %v4657_v5 = vpack.c.bf16 %v1804_v38, %v1800_v49  ;;  %v4665_v47 = vpack.c.bf16 %v1758_v29, %v1754_v60  ;;  %v1762_v49 = vld [vmem:[#allocation7 + $0x490] sm:$0xff]  ;;  %v1795_v42 = vld [vmem:[#allocation7 + $0x598] sm:$0xff] }
 0x13a   : > { %4618 = vmatpush1.bf16.msra.mxu1 %v4617_v48  ;;  %4648 = vmatprep.subr.bf16.mxu0 %v4647_v33  ;;  %v2549_v48 = vld [vmem:[#allocation7 + $0x600] sm:$0xff]  ;;  %v1766_v38 = vld [vmem:[#allocation7 + $0x4b0] sm:$0xff] }
 0x13b   : > { %4620 = vmatprep.subr.bf16.mxu1 %v4619_v24  ;;  %4650 = vmatpush1.bf16.msra.mxu0 %v4649_v30  ;;  %v6547_v24 = vld [vmem:[%s6088_s18 + $0x10] sm:$0xff]  ;;  %v4663_v30 = vpack.c.bf16 %v1759_v34, %v1755_v13  ;;  %v4693_v52 = vpack.c.bf16 %v2553_v39, %v2549_v48  ;;  %v1787_v13 = vld [vmem:[#allocation7 + $0x558] sm:$0xff] }
 0x13c   : > { %975 = vmatmul.mubr.f32.gmra.mrb[44].mxu1 %v6246_v23  ;;  %1232 = vmatmul.mubr.f32.gmra.mrb[12].mxu0 %v6200_v11  ;;  %v8546_v11 = vld [vmem:[#allocation29_spill] sm:$0xff]  ;;  %v8551_v23 = vld [vmem:[#allocation40_spill] sm:$0xff]  ;;  %v1649_v10 = vrot.slane %v6547_v24, 2  ;;  %v2581_v39 = vld [vmem:[#allocation7 + $0x700] sm:$0xff] }
 0x13d   : > { %980 = vmatprep.mubr.f32.mxu1 %v5798_v0  ;;  %1237 = vmatprep.mubr.f32.mxu0 %v5798_v0  ;;  %v1791_v48 = vld [vmem:[#allocation7 + $0x578] sm:$0xff] }
 0x13e   : > { %4622 = vmatpush1.bf16.msra.mxu1 %v4621_v43  ;;  %4652 = vmatprep.subr.bf16.mxu0 %v4651_v55  ;;  %v2562_v43 = vld [vmem:[#allocation7 + $0x668] sm:$0xff]  ;;  %v2561_v55 = vld [vmem:[#allocation7 + $0x660] sm:$0xff] }
 0x13f   : > { %4624 = vmatprep.subr.bf16.mxu1 %v4623_v21  ;;  %4654 = vmatpush1.bf16.msra.mxu0 %v4653_v6  ;;  %v6557_v6 = vld [vmem:[%s6088_s18 + $0x18] sm:$0xff]  ;;  %v4695_v28 = vpack.c.bf16 %v2562_v43, %v2558_v45  ;;  %v4679_v43 = vpack.c.bf16 %v1791_v48, %v1787_v13  ;;  %v2552_v48 = vld [vmem:[#allocation7 + $0x618] sm:$0xff] }
 0x140   : > { %981 = vmatmul.mubr.f32.gmra.mrb[46].mxu1 %v6264_v3  ;;  %1238 = vmatmul.mubr.f32.gmra.mrb[14].mxu0 %v6218_v35  ;;  %v8548_v35 = vld [vmem:[#allocation31_spill] sm:$0xff]  ;;  %v8553_v3 = vld [vmem:[#allocation42_spill] sm:$0xff]  ;;  %v1651_v57 = vrot.slane %v6557_v6, 2 }
 0x141   : > { %986 = vmatprep.mubr.f32.mxu1 %v5798_v0  ;;  %1243 = vmatprep.mubr.f32.mxu0 %v5798_v0  ;;  %v2610_v13 = vld [vmem:[#allocation7 + $0x7e8] sm:$0xff] }
 0x142   : > { %4626 = vmatpush1.bf16.msra.mxu1 %v4625_v36  ;;  %4656 = vmatprep.subr.bf16.mxu0 %v4655_v20  ;;  %v1771_v36 = vld [vmem:[#allocation7 + $0x4d8] sm:$0xff]  ;;  %v4697_v20 = vpack.c.bf16 %v2561_v55, %v2557_v1  ;;  %v2590_v55 = vld [vmem:[#allocation7 + $0x748] sm:$0xff] }
 0x143   : > { %4658 = vmatpush1.bf16.msra.mxu0 %v4657_v5  ;;  %4660 = vmatprep.subr.bf16.mxu1 %v4659_v4  ;;  %v2566_v5 = vld [vmem:[#allocation7 + $0x688] sm:$0xff] }
 0x144   : > { %987 = vmatmul.mubr.f32.gmra.mrb[48].mxu1 %v6282_v61  ;;  %1244 = vmatmul.mubr.f32.gmra.mrb[16].mxu0 %v6236_v62  ;;  %v8550_v62 = vld [vmem:[#allocation33_spill] sm:$0xff]  ;;  %v8555_v61 = vld [vmem:[#allocation44_spill] sm:$0xff]  ;;  %v2570_v4 = vld [vmem:[#allocation7 + $0x6a8] sm:$0xff] }
 0x145   : > { %992 = vmatprep.mubr.f32.mxu1 %v5798_v0  ;;  %1249 = vmatprep.mubr.f32.mxu0 %v5798_v0 }
 0x148   : > { %993 = vmatmul.mubr.f32.gmra.mrb[50].mxu1 %v6300_v27  ;;  %1250 = vmatmul.mubr.f32.gmra.mrb[18].mxu0 %v6254_v37  ;;  %v8552_v37 = vld [vmem:[#allocation35_spill] sm:$0xff]  ;;  %v8557_v27 = vld [vmem:[#allocation45_spill] sm:$0xff] }
 0x149   : > { %998 = vmatprep.mubr.f32.mxu1 %v5798_v0  ;;  %1255 = vmatprep.mubr.f32.mxu0 %v5798_v0 }
 0x14c   : > { %999 = vmatmul.mubr.f32.gmra.mrb[52].mxu1 %v6318_v54  ;;  %1256 = vmatmul.mubr.f32.gmra.mrb[20].mxu0 %v6272_v8  ;;  %v8554_v8 = vld [vmem:[#allocation37_spill] sm:$0xff]  ;;  %v6532_v54 = vld [vmem:[%s6088_s18] sm:$0xff] }
 0x14d   : > { %1004 = vmatprep.mubr.f32.mxu1 %v5798_v0  ;;  %1261 = vmatprep.mubr.f32.mxu0 %v5798_v0 }
 0x150   : > { %1005 = vmatmul.mubr.f32.gmra.mrb[54].mxu1 %v6336_v18  ;;  %1262 = vmatmul.mubr.f32.gmra.mrb[22].mxu0 %v6290_v41  ;;  %v8556_v41 = vld [vmem:[#allocation39_spill] sm:$0xff]  ;;  %v1646_v18 = vrot.slane %v6532_v54, 2 }
 0x151   : > { %1010 = vmatprep.mubr.f32.mxu1 %v5798_v0  ;;  %1267 = vmatprep.mubr.f32.mxu0 %v5798_v0 }
 0x154   : > { %1011 = vmatmul.mubr.f32.gmra.mrb[56].mxu1 %v6354_v40  ;;  %1268 = vmatmul.mubr.f32.gmra.mrb[24].mxu0 %v6308_v46  ;;  %v8558_v46 = vld [vmem:[#allocation41_spill] sm:$0xff] }
 0x155   : > { %1016 = vmatprep.mubr.f32.mxu1 %v5798_v0  ;;  %1273 = vmatprep.mubr.f32.mxu0 %v5798_v0  ;;  %v6536_v40 = vld [vmem:[%s6088_s18 + $0x8] sm:$0xff] }
 0x158   : > { %1017 = vmatmul.mubr.f32.gmra.mrb[58].mxu1 %v6372_v56  ;;  %1274 = vmatmul.mubr.f32.gmra.mrb[26].mxu0 %v6326_v16  ;;  %v1647_v56 = vrot.slane %v6536_v40, 2 }
 0x159   : > { %1022 = vmatprep.mubr.f32.mxu1 %v5798_v0  ;;  %1279 = vmatprep.mubr.f32.mxu0 %v5798_v0 }
 0x15a   : > { %v6544_v53 = vsel %vm1645_vm1, %v1646_v18, %v1647_v56  ;;  %v6554_v21 = vsel %vm1645_vm1, %v1647_v56, %v1649_v10  ;;  %v1778_v18 = vld [vmem:[#allocation7 + $0x510] sm:$0xff] }
 0x15b   : > { %v1782_v56 = vld [vmem:[#allocation7 + $0x530] sm:$0xff] }
 0x15c   : > { %1023 = vmatmul.mubr.f32.gmra.mrb[60].mxu1 %v6386_v19  ;;  %1280 = vmatmul.mubr.f32.gmra.mrb[28].mxu0 %v6344_v22  ;;  %v1750_v19 = vld [vmem:[#allocation7 + $0x430] sm:$0xff]  ;;  %v4677_v29 = vpack.c.bf16 %v1782_v56, %v1778_v18 }
 0x15d   : > { %1028 = vmatprep.mubr.f32.mxu1 %v5798_v0  ;;  %1285 = vmatprep.mubr.f32.mxu0 %v5798_v0 }
 0x160   : > { %1029 = vmatmul.mubr.f32.gmra.mrb[62].mxu1 %v6398_v15  ;;  %1286 = vmatmul.mubr.f32.gmra.mrb[30].mxu0 %v6362_v59  ;;  %v1746_v15 = vld [vmem:[#allocation7 + $0x410] sm:$0xff] }
 0x161   : > { %1034 = vmatprep.mubr.f32.mxu1 %v5798_v0  ;;  %1291 = vmatprep.mubr.f32.mxu0 %v5798_v0  ;;  %v4661_v33 = vpack.c.bf16 %v1750_v19, %v1746_v15 }
 0x164   : > { %1035 = vmatmul.mubr.f32.gmra.mrb[64].mxu1 %v6141_v9  ;;  %1292 = vmatmul.mubr.f32.gmra.mrb[32].mxu0 %v6120_v50  ;;  %v8540_v50 = vld [vmem:[#allocation26_spill] sm:$0xff]  ;;  %v8543_v9 = vld [vmem:[#allocation32_spill] sm:$0xff] }
 0x165   : > { %1040 = vmatprep.mubr.f32.mxu1 %v5798_v0  ;;  %1297 = vmatprep.mubr.f32.mxu0 %v5798_v0 }
 0x168   : > { %1041 = vmatmul.mubr.f32.gmra.mrb[66].mxu1 %v6158_v26  ;;  %1298 = vmatmul.mubr.f32.gmra.mrb[34].mxu0 %v6123_v51  ;;  %v8541_v51 = vld [vmem:[#allocation30_spill] sm:$0xff]  ;;  %v2550_v26 = vld [vmem:[#allocation7 + $0x608] sm:$0xff] }
 0x169   : > { %1046 = vmatprep.mubr.f32.mxu1 %v5798_v0  ;;  %1303 = vmatprep.mubr.f32.mxu0 %v5798_v0 }
 0x16c   : > { %1047 = vmatmul.mubr.f32.gmra.mrb[68].mxu1 %v6177_v44  ;;  %1304 = vmatmul.mubr.f32.gmra.mrb[36].mxu0 %v6133_v2  ;;  %v8542_v2 = vld [vmem:[#allocation27_spill] sm:$0xff] }
 0x16d   : > { %1052 = vmatprep.mubr.f32.mxu1 %v5798_v0  ;;  %1309 = vmatprep.mubr.f32.mxu0 %v5798_v0 }
 0x170   : > { %1053 = vmatmul.mubr.f32.gmra.mrb[70].mxu1 %v6195_v7  ;;  %1310 = vmatmul.mubr.f32.gmra.mrb[38].mxu0 %v6149_v14  ;;  %v8544_v14 = vld [vmem:[#allocation28_spill] sm:$0xff]  ;;  %v8545_v7 = vld [vmem:[#allocation34_spill] sm:$0xff] }
 0x171   : > { %1058 = vmatprep.mubr.f32.mxu1 %v5798_v0  ;;  %1315 = vmatprep.mubr.f32.mxu0 %v5798_v0 }
 0x174   : > { %1059 = vmatmul.mubr.f32.gmra.mrb[72].mxu1 %v6213_v32  ;;  %1316 = vmatmul.mubr.f32.gmra.mrb[40].mxu0 %v6167_v31  ;;  %v2554_v31 = vld [vmem:[#allocation7 + $0x628] sm:$0xff]  ;;  %v8547_v32 = vld [vmem:[#allocation36_spill] sm:$0xff] }
 0x175   : > { %1064 = vmatprep.mubr.f32.mxu1 %v5798_v0  ;;  %1321 = vmatprep.mubr.f32.mxu0 %v5798_v0  ;;  %v4691_v44 = vpack.c.bf16 %v2554_v31, %v2550_v26  ;;  %v4669_v31 = vpack.c.bf16 %v1766_v38, %v1762_v49  ;;  %v2589_v49 = vld [vmem:[#allocation7 + $0x740] sm:$0xff] }
 0x176   : > { %v2593_v38 = vld [vmem:[#allocation7 + $0x760] sm:$0xff] }
 0x177   : > { %4692 = vmatprep.subr.bf16.mxu0 %v4691_v44  ;;  %v1770_v44 = vld [vmem:[#allocation7 + $0x4d0] sm:$0xff] }
 0x178   : > { %1065 = vmatmul.mubr.f32.gmra.mrb[74].mxu1 %v6231_v58  ;;  %1322 = vmatmul.mubr.f32.gmra.mrb[42].mxu0 %v8540_v50  ;;  %v8549_v58 = vld [vmem:[#allocation38_spill] sm:$0xff]  ;;  %v1775_v50 = vld [vmem:[#allocation7 + $0x4f8] sm:$0xff] }
 0x179   : > { %1070 = vmatprep.mubr.f32.mxu1 %v5798_v0  ;;  %1327 = vmatprep.mubr.f32.mxu0 %v5798_v0 }
 0x17c   : > { %1071 = vmatmul.mubr.f32.gmra.mrb[76].mxu1 %v8541_v51  ;;  %1328 = vmatmul.mubr.f32.gmra.mrb[44].mxu0 %v8542_v2  ;;  %v2565_v51 = vld [vmem:[#allocation7 + $0x680] sm:$0xff] }
 0x17d   : > { %1076 = vmatprep.mubr.f32.mxu1 %v5798_v0  ;;  %1333 = vmatprep.mubr.f32.mxu0 %v5798_v0  ;;  %v2569_v2 = vld [vmem:[#allocation7 + $0x6a0] sm:$0xff] }
 0x180   : > { %1077 = vmatmul.mubr.f32.gmra.mrb[78].mxu1 %v8543_v9  ;;  %1334 = vmatmul.mubr.f32.gmra.mrb[46].mxu0 %v8544_v14  ;;  %v6566_v9 = vsel %vm1645_vm1, %v1649_v10, %v1651_v57  ;;  %v6569_v14 = vld [vmem:[%s6088_s18 + $0x20] sm:$0xff] }
 0x181   : > { %1082 = vmatprep.mubr.f32.mxu1 %v5798_v0  ;;  %1339 = vmatprep.mubr.f32.mxu0 %v5798_v0  ;;  %v1653_v26 = vrot.slane %v6569_v14, 2 }
 0x184   : > { %1083 = vmatmul.mubr.f32.gmra.mrb[80].mxu1 %v8545_v7  ;;  %1340 = vmatmul.mubr.f32.gmra.mrb[48].mxu0 %v8546_v11  ;;  %v1774_v7 = vld [vmem:[#allocation7 + $0x4f0] sm:$0xff]  ;;  %v4699_v11 = vpack.c.bf16 %v2570_v4, %v2566_v5 }
 0x185   : > { %1088 = vmatprep.mubr.f32.mxu1 %v5798_v0  ;;  %1345 = vmatprep.mubr.f32.mxu0 %v5798_v0  ;;  %v1794_v5 = vld [vmem:[#allocation7 + $0x590] sm:$0xff] }
 0x186   : > { %v1798_v4 = vld [vmem:[#allocation7 + $0x5b0] sm:$0xff] }
 0x188   : > { %1089 = vmatmul.mubr.f32.gmra.mrb[82].mxu1 %v8547_v32  ;;  %1346 = vmatmul.mubr.f32.gmra.mrb[50].mxu0 %v8548_v35  ;;  %v4671_v32 = vpack.c.bf16 %v1775_v50, %v1771_v36  ;;  %v1779_v35 = vld [vmem:[#allocation7 + $0x518] sm:$0xff] }
 0x189   : > { %1094 = vmatprep.mubr.f32.mxu1 %v5798_v0  ;;  %1351 = vmatprep.mubr.f32.mxu0 %v5798_v0 }
 0x18c   : > { %1095 = vmatmul.mubr.f32.gmra.mrb[84].mxu1 %v8549_v58  ;;  %1352 = vmatmul.mubr.f32.gmra.mrb[52].mxu0 %v8550_v62  ;;  %v4701_v58 = vpack.c.bf16 %v2569_v2, %v2565_v51  ;;  %v2574_v62 = vld [vmem:[#allocation7 + $0x6c8] sm:$0xff] }
 0x18d   : > { %1100 = vmatprep.mubr.f32.mxu1 %v5798_v0  ;;  %1357 = vmatprep.mubr.f32.mxu0 %v5798_v0 }
 0x190   : > { %1101 = vmatmul.mubr.f32.gmra.mrb[86].mxu1 %v8551_v23  ;;  %1358 = vmatmul.mubr.f32.gmra.mrb[54].mxu0 %v8552_v37  ;;  %v2578_v23 = vld [vmem:[#allocation7 + $0x6e8] sm:$0xff]  ;;  %v1783_v37 = vld [vmem:[#allocation7 + $0x538] sm:$0xff] }
 0x191   : > { %1106 = vmatprep.mubr.f32.mxu1 %v5798_v0  ;;  %1363 = vmatprep.mubr.f32.mxu0 %v5798_v0  ;;  %v4703_v15 = vpack.c.bf16 %v2578_v23, %v2574_v62  ;;  %v4675_v19 = vpack.c.bf16 %v1783_v37, %v1779_v35  ;;  %v2597_v35 = vld [vmem:[#allocation7 + $0x780] sm:$0xff]  ;;  %v6617_v23 = vld [vmem:[%s6088_s18 + $0x40] sm:$0xff] }
 0x192   : > { %v1661_v37 = vrot.slane %v6617_v23, 2 }
 0x194   : > { %1107 = vmatmul.mubr.f32.gmra.mrb[88].mxu1 %v8553_v3  ;;  %1364 = vmatmul.mubr.f32.gmra.mrb[56].mxu0 %v8554_v8  ;;  %v2573_v3 = vld [vmem:[#allocation7 + $0x6c0] sm:$0xff] }
 0x195   : > { %1112 = vmatprep.mubr.f32.mxu1 %v5798_v0  ;;  %1369 = vmatprep.mubr.f32.mxu0 %v5798_v0  ;;  %v2577_v8 = vld [vmem:[#allocation7 + $0x6e0] sm:$0xff] }
 0x196   : > { %v4705_v34 = vpack.c.bf16 %v2577_v8, %v2573_v3  ;;  %v4685_v3 = vpack.c.bf16 %v1798_v4, %v1794_v5  ;;  %v1802_v8 = vld [vmem:[#allocation7 + $0x5d0] sm:$0xff] }
 0x198   : > { %1113 = vmatmul.mubr.f32.gmra.mrb[90].mxu1 %v8555_v61  ;;  %1370 = vmatmul.mubr.f32.gmra.mrb[58].mxu0 %v8556_v41  ;;  %v6577_v61 = vsel %vm1645_vm1, %v1651_v57, %v1653_v26  ;;  %v6580_v41 = vld [vmem:[%s6088_s18 + $0x28] sm:$0xff]  ;;  %v2594_v57 = vld [vmem:[#allocation7 + $0x768] sm:$0xff] }
 0x199   : > { %1118 = vmatprep.mubr.f32.mxu1 %v5798_v0  ;;  %1375 = vmatprep.mubr.f32.mxu0 %v5798_v0  ;;  %v4711_v50 = vpack.c.bf16 %v2594_v57, %v2590_v55  ;;  %v6647_v57 = vld [vmem:[%s6088_s18 + $0x50] sm:$0xff] }
 0x19c   : > { %1119 = vmatmul.mubr.f32.gmra.mrb[92].mxu1 %v8557_v27  ;;  %1376 = vmatmul.mubr.f32.gmra.mrb[60].mxu0 %v8558_v46  ;;  %v1655_v27 = vrot.slane %v6580_v41, 2  ;;  %v4673_v46 = vpack.c.bf16 %v1774_v7, %v1770_v44  ;;  %v2598_v44 = vld [vmem:[#allocation7 + $0x788] sm:$0xff] }
 0x19d   : > { %1124 = vmatprep.mubr.f32.mxu1 %v5798_v0  ;;  %1381 = vmatprep.mubr.f32.mxu0 %v5798_v0  ;;  %v2602_v7 = vld [vmem:[#allocation7 + $0x7a8] sm:$0xff] }
 0x19e   : > { %v6588_v10 = vsel %vm1645_vm1, %v1653_v26, %v1655_v27  ;;  %v1803_v26 = vld [vmem:[#allocation7 + $0x5d8] sm:$0xff] }
 0x1a0   : > { %1125 = vmatmul.mubr.f32.gmra.mrb[94].mxu1 %v8559_v25  ;;  %1382 = vmatmul.mubr.f32.gmra.mrb[62].mxu0 %v8560_v17  ;;  %v2582_v25 = vld [vmem:[#allocation7 + $0x708] sm:$0xff] }
 0x1a1   : > { %1452 = vmatprep.mubr.f32.mxu1 %v5798_v0  ;;  %1872 = vmatprep.mubr.f32.mxu0 %v5798_v0  ;;  %v2586_v17 = vld [vmem:[#allocation7 + $0x728] sm:$0xff] }
 0x1a2   : > { %v4707_v45 = vpack.c.bf16 %v2586_v17, %v2582_v25  ;;  %v2609_v17 = vld [vmem:[#allocation7 + $0x7e0] sm:$0xff] }
 0x1a4   : > { %1453 = vmatmul.mubr.f32.vlgmr.msra.gmra.mrb[32].mxu1 %v6532_v54  ;;  %1873 = vmatmul.mubr.f32.vlgmr.msra.gmra.mrb[0].mxu0 %v6544_v53 }
 0x1a5   : > { %4662 = vmatpush1.bf16.msra.mxu1 %v4661_v33  ;;  %1458 = vmatprep.mubr.f32.mxu1 %v5798_v0  ;;  %v2585_v33 = vld [vmem:[#allocation7 + $0x720] sm:$0xff] }
 0x1a6   : > { %1878 = vmatprep.mubr.f32.mxu0 %v5798_v0  ;;  %4664 = vmatprep.subr.bf16.mxu1 %v4663_v30  ;;  %v6591_v30 = vld [vmem:[%s6088_s18 + $0x30] sm:$0xff]  ;;  %v4709_v1 = vpack.c.bf16 %v2585_v33, %v2581_v39  ;;  %v2556_v39 = vld [vmem:[#allocation7 + $0x638] sm:$0xff] }
 0x1a7   : > { %4694 = vmatpush1.bf16.msra.mxu0 %v4693_v52  ;;  %v1657_v60 = vrot.slane %v6591_v30, 2  ;;  %v1790_v52 = vld [vmem:[#allocation7 + $0x570] sm:$0xff] }
 0x1a8   : > { %1459 = vmatmul.mubr.f32.gmra.mrb[34].mxu1 %v6536_v40  ;;  %1879 = vmatmul.mubr.f32.gmra.mrb[2].mxu0 %v6554_v21 }
 0x1a9   : > { %1464 = vmatprep.mubr.f32.mxu1 %v5798_v0  ;;  %1884 = vmatprep.mubr.f32.mxu0 %v5798_v0 }
 0x1aa   : > { %4666 = vmatpush1.bf16.msra.mxu1 %v4665_v47  ;;  %4696 = vmatprep.subr.bf16.mxu0 %v4695_v28  ;;  %v1799_v47 = vld [vmem:[#allocation7 + $0x5b8] sm:$0xff]  ;;  %v6599_v28 = vsel %vm1645_vm1, %v1655_v27, %v1657_v60  ;;  %v1806_v27 = vld [vmem:[#allocation7 + $0x5f0] sm:$0xff] }
 0x1ab   : > { %4668 = vmatprep.subr.bf16.mxu1 %v4667_v63  ;;  %4698 = vmatpush1.bf16.msra.mxu0 %v4697_v20  ;;  %v6602_v63 = vld [vmem:[%s6088_s18 + $0x38] sm:$0xff]  ;;  %v4681_v20 = vpack.c.bf16 %v1790_v52, %v1786_v12  ;;  %v4683_v2 = vpack.c.bf16 %v1799_v47, %v1795_v42  ;;  %v4689_v12 = vpack.c.bf16 %v1806_v27, %v1802_v8  ;;  %v1665_v47 = vrot.slane %v6647_v57, 2 }
 0x1ac   : > { %1465 = vmatmul.mubr.f32.gmra.mrb[36].mxu1 %v6547_v24  ;;  %1885 = vmatmul.mubr.f32.gmra.mrb[4].mxu0 %v6566_v9  ;;  %v1659_v36 = vrot.slane %v6602_v63, 2  ;;  %v4723_v42 = vpack.c.bf16 %v2556_v39, %v2552_v48  ;;  %v1673_v8 = vrot.slane %v6344_v22, 2  ;;  %v6739_v39 = vld [vmem:[%s6088_s18 + $0x70] sm:$0xff] }
 0x1ad   : > { %1470 = vmatprep.mubr.f32.mxu1 %v5798_v0  ;;  %1890 = vmatprep.mubr.f32.mxu0 %v5798_v0 }
 0x1ae   : > { %4670 = vmatpush1.bf16.msra.mxu1 %v4669_v31  ;;  %4700 = vmatprep.subr.bf16.mxu0 %v4699_v11  ;;  %v4713_v31 = vpack.c.bf16 %v2593_v38, %v2589_v49  ;;  %v6614_v62 = vsel %vm1645_vm1, %v1657_v60, %v1659_v36  ;;  %v6629_v33 = vsel %vm1645_vm1, %v1659_v36, %v1661_v37  ;;  %v6632_v60 = vld [vmem:[%s6088_s18 + $0x48] sm:$0xff] }
 0x1af   : > { %4672 = vmatprep.subr.bf16.mxu1 %v4671_v32  ;;  %4702 = vmatpush1.bf16.msra.mxu0 %v4701_v58  ;;  %v1807_v32 = vld [vmem:[#allocation7 + $0x5f8] sm:$0xff]  ;;  %v2601_v58 = vld [vmem:[#allocation7 + $0x7a0] sm:$0xff] }
 0x1b0   : > { %1471 = vmatmul.mubr.f32.gmra.mrb[38].mxu1 %v6557_v6  ;;  %1891 = vmatmul.mubr.f32.gmra.mrb[6].mxu0 %v6577_v61  ;;  %v4687_v56 = vpack.c.bf16 %v1807_v32, %v1803_v26  ;;  %v6677_v26 = vld [vmem:[%s6088_s18 + $0x60] sm:$0xff] }
 0x1b1   : > { %1476 = vmatprep.mubr.f32.mxu1 %v5798_v0  ;;  %1896 = vmatprep.mubr.f32.mxu0 %v5798_v0 }
 0x1b2   : > { %4674 = vmatpush1.bf16.msra.mxu1 %v4673_v46  ;;  %4704 = vmatprep.subr.bf16.mxu0 %v4703_v15  ;;  %v4715_v46 = vpack.c.bf16 %v2602_v7, %v2598_v44  ;;  %v4717_v15 = vpack.c.bf16 %v2601_v58, %v2597_v35  ;;  %v1671_v35 = vrot.slane %v6326_v16, 2 }
 0x1b3   : > { %4676 = vmatprep.subr.bf16.mxu1 %v4675_v19  ;;  %4706 = vmatpush1.bf16.msra.mxu0 %v4705_v34  ;;  %v2606_v19 = vld [vmem:[#allocation7 + $0x7c8] sm:$0xff]  ;;  %v2605_v34 = vld [vmem:[#allocation7 + $0x7c0] sm:$0xff] }
 0x1b4   : > { %1477 = vmatmul.mubr.f32.gmra.mrb[40].mxu1 %v6569_v14  ;;  %1897 = vmatmul.mubr.f32.gmra.mrb[8].mxu0 %v6588_v10  ;;  %v4719_v52 = vpack.c.bf16 %v2610_v13, %v2606_v19  ;;  %v6721_v19 = vld [vmem:[%s6088_s18 + $0x68] sm:$0xff] }
 0x1b5   : > { %1482 = vmatprep.mubr.f32.mxu1 %v5798_v0  ;;  %1902 = vmatprep.mubr.f32.mxu0 %v5798_v0 }
 0x1b6   : > { %4678 = vmatpush1.bf16.msra.mxu1 %v4677_v29  ;;  %4708 = vmatprep.subr.bf16.mxu0 %v4707_v45  ;;  %v1663_v29 = vrot.slane %v6632_v60, 2 }
 0x1b7   : > { %v6605_v51 = vpop.f32.mrb[0].mxu1  ;;  %4680 = vmatprep.subr.bf16.mxu1 %v4679_v43  ;;  %4710 = vmatpush1.bf16.msra.mxu0 %v4709_v1  ;;  %v4721_v43 = vpack.c.bf16 %v2609_v17, %v2605_v34 }
 0x1b8   : > { %8561 = vst [vmem:[#allocation26_spill] sm:$0xff] %v6605_v51  ;;  %v6607_v11 = vpop.f32.mrb[1].mxu1  ;;  %1483 = vmatmul.mubr.f32.gmra.mrb[42].mxu1 %v6580_v41  ;;  %1903 = vmatmul.mubr.f32.gmra.mrb[10].mxu0 %v6599_v28  ;;  %v6644_v55 = vsel %vm1645_vm1, %v1661_v37, %v1663_v29  ;;  %v6659_v36 = vsel %vm1645_vm1, %v1663_v29, %v1665_v47  ;;  %v6919_v51 = vld [vmem:[%s6088_s18 + $0xf0] sm:$0xff] }
 0x1b9   : > { %8562 = vst [vmem:[#allocation30_spill] sm:$0xff] %v6607_v11  ;;  %1488 = vmatprep.mubr.f32.mxu1 %v5798_v0  ;;  %1908 = vmatprep.mubr.f32.mxu0 %v5798_v0  ;;  %8602 = vst [vmem:[#allocation67_spill] sm:$0xff] %v6919_v51 }
 0x1ba   : > { %4682 = vmatpush1.bf16.msra.mxu1 %v4681_v20  ;;  %4712 = vmatprep.subr.bf16.mxu0 %v4711_v50  ;;  %v6662_v20 = vld [vmem:[%s6088_s18 + $0x58] sm:$0xff] }
 0x1bb   : > { %v6620_v18 = vpop.f32.mrb[2].mxu1  ;;  %4684 = vmatprep.subr.bf16.mxu1 %v4683_v2  ;;  %4714 = vmatpush1.bf16.msra.mxu0 %v4713_v31  ;;  %v1667_v5 = vrot.slane %v6662_v20, 2  ;;  %v1669_v31 = vrot.slane %v6677_v26, 2 }
 0x1bc   : > { %8563 = vst [vmem:[#allocation27_spill] sm:$0xff] %v6620_v18  ;;  %v6622_v25 = vpop.f32.mrb[3].mxu1  ;;  %1489 = vmatmul.mubr.f32.gmra.mrb[44].mxu1 %v6591_v30  ;;  %1909 = vmatmul.mubr.f32.gmra.mrb[12].mxu0 %v6614_v62  ;;  %v6908_v18 = vld [vmem:[%s6088_s18 + $0xe8] sm:$0xff] }
 0x1bd   : > { %8564 = vst [vmem:[#allocation32_spill] sm:$0xff] %v6622_v25  ;;  %1494 = vmatprep.mubr.f32.mxu1 %v5798_v0  ;;  %1914 = vmatprep.mubr.f32.mxu0 %v5798_v0  ;;  %v6674_v2 = vsel %vm1645_vm1, %v1665_v47, %v1667_v5  ;;  %v6689_v32 = vsel %vm1645_vm1, %v1667_v5, %v1669_v31  ;;  %v6757_v47 = vld [vmem:[%s6088_s18 + $0x78] sm:$0xff]  ;;  %8600 = vst [vmem:[#allocation65_spill] sm:$0xff] %v6908_v18 }
 0x1be   : > { %4686 = vmatpush1.bf16.msra.mxu1 %v4685_v3  ;;  %4716 = vmatprep.subr.bf16.mxu0 %v4715_v46  ;;  %v6701_v3 = vsel %vm1645_vm1, %v1669_v31, %v1671_v35  ;;  %v6713_v46 = vsel %vm1645_vm1, %v1671_v35, %v1673_v8  ;;  %v6767_v31 = vld [vmem:[%s6088_s18 + $0x90] sm:$0xff] }
 0x1bf   : > { %v6635_v45 = vpop.f32.mrb[4].mxu1  ;;  %4688 = vmatprep.subr.bf16.mxu1 %v4687_v56  ;;  %4718 = vmatpush1.bf16.msra.mxu0 %v4717_v15  ;;  %v1675_v56 = vrot.slane %v6362_v59, 2  ;;  %v6731_v59 = vld [vmem:[%s6088_s18 + $0x80] sm:$0xff]  ;;  %v1681_v35 = vrot.slane %v6767_v31, 2 }
 0x1c0   : > { %8565 = vst [vmem:[#allocation28_spill] sm:$0xff] %v6635_v45  ;;  %v6637_v1 = vpop.f32.mrb[5].mxu1  ;;  %1495 = vmatmul.mubr.f32.gmra.mrb[46].mxu1 %v6602_v63  ;;  %1915 = vmatmul.mubr.f32.gmra.mrb[14].mxu0 %v6629_v33  ;;  %v1677_v34 = vrot.slane %v6731_v59, 2  ;;  %v6897_v45 = vld [vmem:[%s6088_s18 + $0xe0] sm:$0xff] }
 0x1c1   : > { %8566 = vst [vmem:[#allocation34_spill] sm:$0xff] %v6637_v1  ;;  %1500 = vmatprep.mubr.f32.mxu1 %v5798_v0  ;;  %1920 = vmatprep.mubr.f32.mxu0 %v5798_v0  ;;  %v6728_v13 = vsel %vm1645_vm1, %v1673_v8, %v1675_v56  ;;  %8598 = vst [vmem:[#allocation63_spill] sm:$0xff] %v6897_v45 }
 0x1c2   : > { %4690 = vmatpush1.bf16.msra.mxu1 %v4689_v12  ;;  %4720 = vmatprep.subr.bf16.mxu0 %v4719_v52  ;;  %v6746_v29 = vsel %vm1645_vm1, %v1675_v56, %v1677_v34  ;;  %v6749_v12 = vld [vmem:[%s6088_s18 + $0x88] sm:$0xff] }
 0x1c3   : > { %v6650_v49 = vpop.f32.mrb[6].mxu1  ;;  %4722 = vmatpush1.bf16.msra.mxu0 %v4721_v43  ;;  %4724 = vmatprep.subr.bf16.mxu1 %v4723_v42  ;;  %v1679_v52 = vrot.slane %v6749_v12, 2 }
 0x1c4   : > { %8567 = vst [vmem:[#allocation29_spill] sm:$0xff] %v6650_v49  ;;  %v6652_v38 = vpop.f32.mrb[7].mxu1  ;;  %1501 = vmatmul.mubr.f32.gmra.mrb[48].mxu1 %v6617_v23  ;;  %1921 = vmatmul.mubr.f32.gmra.mrb[16].mxu0 %v6644_v55  ;;  %v6886_v49 = vld [vmem:[%s6088_s18 + $0xd8] sm:$0xff] }
 0x1c5   : > { %8568 = vst [vmem:[#allocation36_spill] sm:$0xff] %v6652_v38  ;;  %1506 = vmatprep.mubr.f32.mxu1 %v5798_v0  ;;  %1926 = vmatprep.mubr.f32.mxu0 %v5798_v0  ;;  %v6764_v5 = vsel %vm1645_vm1, %v1677_v34, %v1679_v52  ;;  %v6779_v34 = vsel %vm1645_vm1, %v1679_v52, %v1681_v35  ;;  %8596 = vst [vmem:[#allocation61_spill] sm:$0xff] %v6886_v49 }
 0x1c7   : > { %v6665_v4 = vpop.f32.mrb[8].mxu1 }
 0x1c8   : > { %8569 = vst [vmem:[#allocation31_spill] sm:$0xff] %v6665_v4  ;;  %v6667_v50 = vpop.f32.mrb[9].mxu1  ;;  %1507 = vmatmul.mubr.f32.gmra.mrb[50].mxu1 %v6632_v60  ;;  %1927 = vmatmul.mubr.f32.gmra.mrb[18].mxu0 %v6659_v36  ;;  %v6875_v4 = vld [vmem:[%s6088_s18 + $0xd0] sm:$0xff] }
 0x1c9   : > { %8570 = vst [vmem:[#allocation38_spill] sm:$0xff] %v6667_v50  ;;  %1512 = vmatprep.mubr.f32.mxu1 %v5798_v0  ;;  %1932 = vmatprep.mubr.f32.mxu0 %v5798_v0  ;;  %8594 = vst [vmem:[#allocation59_spill] sm:$0xff] %v6875_v4 }
 0x1cb   : > { %v6680_v44 = vpop.f32.mrb[10].mxu1 }
 0x1cc   : > { %8571 = vst [vmem:[#allocation33_spill] sm:$0xff] %v6680_v44  ;;  %v6682_v7 = vpop.f32.mrb[11].mxu1  ;;  %1513 = vmatmul.mubr.f32.gmra.mrb[52].mxu1 %v6647_v57  ;;  %1933 = vmatmul.mubr.f32.gmra.mrb[20].mxu0 %v6674_v2  ;;  %v6864_v44 = vld [vmem:[%s6088_s18 + $0xc8] sm:$0xff] }
 0x1cd   : > { %8572 = vst [vmem:[#allocation40_spill] sm:$0xff] %v6682_v7  ;;  %1518 = vmatprep.mubr.f32.mxu1 %v5798_v0  ;;  %1938 = vmatprep.mubr.f32.mxu0 %v5798_v0 }
 0x1cf   : > { %v6692_v58 = vpop.f32.mrb[12].mxu1 }
 0x1d0   : > { %8573 = vst [vmem:[#allocation35_spill] sm:$0xff] %v6692_v58  ;;  %v6694_v37 = vpop.f32.mrb[13].mxu1  ;;  %1519 = vmatmul.mubr.f32.gmra.mrb[54].mxu1 %v6662_v20  ;;  %1939 = vmatmul.mubr.f32.gmra.mrb[22].mxu0 %v6689_v32 }
 0x1d1   : > { %8574 = vst [vmem:[#allocation42_spill] sm:$0xff] %v6694_v37  ;;  %1524 = vmatprep.mubr.f32.mxu1 %v5798_v0  ;;  %1944 = vmatprep.mubr.f32.mxu0 %v5798_v0 }
 0x1d3   : > { %v6704_v27 = vpop.f32.mrb[14].mxu1 }
 0x1d4   : > { %8575 = vst [vmem:[#allocation37_spill] sm:$0xff] %v6704_v27  ;;  %v6706_v16 = vpop.f32.mrb[15].mxu1  ;;  %1525 = vmatmul.mubr.f32.gmra.mrb[56].mxu1 %v6677_v26  ;;  %1945 = vmatmul.mubr.f32.gmra.mrb[24].mxu0 %v6701_v3 }
 0x1d5   : > { %8576 = vst [vmem:[#allocation44_spill] sm:$0xff] %v6706_v16  ;;  %1530 = vmatprep.mubr.f32.mxu1 %v5798_v0  ;;  %1950 = vmatprep.mubr.f32.mxu0 %v5798_v0 }
 0x1d7   : > { %v6716_v22 = vpop.f32.mrb[16].mxu1 }
 0x1d8   : > { %8577 = vst [vmem:[#allocation39_spill] sm:$0xff] %v6716_v22  ;;  %v6718_v15 = vpop.f32.mrb[17].mxu1  ;;  %1531 = vmatmul.mubr.f32.gmra.mrb[58].mxu1 %v6721_v19  ;;  %1951 = vmatmul.mubr.f32.gmra.mrb[26].mxu0 %v6713_v46 }
 0x1d9   : > { %8578 = vst [vmem:[#allocation45_spill] sm:$0xff] %v6718_v15  ;;  %1536 = vmatprep.mubr.f32.mxu1 %v5798_v0  ;;  %1956 = vmatprep.mubr.f32.mxu0 %v5798_v0 }
 0x1db   : > { %v6734_v17 = vpop.f32.mrb[18].mxu1 }
 0x1dc   : > { %8579 = vst [vmem:[#allocation41_spill] sm:$0xff] %v6734_v17  ;;  %v6736_v48 = vpop.f32.mrb[19].mxu1  ;;  %1537 = vmatmul.mubr.f32.gmra.mrb[60].mxu1 %v6739_v39  ;;  %1957 = vmatmul.mubr.f32.gmra.mrb[28].mxu0 %v6728_v13 }
 0x1dd   : > { %8580 = vst [vmem:[#allocation46_spill] sm:$0xff] %v6736_v48  ;;  %1542 = vmatprep.mubr.f32.mxu1 %v5798_v0  ;;  %1962 = vmatprep.mubr.f32.mxu0 %v5798_v0 }
 0x1df   : > { %v6752_v43 = vpop.f32.mrb[20].mxu1 }
 0x1e0   : > { %8581 = vst [vmem:[#allocation43_spill] sm:$0xff] %v6752_v43  ;;  %v6754_v42 = vpop.f32.mrb[21].mxu1  ;;  %1543 = vmatmul.mubr.f32.gmra.mrb[62].mxu1 %v6757_v47  ;;  %1963 = vmatmul.mubr.f32.gmra.mrb[30].mxu0 %v6746_v29 }
 0x1e1   : > { %8582 = vst [vmem:[#allocation47_spill] sm:$0xff] %v6754_v42  ;;  %1548 = vmatprep.mubr.f32.mxu1 %v5798_v0  ;;  %1968 = vmatprep.mubr.f32.mxu0 %v5798_v0  ;;  %v6782_v42 = vld [vmem:[%s6088_s18 + $0x98] sm:$0xff] }
 0x1e2   : > { %v1683_v43 = vrot.slane %v6782_v42, 2 }
 0x1e3   : > { %v6770_v8 = vpop.f32.mrb[22].mxu1 }
 0x1e4   : > { %8583 = vst [vmem:[#allocation48_spill] sm:$0xff] %v6770_v8  ;;  %v6772_v56 = vpop.f32.mrb[23].mxu1  ;;  %1549 = vmatmul.mubr.f32.gmra.mrb[64].mxu1 %v6731_v59  ;;  %1969 = vmatmul.mubr.f32.gmra.mrb[32].mxu0 %v6764_v5  ;;  %v6794_v52 = vsel %vm1645_vm1, %v1681_v35, %v1683_v43 }
 0x1e5   : > { %8584 = vst [vmem:[#allocation49_spill] sm:$0xff] %v6772_v56  ;;  %1554 = vmatprep.mubr.f32.mxu1 %v5798_v0  ;;  %1974 = vmatprep.mubr.f32.mxu0 %v5798_v0  ;;  %v6797_v56 = vld [vmem:[%s6088_s18 + $0xa0] sm:$0xff] }
 0x1e6   : > { %v1685_v17 = vrot.slane %v6797_v56, 2 }
 0x1e7   : > { %v6785_v48 = vpop.f32.mrb[24].mxu1 }
 0x1e8   : > { %8585 = vst [vmem:[#allocation50_spill] sm:$0xff] %v6785_v48  ;;  %v6787_v8 = vpop.f32.mrb[25].mxu1  ;;  %1555 = vmatmul.mubr.f32.gmra.mrb[66].mxu1 %v6749_v12  ;;  %1975 = vmatmul.mubr.f32.gmra.mrb[34].mxu0 %v6779_v34  ;;  %v6809_v35 = vsel %vm1645_vm1, %v1683_v43, %v1685_v17 }
 0x1e9   : > { %8586 = vst [vmem:[#allocation51_spill] sm:$0xff] %v6787_v8  ;;  %1560 = vmatprep.mubr.f32.mxu1 %v5798_v0  ;;  %1980 = vmatprep.mubr.f32.mxu0 %v5798_v0  ;;  %v6812_v8 = vld [vmem:[%s6088_s18 + $0xa8] sm:$0xff] }
 0x1ea   : > { %v1687_v22 = vrot.slane %v6812_v8, 2 }
 0x1eb   : > { %v6800_v15 = vpop.f32.mrb[26].mxu1 }
 0x1ec   : > { %8587 = vst [vmem:[#allocation52_spill] sm:$0xff] %v6800_v15  ;;  %v6802_v48 = vpop.f32.mrb[27].mxu1  ;;  %1561 = vmatmul.mubr.f32.gmra.mrb[68].mxu1 %v6767_v31  ;;  %1981 = vmatmul.mubr.f32.gmra.mrb[36].mxu0 %v6794_v52  ;;  %v6824_v43 = vsel %vm1645_vm1, %v1685_v17, %v1687_v22 }
 0x1ed   : > { %8588 = vst [vmem:[#allocation53_spill] sm:$0xff] %v6802_v48  ;;  %1566 = vmatprep.mubr.f32.mxu1 %v5798_v0  ;;  %1986 = vmatprep.mubr.f32.mxu0 %v5798_v0  ;;  %v6827_v48 = vld [vmem:[%s6088_s18 + $0xb0] sm:$0xff] }
 0x1ee   : > { %v1689_v27 = vrot.slane %v6827_v48, 2 }
 0x1ef   : > { %v6815_v16 = vpop.f32.mrb[28].mxu1 }
 0x1f0   : > { %8589 = vst [vmem:[#allocation54_spill] sm:$0xff] %v6815_v16  ;;  %v6817_v15 = vpop.f32.mrb[29].mxu1  ;;  %1567 = vmatmul.mubr.f32.gmra.mrb[70].mxu1 %v6782_v42  ;;  %1987 = vmatmul.mubr.f32.gmra.mrb[38].mxu0 %v6809_v35  ;;  %v6839_v17 = vsel %vm1645_vm1, %v1687_v22, %v1689_v27 }
 0x1f1   : > { %8590 = vst [vmem:[#allocation55_spill] sm:$0xff] %v6817_v15  ;;  %1572 = vmatprep.mubr.f32.mxu1 %v5798_v0  ;;  %1992 = vmatprep.mubr.f32.mxu0 %v5798_v0  ;;  %v6842_v15 = vld [vmem:[%s6088_s18 + $0xb8] sm:$0xff] }
 0x1f2   : > { %v1691_v58 = vrot.slane %v6842_v15, 2 }
 0x1f3   : > { %v6830_v16 = vpop.f32.mrb[30].mxu1 }
 0x1f4   : > { %8591 = vst [vmem:[#allocation56_spill] sm:$0xff] %v6830_v16  ;;  %v6832_v37 = vpop.f32.mrb[31].mxu1  ;;  %1573 = vmatmul.mubr.f32.gmra.mrb[72].mxu1 %v6797_v56  ;;  %1993 = vmatmul.mubr.f32.gmra.mrb[40].mxu0 %v6824_v43  ;;  %v6853_v16 = vld [vmem:[%s6088_s18 + $0xc0] sm:$0xff] }
 0x1f5   : > { %8592 = vst [vmem:[#allocation57_spill] sm:$0xff] %v6832_v37  ;;  %1578 = vmatprep.mubr.f32.mxu1 %v5798_v0  ;;  %1998 = vmatprep.mubr.f32.mxu0 %v5798_v0  ;;  %v6850_v37 = vsel %vm1645_vm1, %v1689_v27, %v1691_v58  ;;  %v1693_v22 = vrot.slane %v6853_v16, 2  ;;  %v1695_v27 = vrot.slane %v6864_v44, 2 }
 0x1f7   : > { %v6861_v7 = vsel %vm1645_vm1, %v1691_v58, %v1693_v22  ;;  %v6872_v50 = vsel %vm1645_vm1, %v1693_v22, %v1695_v27  ;;  %v1697_v58 = vrot.slane %v6875_v4, 2  ;;  %v1699_v22 = vrot.slane %v6886_v49, 2 }
 0x1f8   : > { %1579 = vmatmul.mubr.f32.gmra.mrb[74].mxu1 %v6812_v8  ;;  %1999 = vmatmul.mubr.f32.gmra.mrb[42].mxu0 %v6839_v17  ;;  %8593 = vst [vmem:[#allocation58_spill] sm:$0xff] %v6872_v50 }
 0x1f9   : > { %1584 = vmatprep.mubr.f32.mxu1 %v5798_v0  ;;  %2004 = vmatprep.mubr.f32.mxu0 %v5798_v0  ;;  %v6883_v38 = vsel %vm1645_vm1, %v1695_v27, %v1697_v58  ;;  %v6894_v1 = vsel %vm1645_vm1, %v1697_v58, %v1699_v22  ;;  %v1701_v27 = vrot.slane %v6897_v45, 2  ;;  %v1703_v58 = vrot.slane %v6908_v18, 2 }
 0x1fa   : > { %8595 = vst [vmem:[#allocation60_spill] sm:$0xff] %v6883_v38  ;;  %8597 = vst [vmem:[#allocation62_spill] sm:$0xff] %v6894_v1 }
 0x1fb   : > { %v6905_v25 = vsel %vm1645_vm1, %v1699_v22, %v1701_v27  ;;  %v6916_v11 = vsel %vm1645_vm1, %v1701_v27, %v1703_v58  ;;  %v1705_v22 = vrot.slane %v6919_v51, 2 }
 0x1fc   : > { %1585 = vmatmul.mubr.f32.gmra.mrb[76].mxu1 %v6827_v48  ;;  %2005 = vmatmul.mubr.f32.gmra.mrb[44].mxu0 %v6850_v37  ;;  %8599 = vst [vmem:[#allocation64_spill] sm:$0xff] %v6905_v25  ;;  %8601 = vst [vmem:[#allocation66_spill] sm:$0xff] %v6916_v11 }
 0x1fd   : > { %1590 = vmatprep.mubr.f32.mxu1 %v5798_v0  ;;  %2010 = vmatprep.mubr.f32.mxu0 %v5798_v0 }
 0x200   : > { %1591 = vmatmul.mubr.f32.gmra.mrb[78].mxu1 %v6842_v15  ;;  %2011 = vmatmul.mubr.f32.gmra.mrb[46].mxu0 %v6861_v7 }
 0x201   : > { %1596 = vmatprep.mubr.f32.mxu1 %v5798_v0  ;;  %2016 = vmatprep.mubr.f32.mxu0 %v5798_v0 }
 0x204   : > { %1597 = vmatmul.mubr.f32.gmra.mrb[80].mxu1 %v6853_v16  ;;  %2017 = vmatmul.mubr.f32.gmra.mrb[48].mxu0 %v6872_v50  ;;  %v2560_v50 = vld [vmem:[#allocation7 + $0x658] sm:$0xff] }
 0x205   : > { %1602 = vmatprep.mubr.f32.mxu1 %v5798_v0  ;;  %2022 = vmatprep.mubr.f32.mxu0 %v5798_v0 }
 0x208   : > { %1603 = vmatmul.mubr.f32.gmra.mrb[82].mxu1 %v6864_v44  ;;  %2023 = vmatmul.mubr.f32.gmra.mrb[50].mxu0 %v6883_v38  ;;  %v2551_v38 = vld [vmem:[#allocation7 + $0x610] sm:$0xff] }
 0x209   : > { %1608 = vmatprep.mubr.f32.mxu1 %v5798_v0  ;;  %2028 = vmatprep.mubr.f32.mxu0 %v5798_v0 }
 0x20c   : > { %1609 = vmatmul.mubr.f32.gmra.mrb[84].mxu1 %v6875_v4  ;;  %2029 = vmatmul.mubr.f32.gmra.mrb[52].mxu0 %v6894_v1  ;;  %v6930_v1 = vld [vmem:[%s6088_s18 + $0xf8] sm:$0xff]  ;;  %v2572_v4 = vld [vmem:[#allocation7 + $0x6b8] sm:$0xff]  ;;  %s5650_s18 = scalar_lea.vmem %s8360_s7, 2560 }
 0x20d   : > { %1614 = vmatprep.mubr.f32.mxu1 %v5798_v0  ;;  %2034 = vmatprep.mubr.f32.mxu0 %v5798_v0  ;;  %8604 = vst [vmem:[#allocation69_spill] sm:$0xff] %v6930_v1  ;;  %v1707_v27 = vrot.slane %v6930_v1, 2  ;;  %p5651_p12 = scmp.ne.s32.totalorder %s8360_s7, %s5650_s18  ;;  %p5658_p10 = scmp.lt.s32.totalorder %s5656_s28, %s5650_s18 }
 0x20f   : > { %p5652_p9 = pnand %p5651_p12, %p8709_p8  ;;  %p5659_p13 = por %p5658_p10, %p5657_p6 }
 0x210   : > { %1615 = vmatmul.mubr.f32.gmra.mrb[86].mxu1 %v6886_v49  ;;  %2035 = vmatmul.mubr.f32.gmra.mrb[54].mxu0 %v6905_v25  ;;  %v6927_v25 = vsel %vm1645_vm1, %v1703_v58, %v1705_v22  ;;  %v2555_v49 = vld [vmem:[#allocation7 + $0x630] sm:$0xff] }
 0x211   : > { %1620 = vmatprep.mubr.f32.mxu1 %v5798_v0  ;;  %2040 = vmatprep.mubr.f32.mxu0 %v5798_v0  ;;  %8603 = vst [vmem:[#allocation68_spill] sm:$0xff] %v6927_v25  ;;  %p5653_p1 = pneg %p5652_p9 }
 0x213   : > { %p5660_p3 = pnand %p5659_p13, %p5653_p1 }
 0x214   : > { %1621 = vmatmul.mubr.f32.gmra.mrb[88].mxu1 %v6897_v45  ;;  %2041 = vmatmul.mubr.f32.gmra.mrb[56].mxu0 %v6916_v11  ;;  %v6938_v11 = vsel %vm1645_vm1, %v1705_v22, %v1707_v27  ;;  %v6942_v45 = vld [vmem:[%s278_s21] sm:$0xff]  ;;  %v2452_v22 = vrot.slane %v6536_v40, 3 }
 0x215   : > { %1626 = vmatprep.mubr.f32.mxu1 %v5798_v0  ;;  %2046 = vmatprep.mubr.f32.mxu0 %v5798_v0  ;;  %8605 = vst [vmem:[#allocation70_spill] sm:$0xff] %v6938_v11  ;;  %8606 = vst [vmem:[#allocation71_spill] sm:$0xff] %v6942_v45  ;;  %v1741_v58 = vrot.slane %v6942_v45, 2  ;;  %v2564_v45 = vld [vmem:[#allocation7 + $0x678] sm:$0xff] }
 0x216   : > { %v4727_v40 = vpack.c.bf16 %v2564_v45, %v2560_v50  ;;  %v2580_v50 = vld [vmem:[#allocation7 + $0x6f8] sm:$0xff] }
 0x218   : > { %1627 = vmatmul.mubr.f32.gmra.mrb[90].mxu1 %v6908_v18  ;;  %2047 = vmatmul.mubr.f32.gmra.mrb[58].mxu0 %v6927_v25  ;;  %v6950_v25 = vsel %vm1645_vm1, %v1707_v27, %v1741_v58  ;;  %v2451_v18 = vrot.slane %v6532_v54, 3  ;;  %v4725_v58 = vpack.c.bf16 %v2555_v49, %v2551_v38  ;;  %v2454_v54 = vrot.slane %v6547_v24, 3  ;;  %v2567_v49 = vld [vmem:[#allocation7 + $0x690] sm:$0xff] }
 0x219   : > { %1632 = vmatprep.mubr.f32.mxu1 %v5798_v0  ;;  %2052 = vmatprep.mubr.f32.mxu0 %v5798_v0  ;;  %8607 = vst [vmem:[#allocation72_spill] sm:$0xff] %v6950_v25  ;;  %v2571_v38 = vld [vmem:[#allocation7 + $0x6b0] sm:$0xff] }
 0x21a   : > { %v6959_v27 = vsel %vm2450_vm2, %v2451_v18, %v2452_v22  ;;  %v2456_v18 = vrot.slane %v6557_v6, 3  ;;  %v2458_v6 = vrot.slane %v6569_v14, 3  ;;  %v2460_v14 = vrot.slane %v6580_v41, 3 }
 0x21b   : > { %v2462_v41 = vrot.slane %v6591_v30, 3  ;;  %v2464_v30 = vrot.slane %v6602_v63, 3  ;;  %v2466_v63 = vrot.slane %v6617_v23, 3 }
 0x21c   : > { %1633 = vmatmul.mubr.f32.gmra.mrb[92].mxu1 %v6919_v51  ;;  %2053 = vmatmul.mubr.f32.gmra.mrb[60].mxu0 %v6938_v11  ;;  %v2559_v11 = vld [vmem:[#allocation7 + $0x650] sm:$0xff] }
 0x21d   : > { %1638 = vmatprep.mubr.f32.mxu1 %v5798_v0  ;;  %2058 = vmatprep.mubr.f32.mxu0 %v5798_v0  ;;  %v2563_v51 = vld [vmem:[#allocation7 + $0x670] sm:$0xff] }
 0x21e   : > { %v4729_v24 = vpack.c.bf16 %v2563_v51, %v2559_v11  ;;  %v4733_v51 = vpack.c.bf16 %v2571_v38, %v2567_v49  ;;  %v2587_v49 = vld [vmem:[#allocation7 + $0x730] sm:$0xff]  ;;  %v2596_v38 = vld [vmem:[#allocation7 + $0x778] sm:$0xff] }
 0x220   : > { %1639 = vmatmul.mubr.f32.gmra.mrb[94].mxu1 %v6930_v1  ;;  %2059 = vmatmul.mubr.f32.gmra.mrb[62].mxu0 %v6950_v25  ;;  %v2568_v1 = vld [vmem:[#allocation7 + $0x698] sm:$0xff]  ;;  %v6966_v25 = vsel %vm2450_vm2, %v2452_v22, %v2454_v54  ;;  %v6975_v22 = vsel %vm2450_vm2, %v2454_v54, %v2456_v18  ;;  %v6983_v54 = vsel %vm2450_vm2, %v2456_v18, %v2458_v6 }
 0x221   : > { %2129 = vmatprep.mubr.f32.mxu1 %v5798_v0  ;;  %2677 = vmatprep.mubr.f32.mxu0 %v5798_v0  ;;  %v4731_v45 = vpack.c.bf16 %v2572_v4, %v2568_v1  ;;  %v2575_v1 = vld [vmem:[#allocation7 + $0x6d0] sm:$0xff]  ;;  %v6991_v18 = vsel %vm2450_vm2, %v2458_v6, %v2460_v14  ;;  %v6999_v6 = vsel %vm2450_vm2, %v2460_v14, %v2462_v41 }
 0x222   : > { %v2579_v4 = vld [vmem:[#allocation7 + $0x6f0] sm:$0xff]  ;;  %v7007_v14 = vsel %vm2450_vm2, %v2462_v41, %v2464_v30  ;;  %v2468_v41 = vrot.slane %v6632_v60, 3  ;;  %v2472_v60 = vrot.slane %v6662_v20, 3  ;;  %v2476_v20 = vrot.slane %v6721_v19, 3 }
 0x223   : > { %v2480_v19 = vrot.slane %v6757_v47, 3  ;;  %v2484_v47 = vrot.slane %v6749_v12, 3  ;;  %v2488_v12 = vrot.slane %v6782_v42, 3 }
 0x224   : > { %2130 = vmatmul.mubr.f32.vlgmr.msra.gmra.mrb[32].mxu1 %v6544_v53  ;;  %2678 = vmatmul.mubr.f32.vlgmr.msra.gmra.mrb[0].mxu0 %v6959_v27  ;;  %v2576_v53 = vld [vmem:[#allocation7 + $0x6d8] sm:$0xff] }
 0x225   : > { %4726 = vmatpush1.bf16.msra.mxu1 %v4725_v58  ;;  %2135 = vmatprep.mubr.f32.mxu1 %v5798_v0  ;;  %v4735_v11 = vpack.c.bf16 %v2580_v50, %v2576_v53  ;;  %v2588_v58 = vld [vmem:[#allocation7 + $0x738] sm:$0xff] }
 0x226   : > { %2683 = vmatprep.mubr.f32.mxu0 %v5798_v0  ;;  %4728 = vmatprep.subr.bf16.mxu1 %v4727_v40  ;;  %v4737_v40 = vpack.c.bf16 %v2579_v4, %v2575_v1  ;;  %v2604_v1 = vld [vmem:[#allocation7 + $0x7b8] sm:$0xff] }
 0x228   : > { %2136 = vmatmul.mubr.f32.gmra.mrb[34].mxu1 %v6554_v21  ;;  %2684 = vmatmul.mubr.f32.gmra.mrb[2].mxu0 %v6966_v25  ;;  %v2584_v21 = vld [vmem:[#allocation7 + $0x718] sm:$0xff] }
 0x229   : > { %2141 = vmatprep.mubr.f32.mxu1 %v5798_v0  ;;  %2689 = vmatprep.mubr.f32.mxu0 %v5798_v0 }
 0x22a   : > { %4730 = vmatpush1.bf16.msra.mxu1 %v4729_v24  ;;  %v4739_v24 = vpack.c.bf16 %v2588_v58, %v2584_v21  ;;  %v2599_v58 = vld [vmem:[#allocation7 + $0x790] sm:$0xff] }
 0x22b   : > { %4732 = vmatprep.subr.bf16.mxu1 %v4731_v45  ;;  %v2583_v45 = vld [vmem:[#allocation7 + $0x710] sm:$0xff] }
 0x22c   : > { %2142 = vmatmul.mubr.f32.gmra.mrb[36].mxu1 %v6566_v9  ;;  %2690 = vmatmul.mubr.f32.gmra.mrb[4].mxu0 %v6975_v22  ;;  %v2592_v9 = vld [vmem:[#allocation7 + $0x758] sm:$0xff]  ;;  %v4741_v53 = vpack.c.bf16 %v2587_v49, %v2583_v45 }
 0x22d   : > { %2147 = vmatprep.mubr.f32.mxu1 %v5798_v0  ;;  %2695 = vmatprep.mubr.f32.mxu0 %v5798_v0  ;;  %v4743_v50 = vpack.c.bf16 %v2596_v38, %v2592_v9  ;;  %v2607_v9 = vld [vmem:[#allocation7 + $0x7d0] sm:$0xff] }
 0x22e   : > { %4734 = vmatpush1.bf16.msra.mxu1 %v4733_v51  ;;  %v2591_v51 = vld [vmem:[#allocation7 + $0x750] sm:$0xff] }
 0x22f   : > { %4736 = vmatprep.subr.bf16.mxu1 %v4735_v11  ;;  %v2595_v11 = vld [vmem:[#allocation7 + $0x770] sm:$0xff] }
 0x230   : > { %2148 = vmatmul.mubr.f32.gmra.mrb[38].mxu1 %v6577_v61  ;;  %2696 = vmatmul.mubr.f32.gmra.mrb[6].mxu0 %v6983_v54  ;;  %v2600_v61 = vld [vmem:[#allocation7 + $0x798] sm:$0xff]  ;;  %v4745_v4 = vpack.c.bf16 %v2595_v11, %v2591_v51  ;;  %v2611_v38 = vld [vmem:[#allocation7 + $0x7f0] sm:$0xff]  ;;  %v8609_v51 = vld [vmem:[#allocation58_spill] sm:$0xff] }
 0x231   : > { %2153 = vmatprep.mubr.f32.mxu1 %v5798_v0  ;;  %2701 = vmatprep.mubr.f32.mxu0 %v5798_v0  ;;  %v4747_v21 = vpack.c.bf16 %v2604_v1, %v2600_v61  ;;  %v4753_v23 = vpack.c.bf16 %v2611_v38, %v2607_v9  ;;  %v8611_v61 = vld [vmem:[#allocation60_spill] sm:$0xff] }
 0x232   : > { %4738 = vmatpush1.bf16.msra.mxu1 %v4737_v40  ;;  %v2603_v40 = vld [vmem:[#allocation7 + $0x7b0] sm:$0xff] }
 0x233   : > { %4740 = vmatprep.subr.bf16.mxu1 %v4739_v24  ;;  %v2612_v24 = vld [vmem:[#allocation7 + $0x7f8] sm:$0xff]  ;;  %v4749_v45 = vpack.c.bf16 %v2603_v40, %v2599_v58  ;;  %v8615_v9 = vld [vmem:[#allocation64_spill] sm:$0xff] }
 0x234   : > { %2154 = vmatmul.mubr.f32.gmra.mrb[40].mxu1 %v6588_v10  ;;  %2702 = vmatmul.mubr.f32.gmra.mrb[8].mxu0 %v6991_v18  ;;  %v2608_v10 = vld [vmem:[#allocation7 + $0x7d8] sm:$0xff] }
 0x235   : > { %2159 = vmatprep.mubr.f32.mxu1 %v5798_v0  ;;  %2707 = vmatprep.mubr.f32.mxu0 %v5798_v0  ;;  %v4751_v49 = vpack.c.bf16 %v2612_v24, %v2608_v10  ;;  %v8614_v40 = vld [vmem:[#allocation65_spill] sm:$0xff]  ;;  %v3895_v24 = vld [vmem:[#allocation8] sm:$0xff] }
 0x236   : > { %4742 = vmatpush1.bf16.msra.mxu1 %v4741_v53  ;;  %v2470_v53 = vrot.slane %v6647_v57, 3  ;;  %v2474_v57 = vrot.slane %v6677_v26, 3  ;;  %v2478_v26 = vrot.slane %v6739_v39, 3  ;;  %v2482_v39 = vrot.slane %v6731_v59, 3 }
 0x237   : > { %4744 = vmatprep.subr.bf16.mxu1 %v4743_v50  ;;  %v2486_v59 = vrot.slane %v6767_v31, 3  ;;  %v2490_v31 = vrot.slane %v6797_v56, 3  ;;  %v2508_v10 = vrot.slane %v8614_v40, 3  ;;  %v3912_v40 = vld [vmem:[#allocation8 + $0x88] sm:$0xff] }
 0x238   : > { %2160 = vmatmul.mubr.f32.gmra.mrb[42].mxu1 %v6599_v28  ;;  %2708 = vmatmul.mubr.f32.gmra.mrb[10].mxu0 %v6999_v6  ;;  %v7015_v28 = vsel %vm2450_vm2, %v2464_v30, %v2466_v63  ;;  %v8612_v30 = vld [vmem:[#allocation63_spill] sm:$0xff] }
 0x239   : > { %2165 = vmatprep.mubr.f32.mxu1 %v5798_v0  ;;  %2713 = vmatprep.mubr.f32.mxu0 %v5798_v0  ;;  %v7111_v42 = vsel %vm2450_vm2, %v2488_v12, %v2490_v31 }
 0x23a   : > { %4746 = vmatpush1.bf16.msra.mxu1 %v4745_v4  ;;  %v2506_v4 = vrot.slane %v8612_v30, 3 }
 0x23b   : > { %4748 = vmatprep.subr.bf16.mxu1 %v4747_v21  ;;  %v8613_v21 = vld [vmem:[#allocation62_spill] sm:$0xff] }
 0x23c   : > { %2166 = vmatmul.mubr.f32.gmra.mrb[44].mxu1 %v6614_v62  ;;  %2714 = vmatmul.mubr.f32.gmra.mrb[12].mxu0 %v7007_v14  ;;  %v7023_v62 = vsel %vm2450_vm2, %v2466_v63, %v2468_v41  ;;  %v3896_v63 = vld [vmem:[#allocation8 + $0x8] sm:$0xff]  ;;  %v7184_v38 = vsel %vm2450_vm2, %v2506_v4, %v2508_v10 }
 0x23d   : > { %2171 = vmatprep.mubr.f32.mxu1 %v5798_v0  ;;  %2719 = vmatprep.mubr.f32.mxu0 %v5798_v0 }
 0x23e   : > { %4750 = vmatpush1.bf16.msra.mxu1 %v4749_v45  ;;  %v5799_v45 = vmov 0.0|0.0  }
 0x23f   : > { %4752 = vmatprep.subr.bf16.mxu1 %v4751_v49  ;;  %4755 = vmatprep.subr.bf16.mxu0 %v5799_v45  ;;  %v4756_v49 = vpack.c.bf16 %v3896_v63, %v3895_v24  ;;  %v3916_v24 = vld [vmem:[#allocation8 + $0xa8] sm:$0xff]  ;;  %v3918_v63 = vld [vmem:[#allocation8 + $0xb8] sm:$0xff] }
 0x240   : > { %2172 = vmatmul.mubr.f32.gmra.mrb[46].mxu1 %v6629_v33  ;;  %2720 = vmatmul.mubr.f32.gmra.mrb[14].mxu0 %v7015_v28  ;;  %v7031_v33 = vsel %vm2450_vm2, %v2468_v41, %v2470_v53  ;;  %v8616_v41 = vld [vmem:[#allocation67_spill] sm:$0xff] }
 0x241   : > { %2177 = vmatprep.mubr.f32.mxu1 %v5798_v0  ;;  %2725 = vmatprep.mubr.f32.mxu0 %v5798_v0 }
 0x242   : > { %4754 = vmatpush1.bf16.msra.mxu1 %v4753_v23  ;;  %v2510_v23 = vrot.slane %v8616_v41, 3  ;;  %4757 = vmatpush1.bf16.msra.mxu0 %v4756_v49  ;;  %v3920_v49 = vld [vmem:[#allocation8 + $0xc8] sm:$0xff] }
 0x243   : > { %4758 = vmatprep.subr.bf16.mxu0 %v5799_v45 }
 0x244   : > { %2178 = vmatmul.mubr.f32.gmra.mrb[48].mxu1 %v6644_v55  ;;  %2726 = vmatmul.mubr.f32.gmra.mrb[16].mxu0 %v7023_v62  ;;  %v7039_v55 = vsel %vm2450_vm2, %v2470_v53, %v2472_v60  ;;  %v8617_v53 = vld [vmem:[#allocation66_spill] sm:$0xff] }
 0x245   : > { %2183 = vmatprep.mubr.f32.mxu1 %v5798_v0  ;;  %2731 = vmatprep.mubr.f32.mxu0 %v5798_v0 }
 0x248   : > { %2184 = vmatmul.mubr.f32.gmra.mrb[50].mxu1 %v6659_v36  ;;  %2732 = vmatmul.mubr.f32.gmra.mrb[18].mxu0 %v7031_v33  ;;  %v7047_v36 = vsel %vm2450_vm2, %v2472_v60, %v2474_v57  ;;  %v7193_v60 = vsel %vm2450_vm2, %v2508_v10, %v2510_v23  ;;  %v3914_v10 = vld [vmem:[#allocation8 + $0x98] sm:$0xff] }
 0x249   : > { %2189 = vmatprep.mubr.f32.mxu1 %v5798_v0  ;;  %2737 = vmatprep.mubr.f32.mxu0 %v5798_v0 }
 0x24c   : > { %2190 = vmatmul.mubr.f32.gmra.mrb[52].mxu1 %v6674_v2  ;;  %2738 = vmatmul.mubr.f32.gmra.mrb[20].mxu0 %v7039_v55  ;;  %v7055_v2 = vsel %vm2450_vm2, %v2474_v57, %v2476_v20  ;;  %v8618_v57 = vld [vmem:[#allocation69_spill] sm:$0xff] }
 0x24d   : > { %2195 = vmatprep.mubr.f32.mxu1 %v5798_v0  ;;  %2743 = vmatprep.mubr.f32.mxu0 %v5798_v0 }
 0x250   : > { %2196 = vmatmul.mubr.f32.gmra.mrb[54].mxu1 %v6689_v32  ;;  %2744 = vmatmul.mubr.f32.gmra.mrb[22].mxu0 %v7047_v36  ;;  %v7063_v32 = vsel %vm2450_vm2, %v2476_v20, %v2478_v26  ;;  %v2512_v20 = vrot.slane %v8618_v57, 3  ;;  %v3923_v57 = vld [vmem:[#allocation8 + $0xe0] sm:$0xff] }
 0x251   : > { %2201 = vmatprep.mubr.f32.mxu1 %v5798_v0  ;;  %2749 = vmatprep.mubr.f32.mxu0 %v5798_v0 }
 0x254   : > { %2202 = vmatmul.mubr.f32.gmra.mrb[56].mxu1 %v6701_v3  ;;  %2750 = vmatmul.mubr.f32.gmra.mrb[24].mxu0 %v7055_v2  ;;  %v7071_v3 = vsel %vm2450_vm2, %v2478_v26, %v2480_v19  ;;  %v3897_v26 = vld [vmem:[#allocation8 + $0x10] sm:$0xff] }
 0x255   : > { %2207 = vmatprep.mubr.f32.mxu1 %v5798_v0  ;;  %2755 = vmatprep.mubr.f32.mxu0 %v5798_v0 }
 0x258   : > { %2208 = vmatmul.mubr.f32.gmra.mrb[58].mxu1 %v6713_v46  ;;  %2756 = vmatmul.mubr.f32.gmra.mrb[26].mxu0 %v7063_v32  ;;  %v7079_v46 = vsel %vm2450_vm2, %v2480_v19, %v2482_v39  ;;  %v3898_v19 = vld [vmem:[#allocation8 + $0x18] sm:$0xff] }
 0x259   : > { %2213 = vmatprep.mubr.f32.mxu1 %v5798_v0  ;;  %2761 = vmatprep.mubr.f32.mxu0 %v5798_v0 }
 0x25c   : > { %2214 = vmatmul.mubr.f32.gmra.mrb[60].mxu1 %v6728_v13  ;;  %2762 = vmatmul.mubr.f32.gmra.mrb[28].mxu0 %v7071_v3  ;;  %v7087_v13 = vsel %vm2450_vm2, %v2482_v39, %v2484_v47  ;;  %v4759_v39 = vpack.c.bf16 %v3898_v19, %v3897_v26 }
 0x25d   : > { %2219 = vmatprep.mubr.f32.mxu1 %v5798_v0  ;;  %2767 = vmatprep.mubr.f32.mxu0 %v5798_v0 }
 0x25e   : > { %4760 = vmatpush1.bf16.msra.mxu0 %v4759_v39 }
 0x25f   : > { %4761 = vmatprep.subr.bf16.mxu0 %v5799_v45 }
 0x260   : > { %2220 = vmatmul.mubr.f32.gmra.mrb[62].mxu1 %v6746_v29  ;;  %2768 = vmatmul.mubr.f32.gmra.mrb[30].mxu0 %v7079_v46  ;;  %v7095_v29 = vsel %vm2450_vm2, %v2484_v47, %v2486_v59  ;;  %v8619_v47 = vld [vmem:[#allocation68_spill] sm:$0xff] }
 0x261   : > { %2225 = vmatprep.mubr.f32.mxu1 %v5798_v0  ;;  %2773 = vmatprep.mubr.f32.mxu0 %v5798_v0 }
 0x264   : > { %2226 = vmatmul.mubr.f32.gmra.mrb[64].mxu1 %v6764_v5  ;;  %2774 = vmatmul.mubr.f32.gmra.mrb[32].mxu0 %v7087_v13  ;;  %v7103_v5 = vsel %vm2450_vm2, %v2486_v59, %v2488_v12  ;;  %v7201_v59 = vsel %vm2450_vm2, %v2510_v23, %v2512_v20  ;;  %v8620_v12 = vld [vmem:[#allocation71_spill] sm:$0xff] }
 0x265   : > { %2231 = vmatprep.mubr.f32.mxu1 %v5798_v0  ;;  %2779 = vmatprep.mubr.f32.mxu0 %v5798_v0 }
 0x268   : > { %2232 = vmatmul.mubr.f32.gmra.mrb[66].mxu1 %v6779_v34  ;;  %2780 = vmatmul.mubr.f32.gmra.mrb[34].mxu0 %v7095_v29  ;;  %v2492_v34 = vrot.slane %v6812_v8, 3 }
 0x269   : > { %2237 = vmatprep.mubr.f32.mxu1 %v5798_v0  ;;  %2785 = vmatprep.mubr.f32.mxu0 %v5798_v0 }
 0x26a   : > { %v7119_v56 = vsel %vm2450_vm2, %v2490_v31, %v2492_v34  ;;  %v2546_v31 = vrot.slane %v8620_v12, 3  ;;  %v3926_v12 = vld [vmem:[#allocation8 + $0xf8] sm:$0xff] }
 0x26c   : > { %2238 = vmatmul.mubr.f32.gmra.mrb[68].mxu1 %v6794_v52  ;;  %2786 = vmatmul.mubr.f32.gmra.mrb[36].mxu0 %v7103_v5  ;;  %v2494_v52 = vrot.slane %v6827_v48, 3 }
 0x26d   : > { %2243 = vmatprep.mubr.f32.mxu1 %v5798_v0  ;;  %2791 = vmatprep.mubr.f32.mxu0 %v5798_v0 }
 0x26e   : > { %v7127_v8 = vsel %vm2450_vm2, %v2492_v34, %v2494_v52  ;;  %v8621_v34 = vld [vmem:[#allocation70_spill] sm:$0xff] }
 0x270   : > { %2244 = vmatmul.mubr.f32.gmra.mrb[70].mxu1 %v6809_v35  ;;  %2792 = vmatmul.mubr.f32.gmra.mrb[38].mxu0 %v7111_v42  ;;  %v2496_v35 = vrot.slane %v6842_v15, 3 }
 0x271   : > { %2249 = vmatprep.mubr.f32.mxu1 %v5798_v0  ;;  %2797 = vmatprep.mubr.f32.mxu0 %v5798_v0 }
 0x272   : > { %v7135_v48 = vsel %vm2450_vm2, %v2494_v52, %v2496_v35  ;;  %v7210_v52 = vsel %vm2450_vm2, %v2512_v20, %v2546_v31  ;;  %v3924_v20 = vld [vmem:[#allocation8 + $0xe8] sm:$0xff] }
 0x274   : > { %2250 = vmatmul.mubr.f32.gmra.mrb[72].mxu1 %v6824_v43  ;;  %2798 = vmatmul.mubr.f32.gmra.mrb[40].mxu0 %v7119_v56  ;;  %v2498_v43 = vrot.slane %v6853_v16, 3  ;;  %v8608_v16 = vld [vmem:[#allocation59_spill] sm:$0xff] }
 0x275   : > { %2255 = vmatprep.mubr.f32.mxu1 %v5798_v0  ;;  %2803 = vmatprep.mubr.f32.mxu0 %v5798_v0  ;;  %v2502_v50 = vrot.slane %v8608_v16, 3  ;;  %v8622_v16 = vld [vmem:[#allocation72_spill] sm:$0xff] }
 0x276   : > { %v7143_v15 = vsel %vm2450_vm2, %v2496_v35, %v2498_v43  ;;  %v3899_v35 = vld [vmem:[#allocation8 + $0x20] sm:$0xff] }
 0x278   : > { %2256 = vmatmul.mubr.f32.gmra.mrb[74].mxu1 %v6839_v17  ;;  %2804 = vmatmul.mubr.f32.gmra.mrb[42].mxu0 %v7127_v8  ;;  %v2500_v17 = vrot.slane %v6864_v44, 3 }
 0x279   : > { %2261 = vmatprep.mubr.f32.mxu1 %v5798_v0  ;;  %2809 = vmatprep.mubr.f32.mxu0 %v5798_v0 }
 0x27a   : > { %v7159_v44 = vsel %vm2450_vm2, %v2500_v17, %v2502_v50 }
 0x27c   : > { %2262 = vmatmul.mubr.f32.gmra.mrb[76].mxu1 %v6850_v37  ;;  %2810 = vmatmul.mubr.f32.gmra.mrb[44].mxu0 %v7135_v48  ;;  %v7151_v37 = vsel %vm2450_vm2, %v2498_v43, %v2500_v17  ;;  %v3900_v43 = vld [vmem:[#allocation8 + $0x28] sm:$0xff] }
 0x27d   : > { %2267 = vmatprep.mubr.f32.mxu1 %v5798_v0  ;;  %2815 = vmatprep.mubr.f32.mxu0 %v5798_v0  ;;  %v4762_v17 = vpack.c.bf16 %v3900_v43, %v3899_v35 }
 0x27f   : > { %4763 = vmatpush1.bf16.msra.mxu0 %v4762_v17 }
 0x280   : > { %2268 = vmatmul.mubr.f32.gmra.mrb[78].mxu1 %v6861_v7  ;;  %2816 = vmatmul.mubr.f32.gmra.mrb[46].mxu0 %v7143_v15  ;;  %v8610_v7 = vld [vmem:[#allocation61_spill] sm:$0xff] }
 0x281   : > { %2273 = vmatprep.mubr.f32.mxu1 %v5798_v0  ;;  %2821 = vmatprep.mubr.f32.mxu0 %v5798_v0  ;;  %v2504_v11 = vrot.slane %v8610_v7, 3 }
 0x282   : > { %4764 = vmatprep.subr.bf16.mxu0 %v5799_v45 }
 0x283   : > { %v7167_v1 = vsel %vm2450_vm2, %v2502_v50, %v2504_v11  ;;  %v7175_v58 = vsel %vm2450_vm2, %v2504_v11, %v2506_v4  ;;  %v3901_v50 = vld [vmem:[#allocation8 + $0x30] sm:$0xff]  ;;  %v3903_v11 = vld [vmem:[#allocation8 + $0x40] sm:$0xff] }
 0x284   : > { %2274 = vmatmul.mubr.f32.gmra.mrb[80].mxu1 %v8609_v51  ;;  %2822 = vmatmul.mubr.f32.gmra.mrb[48].mxu0 %v7151_v37  ;;  %v3902_v51 = vld [vmem:[#allocation8 + $0x38] sm:$0xff] }
 0x285   : > { %2279 = vmatprep.mubr.f32.mxu1 %v5798_v0  ;;  %2827 = vmatprep.mubr.f32.mxu0 %v5798_v0  ;;  %v4765_v7 = vpack.c.bf16 %v3902_v51, %v3901_v50 }
 0x287   : > { %4766 = vmatpush1.bf16.msra.mxu0 %v4765_v7 }
 0x288   : > { %2280 = vmatmul.mubr.f32.gmra.mrb[82].mxu1 %v8611_v61  ;;  %2828 = vmatmul.mubr.f32.gmra.mrb[50].mxu0 %v7159_v44  ;;  %v3904_v61 = vld [vmem:[#allocation8 + $0x48] sm:$0xff] }
 0x289   : > { %2285 = vmatprep.mubr.f32.mxu1 %v5798_v0  ;;  %2833 = vmatprep.mubr.f32.mxu0 %v5798_v0  ;;  %v4768_v30 = vpack.c.bf16 %v3904_v61, %v3903_v11 }
 0x28a   : > { %4767 = vmatprep.subr.bf16.mxu0 %v5799_v45 }
 0x28b   : > { %4769 = vmatpush1.bf16.msra.mxu0 %v4768_v30 }
 0x28c   : > { %2286 = vmatmul.mubr.f32.gmra.mrb[84].mxu1 %v8613_v21  ;;  %2834 = vmatmul.mubr.f32.gmra.mrb[52].mxu0 %v7167_v1  ;;  %v3910_v21 = vld [vmem:[#allocation8 + $0x78] sm:$0xff] }
 0x28d   : > { %2291 = vmatprep.mubr.f32.mxu1 %v5798_v0  ;;  %2839 = vmatprep.mubr.f32.mxu0 %v5798_v0 }
 0x28e   : > { %4770 = vmatprep.subr.bf16.mxu0 %v5799_v45 }
 0x290   : > { %2292 = vmatmul.mubr.f32.gmra.mrb[86].mxu1 %v8615_v9  ;;  %2840 = vmatmul.mubr.f32.gmra.mrb[54].mxu0 %v7175_v58  ;;  %v3921_v9 = vld [vmem:[#allocation8 + $0xd0] sm:$0xff] }
 0x291   : > { %2297 = vmatprep.mubr.f32.mxu1 %v5798_v0  ;;  %2845 = vmatprep.mubr.f32.mxu0 %v5798_v0 }
 0x294   : > { %2298 = vmatmul.mubr.f32.gmra.mrb[88].mxu1 %v8617_v53  ;;  %2846 = vmatmul.mubr.f32.gmra.mrb[56].mxu0 %v7184_v38 }
 0x295   : > { %2303 = vmatprep.mubr.f32.mxu1 %v5798_v0  ;;  %2851 = vmatprep.mubr.f32.mxu0 %v5798_v0 }
 0x298   : > { %2304 = vmatmul.mubr.f32.gmra.mrb[90].mxu1 %v8619_v47  ;;  %2852 = vmatmul.mubr.f32.gmra.mrb[58].mxu0 %v7193_v60  ;;  %v3925_v47 = vld [vmem:[#allocation8 + $0xf0] sm:$0xff] }
 0x299   : > { %2309 = vmatprep.mubr.f32.mxu1 %v5798_v0  ;;  %2857 = vmatprep.mubr.f32.mxu0 %v5798_v0 }
 0x29c   : > { %2310 = vmatmul.mubr.f32.gmra.mrb[92].mxu1 %v8621_v34  ;;  %2858 = vmatmul.mubr.f32.gmra.mrb[60].mxu0 %v7201_v59 }
 0x29d   : > { %2315 = vmatprep.mubr.f32.mxu1 %v5798_v0  ;;  %2863 = vmatprep.mubr.f32.mxu0 %v5798_v0 }
 0x2a0   : > { %2316 = vmatmul.mubr.f32.gmra.mrb[94].mxu1 %v8622_v16  ;;  %2864 = vmatmul.mubr.f32.gmra.mrb[62].mxu0 %v7210_v52 }
 0x2a1   : > { %2934 = vmatprep.mubr.f32.mxu1 %v5798_v0 }
 0x2a4   : > { %2935 = vmatmul.mubr.f32.vlgmr.msra.gmra.mrb[32].mxu1 %v6959_v27  ;;  %v3906_v27 = vld [vmem:[#allocation8 + $0x58] sm:$0xff] }
 0x2a5   : > { %2940 = vmatprep.mubr.f32.mxu1 %v5798_v0 }
 0x2a8   : > { %2941 = vmatmul.mubr.f32.gmra.mrb[34].mxu1 %v6966_v25  ;;  %v3905_v25 = vld [vmem:[#allocation8 + $0x50] sm:$0xff] }
 0x2a9   : > { %2946 = vmatprep.mubr.f32.mxu1 %v5798_v0  ;;  %v4771_v4 = vpack.c.bf16 %v3906_v27, %v3905_v25 }
 0x2ab   : > { %4772 = vmatpush1.bf16.msra.mxu0 %v4771_v4  ;;  %v8623_v4 = vld [vmem:[#allocation26_spill] sm:$0xff] }
 0x2ac   : > { %2947 = vmatmul.mubr.f32.gmra.mrb[36].mxu1 %v6975_v22  ;;  %4773 = vmatprep.subr.bf16.mxu0 %v5799_v45  ;;  %v3907_v22 = vld [vmem:[#allocation8 + $0x60] sm:$0xff] }
 0x2ad   : > { %2952 = vmatprep.mubr.f32.mxu1 %v5798_v0 }
 0x2b0   : > { %2953 = vmatmul.mubr.f32.gmra.mrb[38].mxu1 %v6983_v54  ;;  %v3908_v54 = vld [vmem:[#allocation8 + $0x68] sm:$0xff] }
 0x2b1   : > { %2958 = vmatprep.mubr.f32.mxu1 %v5798_v0 }
 0x2b4   : > { %2959 = vmatmul.mubr.f32.gmra.mrb[40].mxu1 %v6991_v18  ;;  %v4774_v18 = vpack.c.bf16 %v3908_v54, %v3907_v22 }
 0x2b5   : > { %2964 = vmatprep.mubr.f32.mxu1 %v5798_v0 }
 0x2b6   : > { %4775 = vmatpush1.bf16.msra.mxu0 %v4774_v18  ;;  %v8624_v18 = vld [vmem:[#allocation30_spill] sm:$0xff] }
 0x2b7   : > { %4776 = vmatprep.subr.bf16.mxu0 %v5799_v45 }
 0x2b8   : > { %2965 = vmatmul.mubr.f32.gmra.mrb[42].mxu1 %v6999_v6  ;;  %v3909_v6 = vld [vmem:[#allocation8 + $0x70] sm:$0xff] }
 0x2b9   : > { %2970 = vmatprep.mubr.f32.mxu1 %v5798_v0 }
 0x2bc   : > { %2971 = vmatmul.mubr.f32.gmra.mrb[44].mxu1 %v7007_v14  ;;  %v4777_v14 = vpack.c.bf16 %v3910_v21, %v3909_v6 }
 0x2bd   : > { %2976 = vmatprep.mubr.f32.mxu1 %v5798_v0 }
 0x2be   : > { %4778 = vmatpush1.bf16.msra.mxu0 %v4777_v14  ;;  %v8625_v14 = vld [vmem:[#allocation27_spill] sm:$0xff] }
 0x2bf   : > { %4779 = vmatprep.subr.bf16.mxu0 %v5799_v45 }
 0x2c0   : > { %2977 = vmatmul.mubr.f32.gmra.mrb[46].mxu1 %v7015_v28  ;;  %v3911_v28 = vld [vmem:[#allocation8 + $0x80] sm:$0xff] }
 0x2c1   : > { %2982 = vmatprep.mubr.f32.mxu1 %v5798_v0 }
 0x2c4   : > { %2983 = vmatmul.mubr.f32.gmra.mrb[48].mxu1 %v7023_v62  ;;  %v4780_v62 = vpack.c.bf16 %v3912_v40, %v3911_v28 }
 0x2c5   : > { %2988 = vmatprep.mubr.f32.mxu1 %v5798_v0 }
 0x2c6   : > { %4781 = vmatpush1.bf16.msra.mxu0 %v4780_v62  ;;  %v8626_v62 = vld [vmem:[#allocation32_spill] sm:$0xff] }
 0x2c7   : > { %4782 = vmatprep.subr.bf16.mxu0 %v5799_v45 }
 0x2c8   : > { %2989 = vmatmul.mubr.f32.gmra.mrb[50].mxu1 %v7031_v33  ;;  %v3913_v33 = vld [vmem:[#allocation8 + $0x90] sm:$0xff] }
 0x2c9   : > { %2994 = vmatprep.mubr.f32.mxu1 %v5798_v0 }
 0x2cc   : > { %2995 = vmatmul.mubr.f32.gmra.mrb[52].mxu1 %v7039_v55  ;;  %v4783_v55 = vpack.c.bf16 %v3914_v10, %v3913_v33 }
 0x2cd   : > { %3000 = vmatprep.mubr.f32.mxu1 %v5798_v0 }
 0x2ce   : > { %4784 = vmatpush1.bf16.msra.mxu0 %v4783_v55  ;;  %v8627_v55 = vld [vmem:[#allocation28_spill] sm:$0xff] }
 0x2cf   : > { %4785 = vmatprep.subr.bf16.mxu0 %v5799_v45 }
 0x2d0   : > { %3001 = vmatmul.mubr.f32.gmra.mrb[54].mxu1 %v7047_v36  ;;  %v3915_v36 = vld [vmem:[#allocation8 + $0xa0] sm:$0xff] }
 0x2d1   : > { %3006 = vmatprep.mubr.f32.mxu1 %v5798_v0 }
 0x2d4   : > { %3007 = vmatmul.mubr.f32.gmra.mrb[56].mxu1 %v7055_v2  ;;  %v4786_v2 = vpack.c.bf16 %v3916_v24, %v3915_v36 }
 0x2d5   : > { %3012 = vmatprep.mubr.f32.mxu1 %v5798_v0 }
 0x2d6   : > { %4787 = vmatpush1.bf16.msra.mxu0 %v4786_v2  ;;  %v8628_v2 = vld [vmem:[#allocation34_spill] sm:$0xff] }
 0x2d7   : > { %4788 = vmatprep.subr.bf16.mxu0 %v5799_v45 }
 0x2d8   : > { %3013 = vmatmul.mubr.f32.gmra.mrb[58].mxu1 %v7063_v32  ;;  %v3917_v32 = vld [vmem:[#allocation8 + $0xb0] sm:$0xff] }
 0x2d9   : > { %3018 = vmatprep.mubr.f32.mxu1 %v5798_v0 }
 0x2dc   : > { %3019 = vmatmul.mubr.f32.gmra.mrb[60].mxu1 %v7071_v3  ;;  %v4789_v3 = vpack.c.bf16 %v3918_v63, %v3917_v32 }
 0x2dd   : > { %3024 = vmatprep.mubr.f32.mxu1 %v5798_v0 }
 0x2de   : > { %4790 = vmatpush1.bf16.msra.mxu0 %v4789_v3  ;;  %v8629_v3 = vld [vmem:[#allocation29_spill] sm:$0xff] }
 0x2df   : > { %4791 = vmatprep.subr.bf16.mxu0 %v5799_v45 }
 0x2e0   : > { %3025 = vmatmul.mubr.f32.gmra.mrb[62].mxu1 %v7079_v46  ;;  %v3919_v46 = vld [vmem:[#allocation8 + $0xc0] sm:$0xff] }
 0x2e1   : > { %3030 = vmatprep.mubr.f32.mxu1 %v5798_v0 }
 0x2e4   : > { %3031 = vmatmul.mubr.f32.gmra.mrb[64].mxu1 %v7087_v13  ;;  %v4792_v13 = vpack.c.bf16 %v3920_v49, %v3919_v46 }
 0x2e5   : > { %3036 = vmatprep.mubr.f32.mxu1 %v5798_v0 }
 0x2e6   : > { %4793 = vmatpush1.bf16.msra.mxu0 %v4792_v13  ;;  %v8630_v13 = vld [vmem:[#allocation36_spill] sm:$0xff] }
 0x2e7   : > { %4794 = vmatprep.subr.bf16.mxu0 %v5799_v45 }
 0x2e8   : > { %3037 = vmatmul.mubr.f32.gmra.mrb[66].mxu1 %v7095_v29 }
 0x2e9   : > { %3042 = vmatprep.mubr.f32.mxu1 %v5798_v0 }
 0x2ec   : > { %3043 = vmatmul.mubr.f32.gmra.mrb[68].mxu1 %v7103_v5  ;;  %v3922_v5 = vld [vmem:[#allocation8 + $0xd8] sm:$0xff] }
 0x2ed   : > { %3048 = vmatprep.mubr.f32.mxu1 %v5798_v0  ;;  %v4795_v23 = vpack.c.bf16 %v3922_v5, %v3921_v9 }
 0x2ef   : > { %4796 = vmatpush1.bf16.msra.mxu0 %v4795_v23  ;;  %v8631_v23 = vld [vmem:[#allocation31_spill] sm:$0xff] }
 0x2f0   : > { %3049 = vmatmul.mubr.f32.gmra.mrb[70].mxu1 %v7111_v42  ;;  %4797 = vmatprep.subr.bf16.mxu0 %v5799_v45 }
 0x2f1   : > { %3054 = vmatprep.mubr.f32.mxu1 %v5798_v0 }
 0x2f4   : > { %3055 = vmatmul.mubr.f32.gmra.mrb[72].mxu1 %v7119_v56 }
 0x2f5   : > { %3060 = vmatprep.mubr.f32.mxu1 %v5798_v0 }
 0x2f7   : > { %v7268_v29 = vpop.f32.mrb[0].mxu0 }
 0x2f8   : > { %v7270_v41 = vpop.f32.mrb[1].mxu0  ;;  %3061 = vmatmul.mubr.f32.gmra.mrb[74].mxu1 %v7127_v8  ;;  %v4798_v8 = vpack.c.bf16 %v3924_v20, %v3923_v57 }
 0x2f9   : > { %3066 = vmatprep.mubr.f32.mxu1 %v5798_v0 }
 0x2fa   : > { %4799 = vmatpush1.bf16.msra.mxu0 %v4798_v8  ;;  %v8632_v8 = vld [vmem:[#allocation38_spill] sm:$0xff] }
 0x2fb   : > { %v7274_v42 = vpop.f32.mrb[2].mxu0  ;;  %4800 = vmatprep.subr.bf16.mxu0 %v5799_v45 }
 0x2fc   : > { %v7277_v53 = vpop.f32.mrb[3].mxu0  ;;  %3067 = vmatmul.mubr.f32.gmra.mrb[76].mxu1 %v7135_v48 }
 0x2fd   : > { %3072 = vmatprep.mubr.f32.mxu1 %v5798_v0 }
 0x2ff   : > { %v7281_v56 = vpop.f32.mrb[4].mxu0 }
 0x300   : > { %v7283_v26 = vpop.f32.mrb[5].mxu0  ;;  %3073 = vmatmul.mubr.f32.gmra.mrb[78].mxu1 %v7143_v15  ;;  %v4801_v15 = vpack.c.bf16 %v3926_v12, %v3925_v47 }
 0x301   : > { %3078 = vmatprep.mubr.f32.mxu1 %v5798_v0 }
 0x302   : > { %4802 = vmatpush1.bf16.msra.mxu0 %v4801_v15  ;;  %v8633_v15 = vld [vmem:[#allocation33_spill] sm:$0xff] }
 0x303   : > { %v7287_v19 = vpop.f32.mrb[6].mxu0 }
 0x304   : > { %v7290_v39 = vpop.f32.mrb[7].mxu0  ;;  %3079 = vmatmul.mubr.f32.gmra.mrb[80].mxu1 %v7151_v37 }
 0x305   : > { %3084 = vmatprep.mubr.f32.mxu1 %v5798_v0 }
 0x307   : > { %v7294_v48 = vpop.f32.mrb[8].mxu0 }
 0x308   : > { %v7296_v31 = vpop.f32.mrb[9].mxu0  ;;  %3085 = vmatmul.mubr.f32.gmra.mrb[82].mxu1 %v7159_v44 }
 0x309   : > { %3090 = vmatprep.mubr.f32.mxu1 %v5798_v0 }
 0x30b   : > { %v7300_v34 = vpop.f32.mrb[10].mxu0 }
 0x30c   : > { %v7302_v45 = vpop.f32.mrb[11].mxu0  ;;  %3091 = vmatmul.mubr.f32.gmra.mrb[84].mxu1 %v7167_v1 }
 0x30d   : > { %3096 = vmatprep.mubr.f32.mxu1 %v5798_v0 }
 0x30f   : > { %v7306_v37 = vpop.f32.mrb[12].mxu0 }
 0x310   : > { %v7308_v35 = vpop.f32.mrb[13].mxu0  ;;  %3097 = vmatmul.mubr.f32.gmra.mrb[86].mxu1 %v7175_v58 }
 0x311   : > { %3102 = vmatprep.mubr.f32.mxu1 %v5798_v0 }
 0x313   : > { %v7312_v44 = vpop.f32.mrb[14].mxu0 }
 0x314   : > { %v7314_v43 = vpop.f32.mrb[15].mxu0  ;;  %3103 = vmatmul.mubr.f32.gmra.mrb[88].mxu1 %v7184_v38 }
 0x315   : > { %3108 = vmatprep.mubr.f32.mxu1 %v5798_v0 }
 0x317   : > { %v7318_v17 = vpop.f32.mrb[16].mxu0 }
 0x318   : > { %v7320_v1 = vpop.f32.mrb[17].mxu0  ;;  %3109 = vmatmul.mubr.f32.gmra.mrb[90].mxu1 %v7193_v60 }
 0x319   : > { %3114 = vmatprep.mubr.f32.mxu1 %v5798_v0 }
 0x31b   : > { %v7324_v16 = vpop.f32.mrb[18].mxu0 }
 0x31c   : > { %v7326_v58 = vpop.f32.mrb[19].mxu0  ;;  %3115 = vmatmul.mubr.f32.gmra.mrb[92].mxu1 %v7201_v59 }
 0x31d   : > { %3120 = vmatprep.mubr.f32.mxu1 %v5798_v0 }
 0x31f   : > { %v7330_v50 = vpop.f32.mrb[20].mxu0 }
 0x320   : > { %v7332_v38 = vpop.f32.mrb[21].mxu0  ;;  %3121 = vmatmul.mubr.f32.gmra.mrb[94].mxu1 %v7210_v52 }
 0x323   : > { %v7335_v51 = vpop.f32.mrb[22].mxu0 }
 0x324   : > { %v7337_v7 = vpop.f32.mrb[23].mxu0 }
 0x327   : > { %v7339_v60 = vpop.f32.mrb[24].mxu0 }
 0x328   : > { %v7341_v11 = vpop.f32.mrb[25].mxu0 }
 0x32b   : > { %v7343_v61 = vpop.f32.mrb[26].mxu0 }
 0x32c   : > { %v7345_v30 = vpop.f32.mrb[27].mxu0 }
 0x32f   : > { %v7347_v59 = vpop.f32.mrb[28].mxu0 }
 0x330   : > { %v7349_v0 = vpop.f32.mrb[29].mxu0 }
 0x333   : > { %v7351_v25 = vpop.f32.mrb[30].mxu0 }
 0x334   : > { %v7353_v27 = vpop.f32.mrb[31].mxu0 }
 0x337   : > { %v2775_v52 = vpop.f32.mrb[32].mxu0 }
 0x338   : > { %v7356_v22 = vadd.f32 %v2775_v52, %v8623_v4  ;;  %v2777_v54 = vpop.f32.mrb[33].mxu0 }
 0x339   : > { %v7359_v6 = vadd.f32 %v2777_v54, %v8624_v18  ;;  %v8634_v54 = vld [vmem:[#allocation40_spill] sm:$0xff] }
 0x33b   : > { %v2781_v21 = vpop.f32.mrb[34].mxu0 }
 0x33c   : > { %v7362_v28 = vadd.f32 %v2781_v21, %v8625_v14  ;;  %v2783_v40 = vpop.f32.mrb[35].mxu0  ;;  %v8635_v14 = vld [vmem:[#allocation35_spill] sm:$0xff] }
 0x33d   : > { %v7365_v33 = vadd.f32 %v2783_v40, %v8626_v62 }
 0x33f   : > { %v2787_v10 = vpop.f32.mrb[36].mxu0 }
 0x340   : > { %v7368_v36 = vadd.f32 %v2787_v10, %v8627_v55  ;;  %v2789_v24 = vpop.f32.mrb[37].mxu0  ;;  %v8636_v10 = vld [vmem:[#allocation42_spill] sm:$0xff] }
 0x341   : > { %v7371_v32 = vadd.f32 %v2789_v24, %v8628_v2  ;;  %v8637_v2 = vld [vmem:[#allocation37_spill] sm:$0xff] }
 0x343   : > { %v2793_v63 = vpop.f32.mrb[38].mxu0 }
 0x344   : > { %v7374_v46 = vadd.f32 %v2793_v63, %v8629_v3  ;;  %v2795_v49 = vpop.f32.mrb[39].mxu0 }
 0x345   : > { %v7377_v9 = vadd.f32 %v2795_v49, %v8630_v13  ;;  %v8638_v49 = vld [vmem:[#allocation44_spill] sm:$0xff] }
 0x347   : > { %v2799_v5 = vpop.f32.mrb[40].mxu0 }
 0x348   : > { %v7380_v57 = vadd.f32 %v2799_v5, %v8631_v23  ;;  %v2801_v20 = vpop.f32.mrb[41].mxu0  ;;  %v8640_v23 = vld [vmem:[#allocation39_spill] sm:$0xff] }
 0x349   : > { %v7383_v47 = vadd.f32 %v2801_v20, %v8632_v8 }
 0x34b   : > { %v2805_v12 = vpop.f32.mrb[42].mxu0 }
 0x34c   : > { %v7386_v52 = vadd.f32 %v2805_v12, %v8633_v15  ;;  %v2807_v4 = vpop.f32.mrb[43].mxu0  ;;  %v8642_v12 = vld [vmem:[#allocation45_spill] sm:$0xff] }
 0x34d   : > { %v7389_v18 = vadd.f32 %v2807_v4, %v8634_v54  ;;  %v8644_v54 = vld [vmem:[#allocation41_spill] sm:$0xff] }
 0x34f   : > { %v2811_v21 = vpop.f32.mrb[44].mxu0 }
 0x350   : > { %v7392_v40 = vadd.f32 %v2811_v21, %v8635_v14  ;;  %v2813_v62 = vpop.f32.mrb[45].mxu0 }
 0x351   : > { %v7395_v55 = vadd.f32 %v2813_v62, %v8636_v10  ;;  %v8646_v62 = vld [vmem:[#allocation46_spill] sm:$0xff] }
 0x353   : > { %v2817_v24 = vpop.f32.mrb[46].mxu0 }
 0x354   : > { %v7398_v63 = vadd.f32 %v2817_v24, %v8637_v2  ;;  %v2819_v3 = vpop.f32.mrb[47].mxu0  ;;  %v8648_v2 = vld [vmem:[#allocation43_spill] sm:$0xff] }
 0x355   : > { %v7401_v13 = vadd.f32 %v2819_v3, %v8638_v49 }
 0x357   : > { %8639 = vst [vmem:[#allocation59_spill] sm:$0xff] %v7401_v13  ;;  %v2823_v5 = vpop.f32.mrb[48].mxu0  ;;  %v8650_v13 = vld [vmem:[#allocation47_spill] sm:$0xff] }
 0x358   : > { %v7404_v20 = vadd.f32 %v2823_v5, %v8640_v23  ;;  %v2825_v8 = vpop.f32.mrb[49].mxu0 }
 0x359   : > { %v7407_v15 = vadd.f32 %v2825_v8, %v8642_v12 }
 0x35a   : > { %8641 = vst [vmem:[#allocation58_spill] sm:$0xff] %v7404_v20  ;;  %v8652_v20 = vld [vmem:[#allocation48_spill] sm:$0xff] }
 0x35b   : > { %8643 = vst [vmem:[#allocation61_spill] sm:$0xff] %v7407_v15  ;;  %v2829_v4 = vpop.f32.mrb[50].mxu0  ;;  %v8653_v15 = vld [vmem:[#allocation49_spill] sm:$0xff] }
 0x35c   : > { %v7410_v21 = vadd.f32 %v2829_v4, %v8644_v54  ;;  %v2831_v14 = vpop.f32.mrb[51].mxu0 }
 0x35d   : > { %v7413_v10 = vadd.f32 %v2831_v14, %v8646_v62 }
 0x35e   : > { %8645 = vst [vmem:[#allocation60_spill] sm:$0xff] %v7410_v21  ;;  %v8655_v21 = vld [vmem:[#allocation50_spill] sm:$0xff] }
 0x35f   : > { %8647 = vst [vmem:[#allocation63_spill] sm:$0xff] %v7413_v10  ;;  %v2835_v24 = vpop.f32.mrb[52].mxu0  ;;  %v8656_v10 = vld [vmem:[#allocation51_spill] sm:$0xff] }
 0x360   : > { %v7416_v3 = vadd.f32 %v2835_v24, %v8648_v2  ;;  %v2837_v49 = vpop.f32.mrb[53].mxu0 }
 0x361   : > { %v7419_v5 = vadd.f32 %v2837_v49, %v8650_v13 }
 0x362   : > { %8649 = vst [vmem:[#allocation62_spill] sm:$0xff] %v7416_v3  ;;  %v8657_v3 = vld [vmem:[#allocation52_spill] sm:$0xff] }
 0x363   : > { %8651 = vst [vmem:[#allocation65_spill] sm:$0xff] %v7419_v5  ;;  %v2841_v23 = vpop.f32.mrb[54].mxu0  ;;  %v8658_v5 = vld [vmem:[#allocation53_spill] sm:$0xff] }
 0x364   : > { %v7422_v8 = vadd.f32 %v2841_v23, %v8652_v20  ;;  %v2843_v12 = vpop.f32.mrb[55].mxu0 }
 0x365   : > { %v7425_v4 = vadd.f32 %v2843_v12, %v8653_v15  ;;  %v3255_v15 = vmul.f32 %v7268_v29, %v7268_v29  ;;  %v8659_v12 = vld [vmem:[#allocation54_spill] sm:$0xff]  ;;  %v7457_v29 = vmul.f32 %v7281_v56, %v7281_v56  ;;  %v7477_v56 = vmul.f32 %v7296_v31, %v7296_v31 }
 0x366   : > { %v7497_v31 = vmul.f32 %v7312_v44, %v7312_v44  ;;  %v7519_v44 = vmul.f32 %v7324_v16, %v7324_v16  ;;  %v7539_v16 = vmul.f32 %v7337_v7, %v7337_v7  ;;  %v7559_v7 = vmul.f32 %v7347_v59, %v7347_v59 }
 0x367   : > { %8654 = vst [vmem:[#allocation64_spill] sm:$0xff] %v7425_v4  ;;  %v2847_v54 = vpop.f32.mrb[56].mxu0  ;;  %v7579_v59 = vmul.f32 %v7359_v6, %v7359_v6 }
 0x368   : > { %v7428_v14 = vadd.f32 %v2847_v54, %v8655_v21  ;;  %v2849_v62 = vpop.f32.mrb[57].mxu0  ;;  %v3257_v54 = vmul.f32 %v7274_v42, %v7274_v42  ;;  %v7469_v42 = vmul.f32 %v7290_v39, %v7290_v39  ;;  %v7489_v39 = vmul.f32 %v7306_v37, %v7306_v37 }
 0x369   : > { %v7431_v24 = vadd.f32 %v2849_v62, %v8656_v10  ;;  %v3256_v10 = vmul.f32 %v7270_v41, %v7270_v41  ;;  %v7465_v41 = vmul.f32 %v7287_v19, %v7287_v19  ;;  %v7485_v19 = vmul.f32 %v7302_v45, %v7302_v45 }
 0x36a   : > { %v7504_v45 = vmul.f32 %v7314_v43, %v7314_v43  ;;  %v7508_v37 = vmul.f32 %v7318_v17, %v7318_v17  ;;  %v7527_v43 = vmul.f32 %v7330_v50, %v7330_v50  ;;  %v7531_v17 = vmul.f32 %v7332_v38, %v7332_v38 }
 0x36b   : > { %v2853_v2 = vpop.f32.mrb[58].mxu0  ;;  %v7547_v50 = vmul.f32 %v7341_v11, %v7341_v11  ;;  %v7551_v38 = vmul.f32 %v7343_v61, %v7343_v61  ;;  %v7567_v11 = vmul.f32 %v7351_v25, %v7351_v25  ;;  %v7571_v61 = vmul.f32 %v7353_v27, %v7353_v27 }
 0x36c   : > { %v7434_v13 = vadd.f32 %v2853_v2, %v8657_v3  ;;  %v2855_v49 = vpop.f32.mrb[59].mxu0  ;;  %v7450_v3 = vmul.f32 %v7277_v53, %v7277_v53  ;;  %v7461_v2 = vmul.f32 %v7283_v26, %v7283_v26  ;;  %v7473_v53 = vmul.f32 %v7294_v48, %v7294_v48 }
 0x36d   : > { %v7437_v20 = vadd.f32 %v2855_v49, %v8658_v5  ;;  %v8660_v5 = vld [vmem:[#allocation55_spill] sm:$0xff]  ;;  %v7481_v26 = vmul.f32 %v7300_v34, %v7300_v34  ;;  %v7493_v48 = vmul.f32 %v7308_v35, %v7308_v35  ;;  %v7512_v35 = vmul.f32 %v7320_v1, %v7320_v1 }
 0x36e   : > { %v7535_v1 = vmul.f32 %v7335_v51, %v7335_v51  ;;  %v7555_v51 = vmul.f32 %v7345_v30, %v7345_v30  ;;  %v7589_v25 = vmul.f32 %v7365_v33, %v7365_v33  ;;  %v7593_v27 = vmul.f32 %v7368_v36, %v7368_v36 }
 0x36f   : > { %v2859_v23 = vpop.f32.mrb[60].mxu0 }
 0x370   : > { %v7442_v4 = vadd.f32 %v2859_v23, %v8659_v12  ;;  %v2861_v21 = vpop.f32.mrb[61].mxu0  ;;  %v8661_v23 = vld [vmem:[#allocation56_spill] sm:$0xff] }
 0x371   : > { %v7453_v62 = vadd.f32 %v2861_v21, %v8660_v5  ;;  %v8663_v21 = vld [vmem:[#allocation57_spill] sm:$0xff] }
 0x373   : > { %v2865_v49 = vpop.f32.mrb[62].mxu0 }
 0x374   : > { %v7500_v34 = vadd.f32 %v2865_v49, %v8661_v23  ;;  %v2867_v12 = vpop.f32.mrb[63].mxu0  ;;  %v7523_v49 = vmul.f32 %v7326_v58, %v7326_v58  ;;  %v7543_v58 = vmul.f32 %v7339_v60, %v7339_v60 }
 0x375   : > { %v7515_v5 = vadd.f32 %v2867_v12, %v8663_v21  ;;  %v7563_v21 = vmul.f32 %v7349_v0, %v7349_v0  ;;  %v7583_v0 = vmul.f32 %v7362_v28, %v7362_v28  ;;  %v7603_v28 = vmul.f32 %v7374_v46, %v7374_v46 }
 0x376   : > { %8662 = vst [vmem:[#allocation67_spill] sm:$0xff] %v7500_v34  ;;  %v7621_v46 = vmul.f32 %v7386_v52, %v7386_v52  ;;  %v8667_v52 = vld [vmem:[#allocation59_spill] sm:$0xff] }
 0x377   : > { %8664 = vst [vmem:[#allocation66_spill] sm:$0xff] %v7515_v5  ;;  %v2936_v23 = vpop.f32.mrb[32].mxu1  ;;  %v7575_v5 = vmul.f32 %v7356_v22, %v7356_v22  ;;  %v7597_v22 = vmul.f32 %v7371_v32, %v7371_v32  ;;  %v7616_v32 = vmul.f32 %v7383_v47, %v7383_v47  ;;  %v7635_v47 = vmul.f32 %v7395_v55, %v7395_v55 }
 0x378   : > { %v3319_v12 = vmul.f32 %v2936_v23, %v2936_v23  ;;  %v2938_v60 = vpop.f32.mrb[33].mxu1 }
 0x379   : > { %v3320_v30 = vmul.f32 %v2938_v60, %v2938_v60  ;;  %8666 = vst [vmem:[#allocation68_spill] sm:$0xff] %v7635_v47 }
 0x37a   : > { %v7585_v23 = vadd.f32 %v3319_v12, %v3255_v15  ;;  %v7607_v15 = vmul.f32 %v7377_v9, %v7377_v9  ;;  %v7612_v12 = vmul.f32 %v7380_v57, %v7380_v57  ;;  %v7625_v9 = vmul.f32 %v7389_v18, %v7389_v18 }
 0x37b   : > { %v7599_v6 = vadd.f32 %v3320_v30, %v3256_v10  ;;  %v2942_v60 = vpop.f32.mrb[34].mxu1  ;;  %v7629_v30 = vmul.f32 %v7392_v40, %v7392_v40  ;;  %v8669_v40 = vld [vmem:[#allocation58_spill] sm:$0xff] }
 0x37c   : > { %5336 = vrsqrt.f32 %v7585_v23  ;;  %v3321_v33 = vmul.f32 %v2942_v60, %v2942_v60  ;;  %v2944_v36 = vpop.f32.mrb[35].mxu1  ;;  %v7639_v60 = vmul.f32 %v7398_v63, %v7398_v63  ;;  %v8673_v63 = vld [vmem:[#allocation60_spill] sm:$0xff]  ;;  %vm3449_vm3 = vcmp.eq.f32.partialorder %v7585_v23, inf }
 0x37d   : > { %v3322_v10 = vmul.f32 %v2944_v36, %v2944_v36  ;;  %5338 = vrsqrt.f32 %v7599_v6  ;;  %8665 = vst [vmem:[#allocation69_spill] sm:$0xff] %v7629_v30  ;;  %v7643_v36 = vmul.f32 %v8667_v52, %v8667_v52  ;;  %v7659_v52 = vmul.f32 %v8673_v63, %v8673_v63 }
 0x37e   : > { %v7631_v57 = vadd.f32 %v3321_v33, %v3257_v54  ;;  %v7650_v54 = vmul.f32 %v8669_v40, %v8669_v40  ;;  %v8671_v33 = vld [vmem:[#allocation61_spill] sm:$0xff]  ;;  %v8676_v40 = vld [vmem:[#allocation62_spill] sm:$0xff]  ;;  %vm3456_vm4 = vcmp.eq.f32.partialorder %v7599_v6, inf  ;;  %vm3458_vm5 = vcmp.eq.f32.partialorder %v7599_v6, 0.0 }
 0x37f   : > { %8668 = vst [vmem:[#allocation71_spill] sm:$0xff] %v7643_v36  ;;  %v7646_v18 = vadd.f32 %v3322_v10, %v7450_v3  ;;  %v2948_v34 = vpop.f32.mrb[36].mxu1  ;;  %v7654_v55 = vmul.f32 %v8671_v33, %v8671_v33  ;;  %v8674_v36 = vld [vmem:[#allocation63_spill] sm:$0xff]  ;;  %v8678_v33 = vld [vmem:[#allocation65_spill] sm:$0xff]  ;;  %vm3451_vm6 = vcmp.eq.f32.partialorder %v7585_v23, 0.0 }
 0x380   : > { %8670 = vst [vmem:[#allocation70_spill] sm:$0xff] %v7650_v54  ;;  %v3323_v47 = vmul.f32 %v2948_v34, %v2948_v34  ;;  %v2950_v30 = vpop.f32.mrb[37].mxu1  ;;  %5340 = vrsqrt.f32 %v7631_v57  ;;  %v7663_v3 = vmul.f32 %v8674_v36, %v8674_v36  ;;  %v7668_v54 = vmul.f32 %v8676_v40, %v8676_v40  ;;  %v8681_v36 = vld [vmem:[#allocation64_spill] sm:$0xff] }
 0x381   : > { %8672 = vst [vmem:[#allocation72_spill] sm:$0xff] %v7654_v55  ;;  %v3324_v10 = vmul.f32 %v2950_v30, %v2950_v30  ;;  %5342 = vrsqrt.f32 %v7646_v18  ;;  %v7672_v34 = vmul.f32 %v8678_v33, %v8678_v33  ;;  %v7676_v55 = vmul.f32 %v7422_v8, %v7422_v8 }
 0x382   : > { %8675 = vst [vmem:[#allocation26_spill] sm:$0xff] %v7663_v3  ;;  %8677 = vst [vmem:[#allocation30_spill] sm:$0xff] %v7668_v54  ;;  %v7679_v63 = vadd.f32 %v3323_v47, %v7457_v29  ;;  %v7683_v30 = vmul.f32 %v8681_v36, %v8681_v36  ;;  %v7687_v3 = vmul.f32 %v7428_v14, %v7428_v14  ;;  %vm3463_vm7 = vcmp.eq.f32.partialorder %v7631_v57, inf }
 0x383   : > { %8679 = vst [vmem:[#allocation27_spill] sm:$0xff] %v7672_v34  ;;  %8680 = vst [vmem:[#allocation32_spill] sm:$0xff] %v7676_v55  ;;  %v7691_v40 = vmul.f32 %v7431_v24, %v7431_v24  ;;  %v7694_v33 = vadd.f32 %v3324_v10, %v7461_v2  ;;  %v2954_v8 = vpop.f32.mrb[38].mxu1  ;;  %v7698_v29 = vmul.f32 %v7434_v13, %v7434_v13  ;;  %vm3465_vm8 = vcmp.eq.f32.partialorder %v7631_v57, 0.0 }
 0x384   : > { %8682 = vst [vmem:[#allocation28_spill] sm:$0xff] %v7683_v30  ;;  %8683 = vst [vmem:[#allocation34_spill] sm:$0xff] %v7687_v3  ;;  %v7702_v47 = vmul.f32 %v7437_v20, %v7437_v20  ;;  %v3325_v36 = vmul.f32 %v2954_v8, %v2954_v8  ;;  %v2956_v30 = vpop.f32.mrb[39].mxu1  ;;  %5344 = vrsqrt.f32 %v7679_v63  ;;  %v7707_v14 = vmul.f32 %v7442_v4, %v7442_v4 }
 0x385   : > { %8684 = vst [vmem:[#allocation29_spill] sm:$0xff] %v7691_v40  ;;  %8685 = vst [vmem:[#allocation36_spill] sm:$0xff] %v7698_v29  ;;  %v3326_v24 = vmul.f32 %v2956_v30, %v2956_v30  ;;  %5346 = vrsqrt.f32 %v7694_v33  ;;  %v3459_v30 = vand.u32 2147483648, %v7599_v6  ;;  %vm3470_vm9 = vcmp.eq.f32.partialorder %v7646_v18, inf }
 0x386   : > { %8686 = vst [vmem:[#allocation31_spill] sm:$0xff] %v7702_v47  ;;  %8687 = vst [vmem:[#allocation38_spill] sm:$0xff] %v7707_v14  ;;  %v5337_v2 = vpop.eup %5336  ;;  %v7712_v13 = vadd.f32 %v3325_v36, %v7465_v41  ;;  %v3452_v14 = vand.u32 2147483648, %v7585_v23  ;;  %vm3472_vm10 = vcmp.eq.f32.partialorder %v7646_v18, 0.0  ;;  %v3473_v3 = vand.u32 2147483648, %v7646_v18 }
 0x387   : > { %v5339_v20 = vpop.eup %5338  ;;  %v7718_v10 = vadd.f32 %v3326_v24, %v7469_v42  ;;  %v2960_v4 = vpop.f32.mrb[40].mxu1  ;;  %v3448_v8 = vmul.f32 %v5337_v2, %v7585_v23  ;;  %v3466_v54 = vand.u32 2147483648, %v7631_v57  ;;  %vm3477_vm11 = vcmp.eq.f32.partialorder %v7679_v63, inf }
 0x388   : > { %v3327_v47 = vmul.f32 %v2960_v4, %v2960_v4  ;;  %v2962_v41 = vpop.f32.mrb[41].mxu1  ;;  %v3455_v36 = vmul.f32 %v5339_v20, %v7599_v6  ;;  %5348 = vrsqrt.f32 %v7712_v13  ;;  %vm3484_vm12 = vcmp.eq.f32.partialorder %v7694_v33, inf }
 0x389   : > { %v3328_v29 = vmul.f32 %v2962_v41, %v2962_v41  ;;  %v3450_v42 = vsel %vm3449_vm3, %v7585_v23, %v3448_v8  ;;  %5350 = vrsqrt.f32 %v7718_v10  ;;  %vm3479_vm13 = vcmp.eq.f32.partialorder %v7679_v63, 0.0 }
 0x38a   : > { %v5341_v24 = vpop.eup %5340  ;;  %v7732_v2 = vadd.f32 %v3327_v47, %v7473_v53  ;;  %v3457_v20 = vsel %vm3456_vm4, %v7599_v6, %v3455_v36  ;;  %v3453_v36 = vsel %vm3451_vm6, %v3452_v14, %v3450_v42  ;;  %vm3486_vm14 = vcmp.eq.f32.partialorder %v7694_v33, 0.0 }
 0x38b   : > { %v5343_v4 = vpop.eup %5342  ;;  %v7740_v41 = vadd.f32 %v3328_v29, %v7477_v56  ;;  %v2966_v8 = vpop.f32.mrb[42].mxu1  ;;  %v3460_v40 = vsel %vm3458_vm5, %v3459_v30, %v3457_v20  ;;  %v3462_v53 = vmul.f32 %v5341_v24, %v7631_v57  ;;  %vm3491_vm15 = vcmp.eq.f32.partialorder %v7712_v13, inf }
 0x38c   : > { %v3329_v47 = vmul.f32 %v2966_v8, %v2966_v8  ;;  %v2968_v55 = vpop.f32.mrb[43].mxu1  ;;  %3991 = vmatprep.mubr.f32.mxu0 %v3460_v40  ;;  %v3469_v34 = vmul.f32 %v5343_v4, %v7646_v18  ;;  %v3487_v8 = vand.u32 2147483648, %v7694_v33  ;;  %vm3498_vm0 = vcmp.eq.f32.partialorder %v7718_v10, inf }
 0x38d   : > { %v3330_v56 = vmul.f32 %v2968_v55, %v2968_v55  ;;  %3992 = vmatmul.mubr.f32.vlgmr.msra.gmra.mrb[64].mxu0 %v3453_v36  ;;  %v3464_v6 = vsel %vm3463_vm7, %v7631_v57, %v3462_v53  ;;  %5352 = vrsqrt.f32 %v7740_v41  ;;  %vm3500_vm1 = vcmp.eq.f32.partialorder %v7718_v10, 0.0 }
 0x38e   : > { %v5345_v29 = vpop.eup %5344  ;;  %v7756_v40 = vadd.f32 %v3329_v47, %v7481_v26  ;;  %v3471_v23 = vsel %vm3470_vm9, %v7646_v18, %v3469_v34  ;;  %v3467_v34 = vsel %vm3465_vm8, %v3466_v54, %v3464_v6  ;;  %5354 = vrsqrt.f32 %v7732_v2 }
 0x38f   : > { %v5347_v55 = vpop.eup %5346  ;;  %v7764_v14 = vadd.f32 %v3330_v56, %v7485_v19  ;;  %v2972_v30 = vpop.f32.mrb[44].mxu1  ;;  %v3474_v42 = vsel %vm3472_vm10, %v3473_v3, %v3471_v23  ;;  %v3476_v26 = vmul.f32 %v5345_v29, %v7679_v63  ;;  %v3480_v3 = vand.u32 2147483648, %v7679_v63 }
 0x390   : > { %v3331_v24 = vmul.f32 %v2972_v30, %v2972_v30  ;;  %v2974_v20 = vpop.f32.mrb[45].mxu1  ;;  %3996 = vmatprep.mubr.f32.mxu0 %v3474_v42  ;;  %v3483_v4 = vmul.f32 %v5347_v55, %v7694_v33  ;;  %v3501_v42 = vand.u32 2147483648, %v7718_v10  ;;  %vm3493_vm2 = vcmp.eq.f32.partialorder %v7712_v13, 0.0 }
 0x391   : > { %v3332_v19 = vmul.f32 %v2974_v20, %v2974_v20  ;;  %3997 = vmatmul.mubr.f32.gmra.mrb[66].mxu0 %v3467_v34  ;;  %v3478_v18 = vsel %vm3477_vm11, %v7679_v63, %v3476_v26  ;;  %5356 = vrsqrt.f32 %v7764_v14  ;;  %vm3512_vm3 = vcmp.eq.f32.partialorder %v7740_v41, inf }
 0x392   : > { %v5349_v53 = vpop.eup %5348  ;;  %v7780_v47 = vadd.f32 %v3331_v24, %v7489_v39  ;;  %v3485_v57 = vsel %vm3484_vm12, %v7694_v33, %v3483_v4  ;;  %v3481_v55 = vsel %vm3479_vm13, %v3480_v3, %v3478_v18  ;;  %5358 = vrsqrt.f32 %v7756_v40 }
 0x393   : > { %v5351_v54 = vpop.eup %5350  ;;  %v7788_v36 = vadd.f32 %v3332_v19, %v7493_v48  ;;  %v2978_v56 = vpop.f32.mrb[46].mxu1  ;;  %v3488_v6 = vsel %vm3486_vm14, %v3487_v8, %v3485_v57  ;;  %v3490_v39 = vmul.f32 %v5349_v53, %v7712_v13  ;;  %v3494_v24 = vand.u32 2147483648, %v7712_v13 }
 0x394   : > { %v3333_v29 = vmul.f32 %v2978_v56, %v2978_v56  ;;  %v2980_v23 = vpop.f32.mrb[47].mxu1  ;;  %4001 = vmatprep.mubr.f32.mxu0 %v3488_v6  ;;  %v3497_v30 = vmul.f32 %v5351_v54, %v7718_v10  ;;  %vm3514_vm4 = vcmp.eq.f32.partialorder %v7740_v41, 0.0  ;;  %vm3505_vm5 = vcmp.eq.f32.partialorder %v7732_v2, inf }
 0x395   : > { %v3334_v48 = vmul.f32 %v2980_v23, %v2980_v23  ;;  %4002 = vmatmul.mubr.f32.gmra.mrb[68].mxu0 %v3481_v55  ;;  %v3492_v33 = vsel %vm3491_vm15, %v7712_v13, %v3490_v39  ;;  %5360 = vrsqrt.f32 %v7788_v36  ;;  %v3515_v13 = vand.u32 2147483648, %v7740_v41 }
 0x396   : > { %v7804_v26 = vadd.f32 %v3333_v29, %v7497_v31  ;;  %v3499_v63 = vsel %vm3498_vm0, %v7718_v10, %v3497_v30  ;;  %v3495_v31 = vsel %vm3493_vm2, %v3494_v24, %v3492_v33  ;;  %5362 = vrsqrt.f32 %v7780_v47 }
 0x397   : > { %v5353_v20 = vpop.eup %5352  ;;  %v7810_v34 = vadd.f32 %v3334_v48, %v7504_v45  ;;  %v2984_v4 = vpop.f32.mrb[48].mxu1  ;;  %v3502_v19 = vsel %vm3500_vm1, %v3501_v42, %v3499_v63  ;;  %vm3507_vm6 = vcmp.eq.f32.partialorder %v7732_v2, 0.0  ;;  %v3508_v54 = vand.u32 2147483648, %v7732_v2 }
 0x398   : > { %v3335_v8 = vmul.f32 %v2984_v4, %v2984_v4  ;;  %v2986_v18 = vpop.f32.mrb[49].mxu1  ;;  %4006 = vmatprep.mubr.f32.mxu0 %v3502_v19  ;;  %v3511_v10 = vmul.f32 %v5353_v20, %v7740_v41  ;;  %v5355_v45 = vpop.eup %5354  ;;  %vm3526_vm7 = vcmp.eq.f32.partialorder %v7764_v14, inf  ;;  %vm3528_vm8 = vcmp.eq.f32.partialorder %v7764_v14, 0.0 }
 0x399   : > { %v3336_v3 = vmul.f32 %v2986_v18, %v2986_v18  ;;  %4007 = vmatmul.mubr.f32.gmra.mrb[70].mxu0 %v3495_v31  ;;  %v3504_v29 = vmul.f32 %v5355_v45, %v7732_v2  ;;  %5364 = vrsqrt.f32 %v7810_v34  ;;  %vm3519_vm9 = vcmp.eq.f32.partialorder %v7756_v40, inf }
 0x39a   : > { %v7820_v53 = vadd.f32 %v3335_v8, %v7508_v37  ;;  %v3513_v57 = vsel %vm3512_vm3, %v7740_v41, %v3511_v10  ;;  %v3529_v37 = vand.u32 2147483648, %v7764_v14  ;;  %5366 = vrsqrt.f32 %v7804_v26 }
 0x39b   : > { %v7826_v56 = vadd.f32 %v3336_v3, %v7512_v35  ;;  %v2990_v6 = vpop.f32.mrb[50].mxu1  ;;  %v3516_v39 = vsel %vm3514_vm4, %v3515_v13, %v3513_v57  ;;  %v5357_v23 = vpop.eup %5356  ;;  %v3506_v35 = vsel %vm3505_vm5, %v7732_v2, %v3504_v29  ;;  %vm3521_vm10 = vcmp.eq.f32.partialorder %v7756_v40, 0.0 }
 0x39c   : > { %v3337_v55 = vmul.f32 %v2990_v6, %v2990_v6  ;;  %v2992_v30 = vpop.f32.mrb[51].mxu1  ;;  %4011 = vmatprep.mubr.f32.mxu0 %v3516_v39  ;;  %v3525_v48 = vmul.f32 %v5357_v23, %v7764_v14  ;;  %v3509_v33 = vsel %vm3507_vm6, %v3508_v54, %v3506_v35  ;;  %v5359_v63 = vpop.eup %5358  ;;  %v3522_v19 = vand.u32 2147483648, %v7756_v40 }
 0x39d   : > { %v3338_v41 = vmul.f32 %v2992_v30, %v2992_v30  ;;  %4012 = vmatmul.mubr.f32.gmra.mrb[72].mxu0 %v3509_v33  ;;  %5368 = vrsqrt.f32 %v7826_v56  ;;  %v3518_v18 = vmul.f32 %v5359_v63, %v7756_v40  ;;  %vm3540_vm11 = vcmp.eq.f32.partialorder %v7788_v36, inf }
 0x39e   : > { %v7839_v42 = vadd.f32 %v3337_v55, %v7519_v44  ;;  %v3527_v4 = vsel %vm3526_vm7, %v7764_v14, %v3525_v48  ;;  %vm3542_vm12 = vcmp.eq.f32.partialorder %v7788_v36, 0.0  ;;  %v3543_v10 = vand.u32 2147483648, %v7788_v36 }
 0x39f   : > { %v7846_v24 = vadd.f32 %v3338_v41, %v7523_v49  ;;  %v2996_v20 = vpop.f32.mrb[52].mxu1  ;;  %v3530_v2 = vsel %vm3528_vm8, %v3529_v37, %v3527_v4  ;;  %v5361_v31 = vpop.eup %5360  ;;  %5370 = vrsqrt.f32 %v7820_v53  ;;  %v3520_v14 = vsel %vm3519_vm9, %v7756_v40, %v3518_v18 }
 0x3a0   : > { %v3339_v44 = vmul.f32 %v2996_v20, %v2996_v20  ;;  %v2998_v8 = vpop.f32.mrb[53].mxu1  ;;  %4016 = vmatprep.mubr.f32.mxu0 %v3530_v2  ;;  %v3539_v13 = vmul.f32 %v5361_v31, %v7788_v36  ;;  %vm3533_vm13 = vcmp.eq.f32.partialorder %v7780_v47, inf  ;;  %v5363_v45 = vpop.eup %5362  ;;  %v3523_v54 = vsel %vm3521_vm10, %v3522_v19, %v3520_v14 }
 0x3a1   : > { %v3340_v49 = vmul.f32 %v2998_v8, %v2998_v8  ;;  %vm3535_vm14 = vcmp.eq.f32.partialorder %v7780_v47, 0.0  ;;  %4017 = vmatmul.mubr.f32.gmra.mrb[74].mxu0 %v3523_v54  ;;  %v3532_v55 = vmul.f32 %v5363_v45, %v7780_v47  ;;  %5372 = vrsqrt.f32 %v7846_v24 }
 0x3a2   : > { %v7859_v3 = vadd.f32 %v3339_v44, %v7527_v43  ;;  %v3536_v43 = vand.u32 2147483648, %v7780_v47  ;;  %v3541_v23 = vsel %vm3540_vm11, %v7788_v36, %v3539_v13  ;;  %vm3554_vm15 = vcmp.eq.f32.partialorder %v7810_v34, inf }
 0x3a3   : > { %v7867_v57 = vadd.f32 %v3340_v49, %v7531_v17  ;;  %v3002_v6 = vpop.f32.mrb[54].mxu1  ;;  %v5365_v17 = vpop.eup %5364  ;;  %v3544_v40 = vsel %vm3542_vm12, %v3543_v10, %v3541_v23  ;;  %vm3556_vm0 = vcmp.eq.f32.partialorder %v7810_v34, 0.0  ;;  %v3534_v41 = vsel %vm3533_vm13, %v7780_v47, %v3532_v55 }
 0x3a4   : > { %v3341_v39 = vmul.f32 %v3002_v6, %v3002_v6  ;;  %v3004_v29 = vpop.f32.mrb[55].mxu1  ;;  %4021 = vmatprep.mubr.f32.mxu0 %v3544_v40  ;;  %v3553_v35 = vmul.f32 %v5365_v17, %v7810_v34  ;;  %v3557_v48 = vand.u32 2147483648, %v7810_v34  ;;  %v5367_v33 = vpop.eup %5366  ;;  %v3537_v63 = vsel %vm3535_vm14, %v3536_v43, %v3534_v41 }
 0x3a5   : > { %v3342_v30 = vmul.f32 %v3004_v29, %v3004_v29  ;;  %vm3547_vm1 = vcmp.eq.f32.partialorder %v7804_v26, inf  ;;  %5374 = vrsqrt.f32 %v7839_v42  ;;  %4022 = vmatmul.mubr.f32.gmra.mrb[76].mxu0 %v3537_v63  ;;  %v3546_v44 = vmul.f32 %v5367_v33, %v7804_v26 }
 0x3a6   : > { %v7883_v37 = vadd.f32 %v3341_v39, %v7535_v1  ;;  %v3555_v19 = vsel %vm3554_vm15, %v7810_v34, %v3553_v35  ;;  %vm3549_vm2 = vcmp.eq.f32.partialorder %v7804_v26, 0.0  ;;  %v3550_v2 = vand.u32 2147483648, %v7804_v26 }
 0x3a7   : > { %v7891_v36 = vadd.f32 %v3342_v30, %v7539_v16  ;;  %v3008_v20 = vpop.f32.mrb[56].mxu1  ;;  %v5369_v16 = vpop.eup %5368  ;;  %v3558_v47 = vsel %vm3556_vm0, %v3557_v48, %v3555_v19  ;;  %5376 = vrsqrt.f32 %v7867_v57  ;;  %v3548_v31 = vsel %vm3547_vm1, %v7804_v26, %v3546_v44 }
 0x3a8   : > { %v3343_v1 = vmul.f32 %v3008_v20, %v3008_v20  ;;  %v3010_v4 = vpop.f32.mrb[57].mxu1  ;;  %4026 = vmatprep.mubr.f32.mxu0 %v3558_v47  ;;  %v3567_v49 = vmul.f32 %v5369_v16, %v7826_v56  ;;  %vm3568_vm3 = vcmp.eq.f32.partialorder %v7826_v56, inf  ;;  %v3551_v34 = vsel %vm3549_vm2, %v3550_v2, %v3548_v31 }
 0x3a9   : > { %v3344_v8 = vmul.f32 %v3010_v4, %v3010_v4  ;;  %v5371_v10 = vpop.eup %5370  ;;  %vm3570_vm4 = vcmp.eq.f32.partialorder %v7826_v56, 0.0  ;;  %v3571_v45 = vand.u32 2147483648, %v7826_v56  ;;  %4027 = vmatmul.mubr.f32.gmra.mrb[78].mxu0 %v3551_v34  ;;  %5378 = vrsqrt.f32 %v7859_v3 }
 0x3aa   : > { %v7907_v18 = vadd.f32 %v3343_v1, %v7543_v58  ;;  %v3569_v6 = vsel %vm3568_vm3, %v7826_v56, %v3567_v49  ;;  %v3560_v26 = vmul.f32 %v5371_v10, %v7820_v53  ;;  %vm3561_vm5 = vcmp.eq.f32.partialorder %v7820_v53, inf }
 0x3ab   : > { %v7913_v14 = vadd.f32 %v3344_v8, %v7547_v50  ;;  %v3014_v13 = vpop.f32.mrb[58].mxu1  ;;  %v3572_v39 = vsel %vm3570_vm4, %v3571_v45, %v3569_v6  ;;  %v3564_v50 = vand.u32 2147483648, %v7820_v53  ;;  %v5373_v29 = vpop.eup %5372  ;;  %vm3563_vm6 = vcmp.eq.f32.partialorder %v7820_v53, 0.0 }
 0x3ac   : > { %v3345_v58 = vmul.f32 %v3014_v13, %v3014_v13  ;;  %v3016_v54 = vpop.f32.mrb[59].mxu1  ;;  %4031 = vmatprep.mubr.f32.mxu0 %v3572_v39  ;;  %v3562_v55 = vsel %vm3561_vm5, %v7820_v53, %v3560_v26  ;;  %5380 = vrsqrt.f32 %v7891_v36  ;;  %v7930_v56 = vmul.f32 %v7453_v62, %v7453_v62 }
 0x3ad   : > { %v3346_v43 = vmul.f32 %v3016_v54, %v3016_v54  ;;  %v3565_v30 = vsel %vm3563_vm6, %v3564_v50, %v3562_v55  ;;  %v3581_v41 = vmul.f32 %v5373_v29, %v7846_v24  ;;  %vm3582_vm7 = vcmp.eq.f32.partialorder %v7846_v24, inf }
 0x3ae   : > { %v7923_v23 = vadd.f32 %v3345_v58, %v7551_v38  ;;  %4032 = vmatmul.mubr.f32.gmra.mrb[80].mxu0 %v3565_v30  ;;  %v3585_v53 = vand.u32 2147483648, %v7846_v24  ;;  %5382 = vrsqrt.f32 %v7883_v37  ;;  %vm3584_vm8 = vcmp.eq.f32.partialorder %v7846_v24, 0.0 }
 0x3af   : > { %v7933_v17 = vadd.f32 %v3346_v43, %v7555_v51  ;;  %v3020_v40 = vpop.f32.mrb[60].mxu1  ;;  %v5375_v48 = vpop.eup %5374  ;;  %v3583_v62 = vsel %vm3582_vm7, %v7846_v24, %v3581_v41  ;;  %vm3575_vm9 = vcmp.eq.f32.partialorder %v7839_v42, inf  ;;  %vm3577_vm10 = vcmp.eq.f32.partialorder %v7839_v42, 0.0 }
 0x3b0   : > { %v3347_v38 = vmul.f32 %v3020_v40, %v3020_v40  ;;  %v3022_v35 = vpop.f32.mrb[61].mxu1  ;;  %v3586_v63 = vsel %vm3584_vm8, %v3585_v53, %v3583_v62  ;;  %v3574_v20 = vmul.f32 %v5375_v48, %v7839_v42  ;;  %v3578_v19 = vand.u32 2147483648, %v7839_v42 }
 0x3b1   : > { %v3348_v33 = vmul.f32 %v3022_v35, %v3022_v35  ;;  %v5377_v1 = vpop.eup %5376  ;;  %4036 = vmatprep.mubr.f32.mxu0 %v3586_v63  ;;  %vm3596_vm11 = vcmp.eq.f32.partialorder %v7867_v57, inf  ;;  %5384 = vrsqrt.f32 %v7913_v14  ;;  %vm3598_vm12 = vcmp.eq.f32.partialorder %v7867_v57, 0.0 }
 0x3b2   : > { %v7943_v51 = vadd.f32 %v3347_v38, %v7559_v7  ;;  %v3576_v7 = vsel %vm3575_vm9, %v7839_v42, %v3574_v20  ;;  %v3595_v8 = vmul.f32 %v5377_v1, %v7867_v57  ;;  %5386 = vrsqrt.f32 %v7907_v18 }
 0x3b3   : > { %v7948_v4 = vadd.f32 %v3348_v33, %v7563_v21  ;;  %v3026_v44 = vpop.f32.mrb[62].mxu1  ;;  %v3579_v47 = vsel %vm3577_vm10, %v3578_v19, %v3576_v7  ;;  %v3599_v21 = vand.u32 2147483648, %v7867_v57  ;;  %v5379_v31 = vpop.eup %5378  ;;  %vm3589_vm13 = vcmp.eq.f32.partialorder %v7859_v3, inf }
 0x3b4   : > { %v3349_v24 = vmul.f32 %v3026_v44, %v3026_v44  ;;  %v3028_v16 = vpop.f32.mrb[63].mxu1  ;;  %4037 = vmatmul.mubr.f32.gmra.mrb[82].mxu0 %v3579_v47  ;;  %v3597_v10 = vsel %vm3596_vm11, %v7867_v57, %v3595_v8  ;;  %vm3591_vm14 = vcmp.eq.f32.partialorder %v7859_v3, 0.0  ;;  %v3588_v13 = vmul.f32 %v5379_v31, %v7859_v3 }
 0x3b5   : > { %v3350_v2 = vmul.f32 %v3028_v16, %v3028_v16  ;;  %v3600_v34 = vsel %vm3598_vm12, %v3599_v21, %v3597_v10  ;;  %5388 = vrsqrt.f32 %v7933_v17  ;;  %vm3610_vm15 = vcmp.eq.f32.partialorder %v7891_v36, inf }
 0x3b6   : > { %v7959_v49 = vadd.f32 %v3349_v24, %v7567_v11  ;;  %v5381_v58 = vpop.eup %5380  ;;  %4041 = vmatprep.mubr.f32.mxu0 %v3600_v34  ;;  %v3592_v11 = vand.u32 2147483648, %v7859_v3  ;;  %vm3612_vm0 = vcmp.eq.f32.partialorder %v7891_v36, 0.0  ;;  %v3590_v57 = vsel %vm3589_vm13, %v7859_v3, %v3588_v13 }
 0x3b7   : > { %v7965_v42 = vadd.f32 %v3350_v2, %v7571_v61  ;;  %v3032_v45 = vpop.f32.mrb[64].mxu1  ;;  %v3609_v26 = vmul.f32 %v5381_v58, %v7891_v36  ;;  %5390 = vrsqrt.f32 %v7923_v23  ;;  %v3613_v29 = vand.u32 2147483648, %v7891_v36 }
 0x3b8   : > { %v3351_v54 = vmul.f32 %v3032_v45, %v3032_v45  ;;  %v3034_v6 = vpop.f32.mrb[65].mxu1  ;;  %v5383_v43 = vpop.eup %5382  ;;  %v3593_v39 = vsel %vm3591_vm14, %v3592_v11, %v3590_v57  ;;  %vm3603_vm1 = vcmp.eq.f32.partialorder %v7883_v37, inf  ;;  %vm3605_vm2 = vcmp.eq.f32.partialorder %v7883_v37, 0.0 }
 0x3b9   : > { %v3352_v61 = vmul.f32 %v3034_v6, %v3034_v6  ;;  %4042 = vmatmul.mubr.f32.gmra.mrb[84].mxu0 %v3593_v39  ;;  %v3611_v30 = vsel %vm3610_vm15, %v7891_v36, %v3609_v26  ;;  %v3602_v40 = vmul.f32 %v5383_v43, %v7883_v37  ;;  %5392 = vrsqrt.f32 %v7948_v4 }
 0x3ba   : > { %v7978_v50 = vadd.f32 %v3351_v54, %v7575_v5  ;;  %v3614_v3 = vsel %vm3612_vm0, %v3613_v29, %v3611_v30  ;;  %v3606_v5 = vand.u32 2147483648, %v7883_v37  ;;  %vm3624_vm3 = vcmp.eq.f32.partialorder %v7913_v14, inf }
 0x3bb   : > { %v7983_v55 = vadd.f32 %v3352_v61, %v7579_v59  ;;  %v3038_v41 = vpop.f32.mrb[66].mxu1  ;;  %v5385_v53 = vpop.eup %5384  ;;  %4046 = vmatprep.mubr.f32.mxu0 %v3614_v3  ;;  %v3604_v59 = vsel %vm3603_vm1, %v7883_v37, %v3602_v40  ;;  %vm3626_vm4 = vcmp.eq.f32.partialorder %v7913_v14, 0.0  ;;  %5394 = vrsqrt.f32 %v7943_v51 }
 0x3bc   : > { %v3353_v38 = vmul.f32 %v3038_v41, %v3038_v41  ;;  %v3040_v35 = vpop.f32.mrb[67].mxu1  ;;  %v3607_v33 = vsel %vm3605_vm2, %v3606_v5, %v3604_v59  ;;  %v3623_v36 = vmul.f32 %v5385_v53, %v7913_v14  ;;  %v5387_v63 = vpop.eup %5386  ;;  %v3627_v37 = vand.u32 2147483648, %v7913_v14 }
 0x3bd   : > { %v3354_v48 = vmul.f32 %v3040_v35, %v3040_v35  ;;  %4047 = vmatmul.mubr.f32.gmra.mrb[86].mxu0 %v3607_v33  ;;  %vm3617_vm5 = vcmp.eq.f32.partialorder %v7907_v18, inf  ;;  %vm3619_vm6 = vcmp.eq.f32.partialorder %v7907_v18, 0.0  ;;  %5396 = vrsqrt.f32 %v7965_v42 }
 0x3be   : > { %v7996_v62 = vadd.f32 %v3353_v38, %v7583_v0  ;;  %v3625_v19 = vsel %vm3624_vm3, %v7913_v14, %v3623_v36  ;;  %v3616_v0 = vmul.f32 %v5387_v63, %v7907_v18  ;;  %v3620_v16 = vand.u32 2147483648, %v7907_v18 }
 0x3bf   : > { %v8001_v20 = vadd.f32 %v3354_v48, %v7589_v25  ;;  %v3044_v1 = vpop.f32.mrb[68].mxu1  ;;  %v5389_v24 = vpop.eup %5388  ;;  %v3628_v25 = vsel %vm3626_vm4, %v3627_v37, %v3625_v19  ;;  %vm3638_vm7 = vcmp.eq.f32.partialorder %v7933_v17, inf  ;;  %vm3640_vm8 = vcmp.eq.f32.partialorder %v7933_v17, 0.0 }
 0x3c0   : > { %v3355_v44 = vmul.f32 %v3044_v1, %v3044_v1  ;;  %v3046_v7 = vpop.f32.mrb[69].mxu1  ;;  %4051 = vmatprep.mubr.f32.mxu0 %v3628_v25  ;;  %v3618_v47 = vsel %vm3617_vm5, %v7907_v18, %v3616_v0  ;;  %v3637_v21 = vmul.f32 %v5389_v24, %v7933_v17  ;;  %v3641_v34 = vand.u32 2147483648, %v7933_v17 }
 0x3c1   : > { %v3356_v8 = vmul.f32 %v3046_v7, %v3046_v7  ;;  %v5391_v31 = vpop.eup %5390  ;;  %v3621_v14 = vsel %vm3619_vm6, %v3620_v16, %v3618_v47  ;;  %5398 = vrsqrt.f32 %v7959_v49  ;;  %vm3631_vm9 = vcmp.eq.f32.partialorder %v7923_v23, inf }
 0x3c2   : > { %v8015_v2 = vadd.f32 %v3355_v44, %v7593_v27  ;;  %4052 = vmatmul.mubr.f32.gmra.mrb[88].mxu0 %v3621_v14  ;;  %v3639_v27 = vsel %vm3638_vm7, %v7933_v17, %v3637_v21  ;;  %v3630_v45 = vmul.f32 %v5391_v31, %v7923_v23  ;;  %v3634_v18 = vand.u32 2147483648, %v7923_v23 }
 0x3c3   : > { %v8022_v10 = vadd.f32 %v3356_v8, %v7597_v22  ;;  %v3050_v13 = vpop.f32.mrb[70].mxu1  ;;  %v3642_v54 = vsel %vm3640_vm8, %v3641_v34, %v3639_v27  ;;  %5400 = vrsqrt.f32 %v7983_v55  ;;  %v5393_v22 = vpop.eup %5392  ;;  %vm3633_vm10 = vcmp.eq.f32.partialorder %v7923_v23, 0.0 }
 0x3c4   : > { %v3357_v58 = vmul.f32 %v3050_v13, %v3050_v13  ;;  %v3052_v11 = vpop.f32.mrb[71].mxu1  ;;  %4056 = vmatprep.mubr.f32.mxu0 %v3642_v54  ;;  %v3632_v57 = vsel %vm3631_vm9, %v7923_v23, %v3630_v45  ;;  %vm3652_vm11 = vcmp.eq.f32.partialorder %v7948_v4, inf  ;;  %v3651_v43 = vmul.f32 %v5393_v22, %v7948_v4  ;;  %v8689_v45 = vld [vmem:[#allocation68_spill] sm:$0xff] }
 0x3c5   : > { %v3358_v6 = vmul.f32 %v3052_v11, %v3052_v11  ;;  %v3635_v61 = vsel %vm3633_vm10, %v3634_v18, %v3632_v57  ;;  %vm3654_vm12 = vcmp.eq.f32.partialorder %v7948_v4, 0.0  ;;  %v5395_v29 = vpop.eup %5394  ;;  %v3655_v30 = vand.u32 2147483648, %v7948_v4 }
 0x3c6   : > { %v8034_v17 = vadd.f32 %v3357_v58, %v7603_v28  ;;  %4057 = vmatmul.mubr.f32.gmra.mrb[90].mxu0 %v3635_v61  ;;  %vm3645_vm13 = vcmp.eq.f32.partialorder %v7943_v51, inf  ;;  %5402 = vrsqrt.f32 %v7978_v50  ;;  %v3653_v40 = vsel %vm3652_vm11, %v7948_v4, %v3651_v43 }
 0x3c7   : > { %v8038_v26 = vadd.f32 %v3358_v6, %v7607_v15  ;;  %v3056_v39 = vpop.f32.mrb[72].mxu1  ;;  %v3644_v15 = vmul.f32 %v5395_v29, %v7943_v51  ;;  %vm3647_vm14 = vcmp.eq.f32.partialorder %v7943_v51, 0.0  ;;  %v5397_v3 = vpop.eup %5396  ;;  %v3656_v5 = vsel %vm3654_vm12, %v3655_v30, %v3653_v40  ;;  %v8690_v40 = vld [vmem:[#allocation71_spill] sm:$0xff] }
 0x3c8   : > { %v3359_v23 = vmul.f32 %v3056_v39, %v3056_v39  ;;  %v3058_v28 = vpop.f32.mrb[73].mxu1  ;;  %v3648_v38 = vand.u32 2147483648, %v7943_v51  ;;  %5404 = vrsqrt.f32 %v8001_v20  ;;  %4061 = vmatprep.mubr.f32.mxu0 %v3656_v5  ;;  %v3665_v4 = vmul.f32 %v5397_v3, %v7965_v42 }
 0x3c9   : > { %v3360_v41 = vmul.f32 %v3058_v28, %v3058_v28  ;;  %v3646_v53 = vsel %vm3645_vm13, %v7943_v51, %v3644_v15  ;;  %vm3666_vm15 = vcmp.eq.f32.partialorder %v7965_v42, inf  ;;  %v3669_v36 = vand.u32 2147483648, %v7965_v42 }
 0x3ca   : > { %v8050_v35 = vadd.f32 %v3359_v23, %v7612_v12  ;;  %v3649_v33 = vsel %vm3647_vm14, %v3648_v38, %v3646_v53  ;;  %5406 = vrsqrt.f32 %v7996_v62  ;;  %v3667_v1 = vsel %vm3666_vm15, %v7965_v42, %v3665_v4 }
 0x3cb   : > { %v8055_v59 = vadd.f32 %v3360_v41, %v7616_v32  ;;  %v3062_v48 = vpop.f32.mrb[74].mxu1  ;;  %v5399_v12 = vpop.eup %5398  ;;  %4062 = vmatmul.mubr.f32.gmra.mrb[92].mxu0 %v3649_v33  ;;  %vm3668_vm0 = vcmp.eq.f32.partialorder %v7965_v42, 0.0  ;;  %vm3659_vm1 = vcmp.eq.f32.partialorder %v7959_v49, inf  ;;  %vm3661_vm2 = vcmp.eq.f32.partialorder %v7959_v49, 0.0 }
 0x3cc   : > { %v3361_v63 = vmul.f32 %v3062_v48, %v3062_v48  ;;  %v3064_v37 = vpop.f32.mrb[75].mxu1  ;;  %v3670_v51 = vsel %vm3668_vm0, %v3669_v36, %v3667_v1  ;;  %v3658_v19 = vmul.f32 %v5399_v12, %v7959_v49  ;;  %v3662_v7 = vand.u32 2147483648, %v7959_v49 }
 0x3cd   : > { %v3362_v32 = vmul.f32 %v3064_v37, %v3064_v37  ;;  %v5401_v44 = vpop.eup %5400  ;;  %4066 = vmatprep.mubr.f32.mxu0 %v3670_v51  ;;  %vm3680_vm3 = vcmp.eq.f32.partialorder %v7983_v55, inf  ;;  %5408 = vrsqrt.f32 %v8022_v10  ;;  %vm3682_vm4 = vcmp.eq.f32.partialorder %v7983_v55, 0.0 }
 0x3ce   : > { %v8067_v0 = vadd.f32 %v3361_v63, %v7621_v46  ;;  %v3660_v25 = vsel %vm3659_vm1, %v7959_v49, %v3658_v19  ;;  %v3679_v16 = vmul.f32 %v5401_v44, %v7983_v55  ;;  %v3683_v21 = vand.u32 2147483648, %v7983_v55  ;;  %v8688_v49 = vld [vmem:[#allocation69_spill] sm:$0xff] }
 0x3cf   : > { %v8071_v24 = vadd.f32 %v3362_v32, %v7625_v9  ;;  %v3068_v42 = vpop.f32.mrb[76].mxu1  ;;  %v3663_v47 = vsel %vm3661_vm2, %v3662_v7, %v3660_v25  ;;  %5410 = vrsqrt.f32 %v8015_v2  ;;  %vm3673_vm5 = vcmp.eq.f32.partialorder %v7978_v50, inf }
 0x3d0   : > { %v3363_v46 = vmul.f32 %v3068_v42, %v3068_v42  ;;  %v3070_v8 = vpop.f32.mrb[77].mxu1  ;;  %v5403_v9 = vpop.eup %5402  ;;  %4067 = vmatmul.mubr.f32.gmra.mrb[94].mxu0 %v3663_v47  ;;  %v3681_v14 = vsel %vm3680_vm3, %v7983_v55, %v3679_v16  ;;  %vm3675_vm6 = vcmp.eq.f32.partialorder %v7978_v50, 0.0  ;;  %5412 = vrsqrt.f32 %v8038_v26 }
 0x3d1   : > { %v3364_v31 = vmul.f32 %v3070_v8, %v3070_v8  ;;  %v3684_v13 = vsel %vm3682_vm4, %v3683_v21, %v3681_v14  ;;  %v3672_v27 = vmul.f32 %v5403_v9, %v7978_v50  ;;  %v3676_v55 = vand.u32 2147483648, %v7978_v50  ;;  %v8693_v9 = vld [vmem:[#allocation26_spill] sm:$0xff] }
 0x3d2   : > { %v8084_v34 = vadd.f32 %v3363_v46, %v8688_v49  ;;  %v5405_v54 = vpop.eup %5404  ;;  %4071 = vmatprep.mubr.f32.mxu0 %v3684_v13  ;;  %vm3694_vm7 = vcmp.eq.f32.partialorder %v8001_v20, inf  ;;  %vm3696_vm8 = vcmp.eq.f32.partialorder %v8001_v20, 0.0  ;;  %5414 = vrsqrt.f32 %v8034_v17 }
 0x3d3   : > { %v8088_v58 = vadd.f32 %v3364_v31, %v8689_v45  ;;  %v3074_v11 = vpop.f32.mrb[78].mxu1  ;;  %v3674_v22 = vsel %vm3673_vm5, %v7978_v50, %v3672_v27  ;;  %v3693_v57 = vmul.f32 %v5405_v54, %v8001_v20  ;;  %v3697_v29 = vand.u32 2147483648, %v8001_v20 }
 0x3d4   : > { %v3365_v18 = vmul.f32 %v3074_v11, %v3074_v11  ;;  %v3076_v6 = vpop.f32.mrb[79].mxu1  ;;  %v5407_v43 = vpop.eup %5406  ;;  %v3677_v39 = vsel %vm3675_vm6, %v3676_v55, %v3674_v22  ;;  %vm3687_vm9 = vcmp.eq.f32.partialorder %v7996_v62, inf  ;;  %vm3689_vm10 = vcmp.eq.f32.partialorder %v7996_v62, 0.0 }
 0x3d5   : > { %v3366_v61 = vmul.f32 %v3076_v6, %v3076_v6  ;;  %4072 = vmatmul.mubr.f32.gmra.mrb[96].mxu0 %v3677_v39  ;;  %v3695_v23 = vsel %vm3694_vm7, %v8001_v20, %v3693_v57  ;;  %v3686_v28 = vmul.f32 %v5407_v43, %v7996_v62  ;;  %v3690_v3 = vand.u32 2147483648, %v7996_v62  ;;  %v8691_v20 = vld [vmem:[#allocation70_spill] sm:$0xff] }
 0x3d6   : > { %v8102_v30 = vadd.f32 %v3365_v18, %v7639_v60  ;;  %v3698_v50 = vsel %vm3696_vm8, %v3697_v29, %v3695_v23  ;;  %5416 = vrsqrt.f32 %v8055_v59  ;;  %vm3708_vm11 = vcmp.eq.f32.partialorder %v8022_v10, inf }
 0x3d7   : > { %v8108_v15 = vadd.f32 %v3366_v61, %v8690_v40  ;;  %v3080_v41 = vpop.f32.mrb[80].mxu1  ;;  %v5409_v60 = vpop.eup %5408  ;;  %4076 = vmatprep.mubr.f32.mxu0 %v3698_v50  ;;  %v3688_v53 = vsel %vm3687_vm9, %v7996_v62, %v3686_v28  ;;  %vm3710_vm12 = vcmp.eq.f32.partialorder %v8022_v10, 0.0  ;;  %5418 = vrsqrt.f32 %v8050_v35  ;;  %v8692_v62 = vld [vmem:[#allocation72_spill] sm:$0xff]  ;;  %v8695_v61 = vld [vmem:[#allocation27_spill] sm:$0xff] }
 0x3d8   : > { %v3367_v5 = vmul.f32 %v3080_v41, %v3080_v41  ;;  %v3082_v38 = vpop.f32.mrb[81].mxu1  ;;  %v3691_v48 = vsel %vm3689_vm10, %v3690_v3, %v3688_v53  ;;  %v3707_v33 = vmul.f32 %v5409_v60, %v8022_v10  ;;  %v3711_v37 = vand.u32 2147483648, %v8022_v10  ;;  %v8696_v60 = vld [vmem:[#allocation32_spill] sm:$0xff] }
 0x3d9   : > { %v3368_v4 = vmul.f32 %v3082_v38, %v3082_v38  ;;  %v5411_v63 = vpop.eup %5410  ;;  %4077 = vmatmul.mubr.f32.gmra.mrb[98].mxu0 %v3691_v48  ;;  %vm3701_vm13 = vcmp.eq.f32.partialorder %v8015_v2, inf  ;;  %vm3703_vm14 = vcmp.eq.f32.partialorder %v8015_v2, 0.0  ;;  %5420 = vrsqrt.f32 %v8071_v24 }
 0x3da   : > { %v8119_v36 = vadd.f32 %v3367_v5, %v8691_v20  ;;  %v3709_v32 = vsel %vm3708_vm11, %v8022_v10, %v3707_v33  ;;  %v3700_v51 = vmul.f32 %v5411_v63, %v8015_v2  ;;  %v5413_v7 = vpop.eup %5412  ;;  %v3704_v25 = vand.u32 2147483648, %v8015_v2 }
 0x3db   : > { %v8126_v12 = vadd.f32 %v3368_v4, %v8692_v62  ;;  %v3086_v1 = vpop.f32.mrb[82].mxu1  ;;  %v3712_v42 = vsel %vm3710_vm12, %v3711_v37, %v3709_v32  ;;  %vm3722_vm15 = vcmp.eq.f32.partialorder %v8038_v26, inf  ;;  %v3721_v8 = vmul.f32 %v5413_v7, %v8038_v26 }
 0x3dc   : > { %v3369_v19 = vmul.f32 %v3086_v1, %v3086_v1  ;;  %v3088_v44 = vpop.f32.mrb[83].mxu1  ;;  %4081 = vmatprep.mubr.f32.mxu0 %v3712_v42  ;;  %v3702_v46 = vsel %vm3701_vm13, %v8015_v2, %v3700_v51  ;;  %vm3724_vm0 = vcmp.eq.f32.partialorder %v8038_v26, 0.0  ;;  %v5415_v21 = vpop.eup %5414  ;;  %v3725_v31 = vand.u32 2147483648, %v8038_v26  ;;  %v8698_v51 = vld [vmem:[#allocation67_spill] sm:$0xff] }
 0x3dd   : > { %v3370_v16 = vmul.f32 %v3088_v44, %v3088_v44  ;;  %v3705_v10 = vsel %vm3703_vm14, %v3704_v25, %v3702_v46  ;;  %5422 = vrsqrt.f32 %v8067_v0  ;;  %v3723_v13 = vsel %vm3722_vm15, %v8038_v26, %v3721_v8  ;;  %v8694_v26 = vld [vmem:[#allocation30_spill] sm:$0xff] }
 0x3de   : > { %v8139_v47 = vadd.f32 %v3369_v19, %v7659_v52  ;;  %4082 = vmatmul.mubr.f32.gmra.mrb[100].mxu0 %v3705_v10  ;;  %v3714_v27 = vmul.f32 %v5415_v21, %v8034_v17  ;;  %vm3715_vm1 = vcmp.eq.f32.partialorder %v8034_v17, inf  ;;  %v3726_v11 = vsel %vm3724_vm0, %v3725_v31, %v3723_v13  ;;  %v8699_v25 = vld [vmem:[#allocation34_spill] sm:$0xff]  ;;  %v8700_v21 = vld [vmem:[#allocation29_spill] sm:$0xff] }
 0x3df   : > { %v8145_v14 = vadd.f32 %v3370_v16, %v8693_v9  ;;  %v3092_v49 = vpop.f32.mrb[84].mxu1  ;;  %v3718_v2 = vand.u32 2147483648, %v8034_v17  ;;  %5424 = vrsqrt.f32 %v8088_v58  ;;  %4086 = vmatprep.mubr.f32.mxu0 %v3726_v11  ;;  %vm3717_vm2 = vcmp.eq.f32.partialorder %v8034_v17, 0.0 }
 0x3e0   : > { %v3371_v52 = vmul.f32 %v3092_v49, %v3092_v49  ;;  %v3094_v45 = vpop.f32.mrb[85].mxu1  ;;  %v5417_v55 = vpop.eup %5416  ;;  %v3716_v18 = vsel %vm3715_vm1, %v8034_v17, %v3714_v27  ;;  %vm3736_vm3 = vcmp.eq.f32.partialorder %v8055_v59, inf  ;;  %vm3738_vm4 = vcmp.eq.f32.partialorder %v8055_v59, 0.0 }
 0x3e1   : > { %v3372_v54 = vmul.f32 %v3094_v45, %v3094_v45  ;;  %v3719_v22 = vsel %vm3717_vm2, %v3718_v2, %v3716_v18  ;;  %v3735_v57 = vmul.f32 %v5417_v55, %v8055_v59  ;;  %v5419_v29 = vpop.eup %5418  ;;  %v3739_v23 = vand.u32 2147483648, %v8055_v59 }
 0x3e2   : > { %v8157_v6 = vadd.f32 %v3371_v52, %v8694_v26  ;;  %4087 = vmatmul.mubr.f32.gmra.mrb[102].mxu0 %v3719_v22  ;;  %vm3729_vm5 = vcmp.eq.f32.partialorder %v8050_v35, inf  ;;  %5426 = vrsqrt.f32 %v8084_v34  ;;  %v3728_v41 = vmul.f32 %v5419_v29, %v8050_v35  ;;  %v8702_v26 = vld [vmem:[#allocation31_spill] sm:$0xff] }
 0x3e3   : > { %v8162_v43 = vadd.f32 %v3372_v54, %v8695_v61  ;;  %v3098_v39 = vpop.f32.mrb[86].mxu1  ;;  %v3737_v40 = vsel %vm3736_vm3, %v8055_v59, %v3735_v57  ;;  %vm3731_vm6 = vcmp.eq.f32.partialorder %v8050_v35, 0.0  ;;  %v5421_v3 = vpop.eup %5420  ;;  %v3732_v38 = vand.u32 2147483648, %v8050_v35  ;;  %v8697_v59 = vld [vmem:[#allocation28_spill] sm:$0xff] }
 0x3e4   : > { %v3373_v17 = vmul.f32 %v3098_v39, %v3098_v39  ;;  %v3100_v28 = vpop.f32.mrb[87].mxu1  ;;  %v3740_v5 = vsel %vm3738_vm4, %v3739_v23, %v3737_v40  ;;  %5428 = vrsqrt.f32 %v8108_v15  ;;  %v3730_v4 = vsel %vm3729_vm5, %v8050_v35, %v3728_v41 }
 0x3e5   : > { %v3374_v50 = vmul.f32 %v3100_v28, %v3100_v28  ;;  %4091 = vmatprep.mubr.f32.mxu0 %v3740_v5  ;;  %v3749_v48 = vmul.f32 %v5421_v3, %v8071_v24  ;;  %vm3750_vm7 = vcmp.eq.f32.partialorder %v8071_v24, inf  ;;  %v3733_v63 = vsel %vm3731_vm6, %v3732_v38, %v3730_v4  ;;  %v8703_v3 = vld [vmem:[#allocation38_spill] sm:$0xff] }
 0x3e6   : > { %v8172_v53 = vadd.f32 %v3373_v17, %v8696_v60  ;;  %v3753_v37 = vand.u32 2147483648, %v8071_v24  ;;  %5430 = vrsqrt.f32 %v8102_v30  ;;  %v8185_v19 = vmul.f32 %v8698_v51, %v8698_v51  ;;  %4092 = vmatmul.mubr.f32.gmra.mrb[104].mxu0 %v3733_v63 }
 0x3e7   : > { %v8179_v33 = vadd.f32 %v3374_v50, %v8697_v59  ;;  %v3104_v20 = vpop.f32.mrb[88].mxu1  ;;  %v5423_v32 = vpop.eup %5422  ;;  %v3751_v35 = vsel %vm3750_vm7, %v8071_v24, %v3749_v48  ;;  %vm3752_vm8 = vcmp.eq.f32.partialorder %v8071_v24, 0.0  ;;  %vm3743_vm9 = vcmp.eq.f32.partialorder %v8067_v0, inf }
 0x3e8   : > { %v3375_v62 = vmul.f32 %v3104_v20, %v3104_v20  ;;  %v3106_v1 = vpop.f32.mrb[89].mxu1  ;;  %v3754_v7 = vsel %vm3752_vm8, %v3753_v37, %v3751_v35  ;;  %v3742_v42 = vmul.f32 %v5423_v32, %v8067_v0  ;;  %vm3745_vm10 = vcmp.eq.f32.partialorder %v8067_v0, 0.0 }
 0x3e9   : > { %v3376_v44 = vmul.f32 %v3106_v1, %v3106_v1  ;;  %v5425_v46 = vpop.eup %5424  ;;  %4096 = vmatprep.mubr.f32.mxu0 %v3754_v7  ;;  %v3746_v8 = vand.u32 2147483648, %v8067_v0  ;;  %5432 = vrsqrt.f32 %v8126_v12  ;;  %vm3764_vm11 = vcmp.eq.f32.partialorder %v8088_v58, inf }
 0x3ea   : > { %v8192_v16 = vadd.f32 %v3375_v62, %v8699_v25  ;;  %v3744_v24 = vsel %vm3743_vm9, %v8067_v0, %v3742_v42  ;;  %v3763_v9 = vmul.f32 %v5425_v46, %v8088_v58  ;;  %v3767_v52 = vand.u32 2147483648, %v8088_v58  ;;  %v8701_v0 = vld [vmem:[#allocation36_spill] sm:$0xff]  ;;  %v8704_v62 = vld [vmem:[#allocation66_spill] sm:$0xff] }
 0x3eb   : > { %v8197_v10 = vadd.f32 %v3376_v44, %v8700_v21  ;;  %v3110_v31 = vpop.f32.mrb[90].mxu1  ;;  %v3747_v27 = vsel %vm3745_vm10, %v3746_v8, %v3744_v24  ;;  %5434 = vrsqrt.f32 %v8119_v36  ;;  %vm3766_vm12 = vcmp.eq.f32.partialorder %v8088_v58, 0.0 }
 0x3ec   : > { %v3377_v49 = vmul.f32 %v3110_v31, %v3110_v31  ;;  %v3112_v13 = vpop.f32.mrb[91].mxu1  ;;  %v5427_v11 = vpop.eup %5426  ;;  %4097 = vmatmul.mubr.f32.gmra.mrb[106].mxu0 %v3747_v27  ;;  %v3765_v2 = vsel %vm3764_vm11, %v8088_v58, %v3763_v9  ;;  %vm3757_vm13 = vcmp.eq.f32.partialorder %v8084_v34, inf  ;;  %5436 = vrsqrt.f32 %v8145_v14 }
 0x3ed   : > { %v3378_v45 = vmul.f32 %v3112_v13, %v3112_v13  ;;  %v3768_v55 = vsel %vm3766_vm12, %v3767_v52, %v3765_v2  ;;  %v3756_v18 = vmul.f32 %v5427_v11, %v8084_v34  ;;  %vm3759_vm14 = vcmp.eq.f32.partialorder %v8084_v34, 0.0 }
 0x3ee   : > { %v8209_v54 = vadd.f32 %v3377_v49, %v8701_v0  ;;  %v5429_v61 = vpop.eup %5428  ;;  %4101 = vmatprep.mubr.f32.mxu0 %v3768_v55  ;;  %v3760_v58 = vand.u32 2147483648, %v8084_v34  ;;  %vm3778_vm15 = vcmp.eq.f32.partialorder %v8108_v15, inf  ;;  %5438 = vrsqrt.f32 %v8139_v47 }
 0x3ef   : > { %v8213_v22 = vadd.f32 %v3378_v45, %v8702_v26  ;;  %v3116_v57 = vpop.f32.mrb[92].mxu1  ;;  %v3758_v23 = vsel %vm3757_vm13, %v8084_v34, %v3756_v18  ;;  %v3777_v17 = vmul.f32 %v5429_v61, %v8108_v15  ;;  %vm3780_vm0 = vcmp.eq.f32.partialorder %v8108_v15, 0.0 }
 0x3f0   : > { %v3379_v39 = vmul.f32 %v3116_v57, %v3116_v57  ;;  %v3118_v29 = vpop.f32.mrb[93].mxu1  ;;  %v5431_v40 = vpop.eup %5430  ;;  %v3761_v41 = vsel %vm3759_vm14, %v3760_v58, %v3758_v23  ;;  %v3781_v50 = vand.u32 2147483648, %v8108_v15  ;;  %vm3771_vm1 = vcmp.eq.f32.partialorder %v8102_v30, inf }
 0x3f1   : > { %v3380_v28 = vmul.f32 %v3118_v29, %v3118_v29  ;;  %4102 = vmatmul.mubr.f32.gmra.mrb[108].mxu0 %v3761_v41  ;;  %v3779_v38 = vsel %vm3778_vm15, %v8108_v15, %v3777_v17  ;;  %v3770_v60 = vmul.f32 %v5431_v40, %v8102_v30  ;;  %v3774_v59 = vand.u32 2147483648, %v8102_v30 }
 0x3f2   : > { %v8225_v5 = vadd.f32 %v3379_v39, %v8703_v3  ;;  %v3782_v48 = vsel %vm3780_vm0, %v3781_v50, %v3779_v38  ;;  %5440 = vrsqrt.f32 %v8162_v43  ;;  %v3318_v1 = vmul.f32 %v8704_v62, %v8704_v62 }
 0x3f3   : > { %v8231_v34 = vadd.f32 %v3380_v28, %v7930_v56  ;;  %v3122_v4 = vpop.f32.mrb[94].mxu1  ;;  %v5433_v37 = vpop.eup %5432  ;;  %4106 = vmatprep.mubr.f32.mxu0 %v3782_v48  ;;  %v3772_v15 = vsel %vm3771_vm1, %v8102_v30, %v3770_v60  ;;  %vm3773_vm2 = vcmp.eq.f32.partialorder %v8102_v30, 0.0  ;;  %5442 = vrsqrt.f32 %v8157_v6 }
 0x3f4   : > { %v3381_v20 = vmul.f32 %v3122_v4, %v3122_v4  ;;  %v3124_v63 = vpop.f32.mrb[95].mxu1  ;;  %v3775_v56 = vsel %vm3773_vm2, %v3774_v59, %v3772_v15  ;;  %v3791_v51 = vmul.f32 %v5433_v37, %v8126_v12  ;;  %vm3792_vm3 = vcmp.eq.f32.partialorder %v8126_v12, inf }
 0x3f5   : > { %v3382_v32 = vmul.f32 %v3124_v63, %v3124_v63  ;;  %v5435_v44 = vpop.eup %5434  ;;  %4107 = vmatmul.mubr.f32.gmra.mrb[110].mxu0 %v3775_v56  ;;  %v3795_v7 = vand.u32 2147483648, %v8126_v12  ;;  %vm3794_vm4 = vcmp.eq.f32.partialorder %v8126_v12, 0.0  ;;  %5444 = vrsqrt.f32 %v8179_v33 }
 0x3f6   : > { %v8241_v35 = vadd.f32 %v3381_v20, %v8185_v19  ;;  %v3793_v25 = vsel %vm3792_vm3, %v8126_v12, %v3791_v51  ;;  %v3784_v30 = vmul.f32 %v5435_v44, %v8119_v36  ;;  %v5437_v19 = vpop.eup %5436  ;;  %vm3785_vm5 = vcmp.eq.f32.partialorder %v8119_v36, inf }
 0x3f7   : > { %v8246_v42 = vadd.f32 %v3382_v32, %v3318_v1  ;;  %v3796_v46 = vsel %vm3794_vm4, %v3795_v7, %v3793_v25  ;;  %v3788_v8 = vand.u32 2147483648, %v8119_v36  ;;  %5446 = vrsqrt.f32 %v8172_v53 }
 0x3f8   : > { %4111 = vmatprep.mubr.f32.mxu0 %v3796_v46  ;;  %v3786_v21 = vsel %vm3785_vm5, %v8119_v36, %v3784_v30  ;;  %vm3787_vm6 = vcmp.eq.f32.partialorder %v8119_v36, 0.0  ;;  %v3805_v31 = vmul.f32 %v5437_v19, %v8145_v14  ;;  %v5439_v12 = vpop.eup %5438  ;;  %vm3806_vm7 = vcmp.eq.f32.partialorder %v8145_v14, inf }
 0x3f9   : > { %v3789_v24 = vsel %vm3787_vm6, %v3788_v8, %v3786_v21  ;;  %v3809_v9 = vand.u32 2147483648, %v8145_v14  ;;  %5448 = vrsqrt.f32 %v8197_v10  ;;  %vm3808_vm8 = vcmp.eq.f32.partialorder %v8145_v14, 0.0 }
 0x3fa   : > { %4112 = vmatmul.mubr.f32.gmra.mrb[112].mxu0 %v3789_v24  ;;  %v3807_v49 = vsel %vm3806_vm7, %v8145_v14, %v3805_v31  ;;  %v3798_v13 = vmul.f32 %v5439_v12, %v8139_v47  ;;  %vm3799_vm9 = vcmp.eq.f32.partialorder %v8139_v47, inf  ;;  %v3802_v36 = vand.u32 2147483648, %v8139_v47 }
 0x3fb   : > { %v3810_v27 = vsel %vm3808_vm8, %v3809_v9, %v3807_v49  ;;  %5450 = vrsqrt.f32 %v8192_v16  ;;  %vm3801_vm10 = vcmp.eq.f32.partialorder %v8139_v47, 0.0  ;;  %vm3820_vm11 = vcmp.eq.f32.partialorder %v8162_v43, inf }
 0x3fc   : > { %v5441_v52 = vpop.eup %5440  ;;  %4116 = vmatprep.mubr.f32.mxu0 %v3810_v27  ;;  %v3800_v45 = vsel %vm3799_vm9, %v8139_v47, %v3798_v13  ;;  %5452 = vrsqrt.f32 %v8213_v22  ;;  %v3823_v0 = vand.u32 2147483648, %v8162_v43  ;;  %vm3822_vm12 = vcmp.eq.f32.partialorder %v8162_v43, 0.0 }
 0x3fd   : > { %v3803_v11 = vsel %vm3801_vm10, %v3802_v36, %v3800_v45  ;;  %v3819_v14 = vmul.f32 %v5441_v52, %v8162_v43  ;;  %v5443_v2 = vpop.eup %5442  ;;  %5454 = vrsqrt.f32 %v8209_v54  ;;  %vm3813_vm13 = vcmp.eq.f32.partialorder %v8157_v6, inf }
 0x3fe   : > { %4117 = vmatmul.mubr.f32.gmra.mrb[114].mxu0 %v3803_v11  ;;  %v3812_v18 = vmul.f32 %v5443_v2, %v8157_v6  ;;  %5456 = vrsqrt.f32 %v8231_v34  ;;  %v3816_v57 = vand.u32 2147483648, %v8157_v6  ;;  %vm3815_vm14 = vcmp.eq.f32.partialorder %v8157_v6, 0.0 }
 0x3ff   : > { %v3821_v55 = vsel %vm3820_vm11, %v8162_v43, %v3819_v14  ;;  %v5445_v47 = vpop.eup %5444  ;;  %5458 = vrsqrt.f32 %v8225_v5  ;;  %vm3834_vm15 = vcmp.eq.f32.partialorder %v8179_v33, inf  ;;  %v3837_v29 = vand.u32 2147483648, %v8179_v33 }
 0x400   : > { %v3824_v26 = vsel %vm3822_vm12, %v3823_v0, %v3821_v55  ;;  %v3814_v58 = vsel %vm3813_vm13, %v8157_v6, %v3812_v18  ;;  %v3833_v43 = vmul.f32 %v5445_v47, %v8179_v33  ;;  %5460 = vrsqrt.f32 %v8246_v42 }
 0x401   : > { %v5447_v61 = vpop.eup %5446  ;;  %4121 = vmatprep.mubr.f32.mxu0 %v3824_v26  ;;  %v3817_v39 = vsel %vm3815_vm14, %v3816_v57, %v3814_v58  ;;  %vm3836_vm0 = vcmp.eq.f32.partialorder %v8179_v33, 0.0  ;;  %vm3827_vm1 = vcmp.eq.f32.partialorder %v8172_v53, inf  ;;  %v3830_v6 = vand.u32 2147483648, %v8172_v53 }
 0x402   : > { %v3826_v23 = vmul.f32 %v5447_v61, %v8172_v53  ;;  %4122 = vmatmul.mubr.f32.gmra.mrb[116].mxu0 %v3817_v39  ;;  %v3835_v28 = vsel %vm3834_vm15, %v8179_v33, %v3833_v43  ;;  %5462 = vrsqrt.f32 %v8241_v35  ;;  %vm3829_vm2 = vcmp.eq.f32.partialorder %v8172_v53, 0.0 }
 0x403   : > { %v5449_v17 = vpop.eup %5448  ;;  %v3838_v40 = vsel %vm3836_vm0, %v3837_v29, %v3835_v28  ;;  %vm3848_vm3 = vcmp.eq.f32.partialorder %v8197_v10, inf  ;;  %v3851_v38 = vand.u32 2147483648, %v8197_v10  ;;  %vm3850_vm4 = vcmp.eq.f32.partialorder %v8197_v10, 0.0 }
 0x404   : > { %v3828_v41 = vsel %vm3827_vm1, %v8172_v53, %v3826_v23  ;;  %v3847_v50 = vmul.f32 %v5449_v17, %v8197_v10  ;;  %4126 = vmatprep.mubr.f32.mxu0 %v3838_v40  ;;  %vm3841_vm5 = vcmp.eq.f32.partialorder %v8192_v16, inf  ;;  %v3844_v37 = vand.u32 2147483648, %v8192_v16 }
 0x405   : > { %v5451_v3 = vpop.eup %5450  ;;  %v3831_v60 = vsel %vm3829_vm2, %v3830_v6, %v3828_v41  ;;  %vm3862_vm6 = vcmp.eq.f32.partialorder %v8213_v22, inf  ;;  %v3865_v62 = vand.u32 2147483648, %v8213_v22  ;;  %vm3843_vm7 = vcmp.eq.f32.partialorder %v8192_v16, 0.0 }
 0x406   : > { %v5453_v33 = vpop.eup %5452  ;;  %v3849_v4 = vsel %vm3848_vm3, %v8197_v10, %v3847_v50  ;;  %v3840_v48 = vmul.f32 %v5451_v3, %v8192_v16  ;;  %4127 = vmatmul.mubr.f32.gmra.mrb[118].mxu0 %v3831_v60  ;;  %vm3864_vm8 = vcmp.eq.f32.partialorder %v8213_v22, 0.0  ;;  %vm3855_vm9 = vcmp.eq.f32.partialorder %v8209_v54, inf }
 0x407   : > { %v3852_v59 = vsel %vm3850_vm4, %v3851_v38, %v3849_v4  ;;  %v3861_v20 = vmul.f32 %v5453_v33, %v8213_v22  ;;  %v5455_v63 = vpop.eup %5454  ;;  %vm3876_vm10 = vcmp.eq.f32.partialorder %v8231_v34, inf  ;;  %vm3878_vm11 = vcmp.eq.f32.partialorder %v8231_v34, 0.0 }
 0x408   : > { %4131 = vmatprep.mubr.f32.mxu0 %v3852_v59  ;;  %v3842_v53 = vsel %vm3841_vm5, %v8192_v16, %v3840_v48  ;;  %v5457_v1 = vpop.eup %5456  ;;  %v3854_v15 = vmul.f32 %v5455_v63, %v8209_v54  ;;  %v3879_v16 = vand.u32 2147483648, %v8231_v34  ;;  %vm3857_vm12 = vcmp.eq.f32.partialorder %v8209_v54, 0.0 }
 0x409   : > { %v3863_v10 = vsel %vm3862_vm6, %v8213_v22, %v3861_v20  ;;  %v5459_v32 = vpop.eup %5458  ;;  %v3845_v56 = vsel %vm3843_vm7, %v3844_v37, %v3842_v53  ;;  %v3875_v44 = vmul.f32 %v5457_v1, %v8231_v34  ;;  %v3858_v22 = vand.u32 2147483648, %v8209_v54 }
 0x40a   : > { %v3866_v51 = vsel %vm3864_vm8, %v3865_v62, %v3863_v10  ;;  %4132 = vmatmul.mubr.f32.gmra.mrb[120].mxu0 %v3845_v56  ;;  %v3856_v7 = vsel %vm3855_vm9, %v8209_v54, %v3854_v15  ;;  %v3868_v25 = vmul.f32 %v5459_v32, %v8225_v5  ;;  %v5461_v30 = vpop.eup %5460  ;;  %vm3869_vm13 = vcmp.eq.f32.partialorder %v8225_v5, inf }
 0x40b   : > { %4136 = vmatprep.mubr.f32.mxu0 %v3866_v51  ;;  %v3877_v19 = vsel %vm3876_vm10, %v8231_v34, %v3875_v44  ;;  %v3889_v8 = vmul.f32 %v5461_v30, %v8246_v42  ;;  %v3859_v31 = vsel %vm3857_vm12, %v3858_v22, %v3856_v7  ;;  %vm3890_vm14 = vcmp.eq.f32.partialorder %v8246_v42, inf }
 0x40c   : > { %v3880_v46 = vsel %vm3878_vm11, %v3879_v16, %v3877_v19  ;;  %v5463_v21 = vpop.eup %5462  ;;  %v3870_v12 = vsel %vm3869_vm13, %v8225_v5, %v3868_v25  ;;  %v3893_v9 = vand.u32 2147483648, %v8246_v42  ;;  %v3872_v54 = vand.u32 2147483648, %v8225_v5 }
 0x40d   : > { %v3891_v24 = vsel %vm3890_vm14, %v8246_v42, %v3889_v8  ;;  %v3882_v34 = vmul.f32 %v5463_v21, %v8241_v35  ;;  %vm3892_vm15 = vcmp.eq.f32.partialorder %v8246_v42, 0.0  ;;  %vm3871_vm0 = vcmp.eq.f32.partialorder %v8225_v5, 0.0 }
 0x40e   : > { %4137 = vmatmul.mubr.f32.gmra.mrb[122].mxu0 %v3859_v31  ;;  %v3894_v49 = vsel %vm3892_vm15, %v3893_v9, %v3891_v24  ;;  %v3873_v13 = vsel %vm3871_vm0, %v3872_v54, %v3870_v12  ;;  %vm3883_vm1 = vcmp.eq.f32.partialorder %v8241_v35, inf  ;;  %v3886_v36 = vand.u32 2147483648, %v8241_v35 }
 0x40f   : > { %4141 = vmatprep.mubr.f32.mxu0 %v3880_v46  ;;  %v3884_v27 = vsel %vm3883_vm1, %v8241_v35, %v3882_v34  ;;  %vm3885_vm2 = vcmp.eq.f32.partialorder %v8241_v35, 0.0 }
 0x410   : > { %v3887_v52 = vsel %vm3885_vm2, %v3886_v36, %v3884_v27 }
 0x412   : > { %4142 = vmatmul.mubr.f32.gmra.mrb[124].mxu0 %v3873_v13 }
 0x413   : > { %4146 = vmatprep.mubr.f32.mxu0 %v3894_v49 }
 0x416   : > { %4147 = vmatmul.mubr.f32.gmra.mrb[126].mxu0 %v3887_v52 }
 0x460   : > { %v3993_v45 = vpop.f32.mrb[64].mxu0 }
 0x461   : > { %4152 = vxpose.xlu0.b32.start [1/16] (narrow) %v3993_v45, 80  ;;  %v3995_v11 = vpop.f32.mrb[65].mxu0 }
 0x464   : > { %v3998_v42 = vpop.f32.mrb[66].mxu0 }
 0x465   : > { %4153 = vxpose.xlu0.b32.cont [2/16] (narrow) %v3998_v42, 80  ;;  %v4000_v5 = vpop.f32.mrb[67].mxu0 }
 0x468   : > { %v4003_v14 = vpop.f32.mrb[68].mxu0 }
 0x469   : > { %4154 = vxpose.xlu0.b32.cont [3/16] (narrow) %v4003_v14, 80  ;;  %v4005_v2 = vpop.f32.mrb[69].mxu0 }
 0x46c   : > { %v4008_v0 = vpop.f32.mrb[70].mxu0 }
 0x46d   : > { %4155 = vxpose.xlu0.b32.cont [4/16] (narrow) %v4008_v0, 80  ;;  %v4010_v55 = vpop.f32.mrb[71].mxu0 }
 0x470   : > { %v4013_v18 = vpop.f32.mrb[72].mxu0 }
 0x471   : > { %4156 = vxpose.xlu0.b32.cont [5/16] (narrow) %v4013_v18, 80  ;;  %v4015_v47 = vpop.f32.mrb[73].mxu0 }
 0x474   : > { %v4018_v26 = vpop.f32.mrb[74].mxu0 }
 0x475   : > { %4157 = vxpose.xlu0.b32.cont [6/16] (narrow) %v4018_v26, 80  ;;  %v4020_v35 = vpop.f32.mrb[75].mxu0 }
 0x478   : > { %v4023_v57 = vpop.f32.mrb[76].mxu0 }
 0x479   : > { %4158 = vxpose.xlu0.b32.cont [7/16] (narrow) %v4023_v57, 80  ;;  %v4025_v61 = vpop.f32.mrb[77].mxu0 }
 0x47c   : > { %v4028_v58 = vpop.f32.mrb[78].mxu0 }
 0x47d   : > { %4159 = vxpose.xlu0.b32.cont [8/16] (narrow) %v4028_v58, 80  ;;  %v4030_v43 = vpop.f32.mrb[79].mxu0 }
 0x481   : > { %v4033_v39 = vpop.f32.mrb[80].mxu0 }
 0x482   : > { %4160 = vxpose.xlu0.b32.cont [9/16] (narrow) %v4033_v39, 80  ;;  %v4035_v29 = vpop.f32.mrb[81].mxu0 }
 0x487   : > { %v4038_v23 = vpop.f32.mrb[82].mxu0 }
 0x488   : > { %4161 = vxpose.xlu0.b32.cont [10/16] (narrow) %v4038_v23, 80  ;;  %v4040_v17 = vpop.f32.mrb[83].mxu0 }
 0x48c   : > { %v4043_v28 = vpop.f32.mrb[84].mxu0 }
 0x48d   : > { %4162 = vxpose.xlu0.b32.cont [11/16] (narrow) %v4043_v28, 80  ;;  %v4045_v6 = vpop.f32.mrb[85].mxu0 }
 0x490   : > { %v4048_v40 = vpop.f32.mrb[86].mxu0 }
 0x491   : > { %4163 = vxpose.xlu0.b32.cont [12/16] (narrow) %v4048_v40, 80  ;;  %v4050_v41 = vpop.f32.mrb[87].mxu0 }
 0x495   : > { %v4053_v50 = vpop.f32.mrb[88].mxu0 }
 0x496   : > { %4164 = vxpose.xlu0.b32.cont [13/16] (narrow) %v4053_v50, 80  ;;  %v4055_v3 = vpop.f32.mrb[89].mxu0 }
 0x499   : > { %v4058_v38 = vpop.f32.mrb[90].mxu0 }
 0x49a   : > { %4165 = vxpose.xlu0.b32.cont [14/16] (narrow) %v4058_v38, 80  ;;  %v4060_v33 = vpop.f32.mrb[91].mxu0 }
 0x49e   : > { %v4063_v60 = vpop.f32.mrb[92].mxu0 }
 0x49f   : > { %4166 = vxpose.xlu0.b32.cont [15/16] (narrow) %v4063_v60, 80  ;;  %v4065_v4 = vpop.f32.mrb[93].mxu0 }
 0x4a3   : > { %v4068_v48 = vpop.f32.mrb[94].mxu0 }
 0x4a4   : > { %4167 = vxpose.xlu0.b32.end [16/16] (narrow) %v4068_v48, 80  ;;  %v4070_v59 = vpop.f32.mrb[95].mxu0 }
 0x4a8   : > { %v4073_v20 = vpop.f32.mrb[96].mxu0 }
 0x4a9   : > { %4184 = vxpose.xlu1.b32.start [1/16] (narrow) %v4073_v20, 80  ;;  %v4075_v63 = vpop.f32.mrb[97].mxu0 }
 0x4ac   : > { %v4078_v53 = vpop.f32.mrb[98].mxu0 }
 0x4ad   : > { %4185 = vxpose.xlu1.b32.cont [2/16] (narrow) %v4078_v53, 80  ;;  %v4080_v37 = vpop.f32.mrb[99].mxu0 }
 0x4b1   : > { %v4083_v62 = vpop.f32.mrb[100].mxu0 }
 0x4b2   : > { %4186 = vxpose.xlu1.b32.cont [3/16] (narrow) %v4083_v62, 80  ;;  %v4085_v1 = vpop.f32.mrb[101].mxu0 }
 0x4b5   : > { %v4088_v10 = vpop.f32.mrb[102].mxu0 }
 0x4b6   : > { %4187 = vxpose.xlu1.b32.cont [4/16] (narrow) %v4088_v10, 80  ;;  %v4090_v15 = vpop.f32.mrb[103].mxu0 }
 0x4b9   : > { %v4093_v32 = vpop.f32.mrb[104].mxu0 }
 0x4ba   : > { %4188 = vxpose.xlu1.b32.cont [5/16] (narrow) %v4093_v32, 80  ;;  %v4095_v56 = vpop.f32.mrb[105].mxu0 }
 0x4bf   : > { %v4098_v51 = vpop.f32.mrb[106].mxu0 }
 0x4c0   : > { %4189 = vxpose.xlu1.b32.cont [6/16] (narrow) %v4098_v51, 80  ;;  %v4100_v44 = vpop.f32.mrb[107].mxu0 }
 0x4c4   : > { %v4103_v7 = vpop.f32.mrb[108].mxu0 }
 0x4c5   : > { %4190 = vxpose.xlu1.b32.cont [7/16] (narrow) %v4103_v7, 80  ;;  %v4105_v16 = vpop.f32.mrb[109].mxu0 }
 0x4c8   : > { %v4108_v25 = vpop.f32.mrb[110].mxu0 }
 0x4c9   : > { %4191 = vxpose.xlu1.b32.cont [8/16] (narrow) %v4108_v25, 80  ;;  %v4110_v30 = vpop.f32.mrb[111].mxu0 }
 0x4cd   : > { %v4113_v22 = vpop.f32.mrb[112].mxu0 }
 0x4ce   : > { %4192 = vxpose.xlu1.b32.cont [9/16] (narrow) %v4113_v22, 80  ;;  %v4115_v19 = vpop.f32.mrb[113].mxu0 }
 0x4d1   : > { %v4118_v46 = vpop.f32.mrb[114].mxu0 }
 0x4d2   : > { %4193 = vxpose.xlu1.b32.cont [10/16] (narrow) %v4118_v46, 80  ;;  %v4120_v8 = vpop.f32.mrb[115].mxu0 }
 0x4d5   : > { %v4123_v21 = vpop.f32.mrb[116].mxu0 }
 0x4d6   : > { %4194 = vxpose.xlu1.b32.cont [11/16] (narrow) %v4123_v21, 80  ;;  %v4125_v31 = vpop.f32.mrb[117].mxu0 }
 0x4d9   : > { %v4128_v12 = vpop.f32.mrb[118].mxu0 }
 0x4da   : > { %4195 = vxpose.xlu1.b32.cont [12/16] (narrow) %v4128_v12, 80  ;;  %v4130_v24 = vpop.f32.mrb[119].mxu0 }
 0x4dd   : > { %v4133_v9 = vpop.f32.mrb[120].mxu0 }
 0x4de   : > { %4196 = vxpose.xlu1.b32.cont [13/16] (narrow) %v4133_v9, 80  ;;  %v4135_v34 = vpop.f32.mrb[121].mxu0 }
 0x4e1   : > { %v4138_v54 = vpop.f32.mrb[122].mxu0 }
 0x4e2   : > { %4197 = vxpose.xlu1.b32.cont [14/16] (narrow) %v4138_v54, 80  ;;  %v4140_v49 = vpop.f32.mrb[123].mxu0 }
 0x4e5   : > { %v4143_v13 = vpop.f32.mrb[124].mxu0 }
 0x4e6   : > { %4198 = vxpose.xlu1.b32.cont [15/16] (narrow) %v4143_v13, 80  ;;  %v4145_v27 = vpop.f32.mrb[125].mxu0 }
 0x4e8   : > { %v4168_v36 = vpop.trf.xlu0 }
 0x4e9   : > { %v4216_v52 = vmul.f32 10000.0, %v4168_v36  ;;  %v4148_v45 = vpop.f32.mrb[126].mxu0 }
 0x4ea   : > { %4199 = vxpose.xlu1.b32.end [16/16] (narrow) %v4148_v45, 80  ;;  %v4150_v11 = vpop.f32.mrb[127].mxu0 }
 0x4eb   : > { %v4236_v42 = vadd.f32 1.0, %v4216_v52 }
 0x4ec   : > { %v4169_v5 = vpop.trf.xlu0 }
 0x4ed   : > { %5464 = vlog2.f32 %v4236_v42  ;;  %v4218_v14 = vmul.f32 10000.0, %v4169_v5 }
 0x4ef   : > { %v4238_v2 = vadd.f32 1.0, %v4218_v14 }
 0x4f0   : > { %v4170_v0 = vpop.trf.xlu0 }
 0x4f1   : > { %5466 = vlog2.f32 %v4238_v2  ;;  %v4220_v55 = vmul.f32 10000.0, %v4170_v0 }
 0x4f3   : > { %v4240_v18 = vadd.f32 1.0, %v4220_v55 }
 0x4f4   : > { %v4171_v47 = vpop.trf.xlu0 }
 0x4f5   : > { %5468 = vlog2.f32 %v4240_v18  ;;  %v4222_v26 = vmul.f32 10000.0, %v4171_v47 }
 0x4f7   : > { %v5465_v35 = vpop.eup %5464  ;;  %v4242_v57 = vadd.f32 1.0, %v4222_v26 }
 0x4f8   : > { %v4257_v61 = vmul.f32 0.6931472, %v5465_v35  ;;  %v4172_v58 = vpop.trf.xlu0 }
 0x4f9   : > { %5470 = vlog2.f32 %v4242_v57  ;;  %v4224_v43 = vmul.f32 10000.0, %v4172_v58 }
 0x4fa   : > { %4296 = vst [vmem:[%s8336_s8] sm:$0xff] %v4257_v61 }
 0x4fb   : > { %v5467_v39 = vpop.eup %5466  ;;  %v4244_v29 = vadd.f32 1.0, %v4224_v43 }
 0x4fc   : > { %v4261_v23 = vmul.f32 0.6931472, %v5467_v39  ;;  %v4173_v17 = vpop.trf.xlu0 }
 0x4fd   : > { %5472 = vlog2.f32 %v4244_v29  ;;  %v4226_v28 = vmul.f32 10000.0, %v4173_v17 }
 0x4fe   : > { %4298 = vst [vmem:[%s8336_s8 + $0x10] sm:$0xff] %v4261_v23 }
 0x4ff   : > { %v5469_v6 = vpop.eup %5468  ;;  %v4246_v40 = vadd.f32 1.0, %v4226_v28 }
 0x500   : > { %v4265_v41 = vmul.f32 0.6931472, %v5469_v6  ;;  %v4174_v50 = vpop.trf.xlu0 }
 0x501   : > { %5474 = vlog2.f32 %v4246_v40  ;;  %v4228_v3 = vmul.f32 10000.0, %v4174_v50 }
 0x502   : > { %4300 = vst [vmem:[%s8336_s8 + $0x20] sm:$0xff] %v4265_v41 }
 0x503   : > { %v5471_v38 = vpop.eup %5470  ;;  %v4248_v33 = vadd.f32 1.0, %v4228_v3 }
 0x504   : > { %v4269_v60 = vmul.f32 0.6931472, %v5471_v38  ;;  %v4175_v4 = vpop.trf.xlu0 }
 0x505   : > { %5476 = vlog2.f32 %v4248_v33  ;;  %v4230_v48 = vmul.f32 10000.0, %v4175_v4 }
 0x506   : > { %4302 = vst [vmem:[%s8336_s8 + $0x30] sm:$0xff] %v4269_v60 }
 0x507   : > { %v5473_v59 = vpop.eup %5472  ;;  %v4250_v20 = vadd.f32 1.0, %v4230_v48 }
 0x508   : > { %v4273_v63 = vmul.f32 0.6931472, %v5473_v59  ;;  %v4176_v53 = vpop.trf.xlu0 }
 0x509   : > { %5478 = vlog2.f32 %v4250_v20  ;;  %v4232_v37 = vmul.f32 10000.0, %v4176_v53 }
 0x50a   : > { %4304 = vst [vmem:[%s8336_s8 + $0x40] sm:$0xff] %v4273_v63 }
 0x50b   : > { %v5475_v62 = vpop.eup %5474  ;;  %v4252_v1 = vadd.f32 1.0, %v4232_v37 }
 0x50c   : > { %v4277_v10 = vmul.f32 0.6931472, %v5475_v62  ;;  %v4177_v15 = vpop.trf.xlu0 }
 0x50d   : > { %5480 = vlog2.f32 %v4252_v1  ;;  %v4234_v32 = vmul.f32 10000.0, %v4177_v15 }
 0x50e   : > { %4306 = vst [vmem:[%s8336_s8 + $0x50] sm:$0xff] %v4277_v10 }
 0x50f   : > { %v5477_v56 = vpop.eup %5476  ;;  %v4254_v51 = vadd.f32 1.0, %v4234_v32 }
 0x510   : > { %v4281_v44 = vmul.f32 0.6931472, %v5477_v56 }
 0x511   : > { %5482 = vlog2.f32 %v4254_v51 }
 0x512   : > { %4308 = vst [vmem:[%s8336_s8 + $0x60] sm:$0xff] %v4281_v44 }
 0x513   : > { %v5479_v7 = vpop.eup %5478 }
 0x514   : > { %v4285_v16 = vmul.f32 0.6931472, %v5479_v7 }
 0x516   : > { %4310 = vst [vmem:[%s8336_s8 + $0x70] sm:$0xff] %v4285_v16 }
 0x517   : > { %v5481_v25 = vpop.eup %5480 }
 0x518   : > { %v4289_v30 = vmul.f32 0.6931472, %v5481_v25 }
 0x51a   : > { %4312 = vst [vmem:[%s8336_s8 + $0x80] sm:$0xff] %v4289_v30 }
 0x51b   : > { %v5483_v22 = vpop.eup %5482 }
 0x51c   : > { %v4293_v19 = vmul.f32 0.6931472, %v5483_v22 }
 0x51e   : > { %4314 = vst [vmem:[%s8336_s8 + $0x90] sm:$0xff] %v4293_v19 }
 0x52e   : > { %v4200_v46 = vpop.trf.xlu1 }
 0x52f   : > { %v4217_v8 = vmul.f32 10000.0, %v4200_v46 }
 0x531   : > { %v4237_v21 = vadd.f32 1.0, %v4217_v8 }
 0x532   : > { %v4201_v31 = vpop.trf.xlu1 }
 0x533   : > { %5484 = vlog2.f32 %v4237_v21  ;;  %v4219_v12 = vmul.f32 10000.0, %v4201_v31 }
 0x535   : > { %v4239_v24 = vadd.f32 1.0, %v4219_v12 }
 0x536   : > { %v4202_v9 = vpop.trf.xlu1 }
 0x537   : > { %5486 = vlog2.f32 %v4239_v24  ;;  %v4221_v34 = vmul.f32 10000.0, %v4202_v9 }
 0x539   : > { %v4241_v54 = vadd.f32 1.0, %v4221_v34 }
 0x53a   : > { %v4203_v49 = vpop.trf.xlu1 }
 0x53b   : > { %5488 = vlog2.f32 %v4241_v54  ;;  %v4223_v13 = vmul.f32 10000.0, %v4203_v49 }
 0x53d   : > { %v5485_v27 = vpop.eup %5484  ;;  %v4243_v36 = vadd.f32 1.0, %v4223_v13 }
 0x53e   : > { %v4259_v52 = vmul.f32 0.6931472, %v5485_v27  ;;  %v4204_v45 = vpop.trf.xlu1 }
 0x53f   : > { %5490 = vlog2.f32 %v4243_v36  ;;  %v4225_v11 = vmul.f32 10000.0, %v4204_v45 }
 0x540   : > { %4297 = vst [vmem:[%s8336_s8 + $0x8] sm:$0xff] %v4259_v52 }
 0x541   : > { %v5487_v42 = vpop.eup %5486  ;;  %v4245_v5 = vadd.f32 1.0, %v4225_v11 }
 0x542   : > { %v4263_v14 = vmul.f32 0.6931472, %v5487_v42  ;;  %v4205_v2 = vpop.trf.xlu1 }
 0x543   : > { %5492 = vlog2.f32 %v4245_v5  ;;  %v4227_v0 = vmul.f32 10000.0, %v4205_v2 }
 0x544   : > { %4299 = vst [vmem:[%s8336_s8 + $0x18] sm:$0xff] %v4263_v14 }
 0x545   : > { %v5489_v55 = vpop.eup %5488  ;;  %v4247_v18 = vadd.f32 1.0, %v4227_v0 }
 0x546   : > { %v4267_v47 = vmul.f32 0.6931472, %v5489_v55  ;;  %v4206_v26 = vpop.trf.xlu1 }
 0x547   : > { %5494 = vlog2.f32 %v4247_v18  ;;  %v4229_v35 = vmul.f32 10000.0, %v4206_v26 }
 0x548   : > { %4301 = vst [vmem:[%s8336_s8 + $0x28] sm:$0xff] %v4267_v47 }
 0x549   : > { %v5491_v57 = vpop.eup %5490  ;;  %v4249_v61 = vadd.f32 1.0, %v4229_v35 }
 0x54a   : > { %v4271_v58 = vmul.f32 0.6931472, %v5491_v57  ;;  %v4207_v43 = vpop.trf.xlu1 }
 0x54b   : > { %5496 = vlog2.f32 %v4249_v61  ;;  %v4231_v39 = vmul.f32 10000.0, %v4207_v43 }
 0x54c   : > { %4303 = vst [vmem:[%s8336_s8 + $0x38] sm:$0xff] %v4271_v58 }
 0x54d   : > { %v5493_v29 = vpop.eup %5492  ;;  %v4251_v23 = vadd.f32 1.0, %v4231_v39 }
 0x54e   : > { %v4275_v17 = vmul.f32 0.6931472, %v5493_v29  ;;  %v4208_v28 = vpop.trf.xlu1 }
 0x54f   : > { %5498 = vlog2.f32 %v4251_v23  ;;  %v4233_v6 = vmul.f32 10000.0, %v4208_v28 }
 0x550   : > { %4305 = vst [vmem:[%s8336_s8 + $0x48] sm:$0xff] %v4275_v17 }
 0x551   : > { %v5495_v40 = vpop.eup %5494  ;;  %v4253_v41 = vadd.f32 1.0, %v4233_v6 }
 0x552   : > { %v4279_v50 = vmul.f32 0.6931472, %v5495_v40  ;;  %v4209_v3 = vpop.trf.xlu1 }
 0x553   : > { %5500 = vlog2.f32 %v4253_v41  ;;  %v4235_v38 = vmul.f32 10000.0, %v4209_v3 }
 0x554   : > { %4307 = vst [vmem:[%s8336_s8 + $0x58] sm:$0xff] %v4279_v50 }
 0x555   : > { %v5497_v33 = vpop.eup %5496  ;;  %v4255_v60 = vadd.f32 1.0, %v4235_v38 }
 0x556   : > { %v4283_v4 = vmul.f32 0.6931472, %v5497_v33 }
 0x557   : > { %5502 = vlog2.f32 %v4255_v60 }
 0x558   : > { %4309 = vst [vmem:[%s8336_s8 + $0x68] sm:$0xff] %v4283_v4 }
 0x559   : > { %v5499_v48 = vpop.eup %5498 }
 0x55a   : > { %v4287_v59 = vmul.f32 0.6931472, %v5499_v48 }
 0x55c   : > { %4311 = vst [vmem:[%s8336_s8 + $0x78] sm:$0xff] %v4287_v59 }
 0x55d   : > { %v5501_v20 = vpop.eup %5500 }
 0x55e   : > { %v4291_v63 = vmul.f32 0.6931472, %v5501_v20 }
 0x560   : > { %4313 = vst [vmem:[%s8336_s8 + $0x88] sm:$0xff] %v4291_v63 }
 0x561   : > { %v5503_v53 = vpop.eup %5502 }
 0x562   : > { %v4295_v37 = vmul.f32 0.6931472, %v5503_v53 }
 0x564   : > { %4315 = vst [vmem:[%s8336_s8 + $0x98] sm:$0xff] %v4295_v37 }
 0x565   : > { %5663 = shalt.err (!%p5660_p3)
}
 0x566   : > { %s5664_s12 = scalar_lea.hbm %s8365_s15, 2560  ;;  %s5668_s8 = scalar_lea.hbm %s8708_s29, 10240 }
 0x567   : > { %p5665_p0 = scmp.ne.s32.totalorder %s8365_s15, %s5664_s12  ;;  %p5669_p2 = scmp.lt.u32.totalorder %s8365_s15, %s8708_s29 }
 0x568   : > { %p5670_p5 = scmp.lt.u32.totalorder %s5668_s8, %s5664_s12  ;;  %p5672_p12 = scmp.lt.u32.totalorder %s5664_s12, %s8365_s15 }
 0x569   : > { %p5666_p7 = pnand %p5665_p0, %p8709_p8 }
 0x56a   : > { %p5671_p11 = por %p5670_p5, %p5669_p2 }
 0x56b   : > { %p5667_p4 = pneg %p5666_p7 }
 0x56c   : > { %p5673_p9 = por %p5672_p12, %p5671_p11 }
 0x56e   : > { %p5674_p1 = pnand %p5673_p9, %p5667_p4 }
 0x570   : > { %5677 = shalt.err (!%p5674_p1)
}
 0x571   : > { %s5801_s2 = smov 256   ;;  %s5802_s14 = smov 512  }
 0x572   : > { %s5803_s6 = smov 16  }
 0x573   : > { %5217 = dma.vmem_to_hbm [thread:$0]  (%p8709_p8), %s8360_s7, 2560, %s8365_s15, %s4317_s27, %s5801_s2, %s5802_s14, %s5803_s6  }
 0x574 PF: > { %s8710_s10 = sld [smem:[#allocation16_spill]]  ;;  %s8711_s22 = sld [smem:[#allocation25_spill]] }
 0x575   : > { %p5234_p6 = scmp.ge.s32.totalorder %s5786_s25, 2 }
 0x57a   : > { %s4347_s30 = sand.u32 1, %s8710_s10   ;;  %p8712_p10 = scmp.ne.s32.totalorder %s8711_s22, 0 }
 0x57b   : > { %s4348_s18 = scalar_lea.sflag [#allocation4], %s4347_s30 }
 0x57c   : > { %p5227_p13 = pnand %p5234_p6, %p8712_p10 }
 0x57e   : > { %5739 = dma.done.wait (!%p5227_p13), %s4348_s18, 2560  }
 0x57f   : > { %5741 = vsyncadd (!%p5227_p13), %s4348_s18, 4294964736  ;;  %s24_s25 = sadd.s32 1, %s5786_s25   ;;  %s8713_s5 = sld [smem:[#allocation23_spill]] }
 0x580   : > { %p21_p3 = scmp.ge.s32.totalorder %s24_s25, 6   ;;  %s8714_s4 = sld [smem:[#allocation22_spill]] }
 0x581   : > { %s8715_s21 = sld [smem:[#allocation19_spill]]  ;;  %s8716_s23 = sld [smem:[#allocation20_spill]] }
 0x582   : > { %s8717_s13 = sld [smem:[#allocation21_spill]]  ;;  %s8718_s15 = smov %s5750_s16 }
 0x583   : > { %s8719_s16 = smov %s5754_s17  ;;  %s8721_s18 = smov %s5762_s19 }
 0x584   : > { %s8722_s19 = smov %s5766_s20  ;;  %s8724_s22 = smov %s5782_s24 }
 0x585   : > { %s8720_s17 = smov %s8713_s5  ;;  %23 = sbr.rel (!%p21_p3) target bundleno = 15 (0xf), region = 102 }
 0x586   : > { %s8723_s20 = smov %s8714_s4 }
 0x588   : > { %s8725_s24 = smov %s8717_s13 }
 0x58c   :  { %4353 = vsyncpa [#allocation3], 1 }
 0x58d   :  { %4355 = vsyncpa [#allocation3 + $0x1], 1 }
 0x58e   :  { %4356 = vsyncpa [#allocation6], 1 }
 0x58f   :  { %4358 = vsyncpa [#allocation6 + $0x1], 1 }
 0x590   :  { %4359 = vsyncpa [#allocation9], 1 }
 0x591   :  { %4360 = vsyncpa [#allocation4], 1 }
 0x592   :  { %4362 = vsyncpa [#allocation4 + $0x1], 1 }

</bundles_post_ra>
